<compile_context>
chip_gen: v6e
topology: v6e:2x2x1
jax: 0.10.0
libtpu: 0.0.40
codegen_flags: <defaults>
</compile_context>

<pallas_src>
import functools

import jax
import jax.numpy as jnp
import numpy as np
from jax import lax
from jax.experimental import pallas as pl
from jax.experimental.pallas import tpu as pltpu


# ----------------------------------------------------------------------------
# Fused kernel: LSTM layer 1 -> LSTM layer 2 -> Linear head
# ----------------------------------------------------------------------------
def fused_name_lstm_kernel(
    x_ref,        # (N, Din)   bf16, N = T * Bp, time-major flattened input
    wih1_ref,     # (Din, 4H)  bf16
    whh1_ref,     # (H, 4H)    bf16
    b1_ref,       # (1, 4H)    f32   (b_ih + b_hh, layer 1)
    wih2_ref,     # (H, 4H)    bf16
    whh2_ref,     # (H, 4H)    bf16
    b2_ref,       # (1, 4H)    f32   (b_ih + b_hh, layer 2)
    wfc_ref,      # (H, Vp)    bf16  (lane-padded FC weight)
    bfc_ref,      # (1, Vp)    f32   (lane-padded FC bias)
    out_ref,      # (N, Vp)    f32   logits, lane-dense single store
    gx_sc,        # (N, 4H)    f32   precomputed input->gate projection
    h1seq_sc,     # (N, H)     f32   layer-1 hidden sequence
    h2seq_sc,     # (N, H)     f32   layer-2 hidden sequence
    h_sc,         # (Bp, H)    f32   recurrent hidden state
    c_sc,         # (Bp, H)    f32   recurrent cell state
    *, T, Bp,
):
    H = whh1_ref.shape[0]

    def recurrence(whh_ref, hseq_sc):
        """Run the LSTM recurrence over gates precomputed into gx_sc."""
        h_sc[...] = jnp.zeros_like(h_sc)
        c_sc[...] = jnp.zeros_like(c_sc)

        def step(t, carry):
            row = pl.multiple_of(t * Bp, Bp)
            # Only the hidden->gates matmul is on the serial critical path.
            gates = gx_sc[pl.ds(row, Bp), :] + jnp.dot(
                h_sc[...].astype(jnp.bfloat16), whh_ref[...],
                preferred_element_type=jnp.float32)          # (Bp, 4H) f32
            i_g = jax.nn.sigmoid(gates[:, 0 * H:1 * H])
            f_g = jax.nn.sigmoid(gates[:, 1 * H:2 * H])
            g_g = jnp.tanh(gates[:, 2 * H:3 * H])
            o_g = jax.nn.sigmoid(gates[:, 3 * H:4 * H])
            c_new = f_g * c_sc[...] + i_g * g_g
            h_new = o_g * jnp.tanh(c_new)
            c_sc[...] = c_new
            h_sc[...] = h_new
            hseq_sc[pl.ds(row, Bp), :] = h_new               # full-vreg store
            return carry

        lax.fori_loop(0, T, step, 0, unroll=True)

    # ---- Layer 1: hoisted input->gates projection (bias folded in once) ----
    gx_sc[...] = (
        jnp.dot(x_ref[...], wih1_ref[...], preferred_element_type=jnp.float32)
        + b1_ref[...]
    )
    recurrence(whh1_ref, h1seq_sc)

    # ---- Layer 2: same, fed from the layer-1 hidden sequence in VMEM ----
    gx_sc[...] = (
        jnp.dot(h1seq_sc[...].astype(jnp.bfloat16), wih2_ref[...],
                preferred_element_type=jnp.float32)
        + b2_ref[...]
    )
    recurrence(whh2_ref, h2seq_sc)

    # ---- FC head: one (N, H) @ (H, Vp) matmul, single lane-dense store ----
    out_ref[...] = (
        jnp.dot(h2seq_sc[...].astype(jnp.bfloat16), wfc_ref[...],
                preferred_element_type=jnp.float32)
        + bfc_ref[...]
    )


# ----------------------------------------------------------------------------
# Wrapper (single pallas_call; cheap pad/transpose glue only)
# ----------------------------------------------------------------------------
def _vmem():
    return pl.BlockSpec(memory_space=pltpu.MemorySpace.VMEM)


@jax.jit
def name_generator_lstm_forward(x_btd, kp):
    """Equivalent of NameGeneratorLSTM.forward.  x_btd: (B, T, input_size)."""
    B, T, Din = x_btd.shape
    V = Din                                   # fc maps hidden -> input_size
    l1, l2 = kp["lstm"]                       # fused kernel assumes num_layers=2
    H = l1["whh_t"].shape[0]
    V_pad = kp["fc_w"].shape[1]
    B_pad = ((B + 7) // 8) * 8                # full f32 sublane group
    N = T * B_pad

    # Time-major, batch-padded, flattened, bf16 matmul operand (one small
    # fused XLA op; everything heavy happens inside the single kernel).
    x_tm = jnp.transpose(x_btd, (1, 0, 2))                     # (T, B, Din)
    x_tm = jnp.pad(x_tm, ((0, 0), (0, B_pad - B), (0, 0)))     # (T, Bp, Din)
    x_flat = x_tm.reshape(N, Din).astype(jnp.bfloat16)         # (N, Din)

    out_flat = pl.pallas_call(
        functools.partial(fused_name_lstm_kernel, T=T, Bp=B_pad),
        out_shape=jax.ShapeDtypeStruct((N, V_pad), jnp.float32),
        in_specs=[_vmem()] * 9,
        out_specs=_vmem(),
        scratch_shapes=[
            pltpu.VMEM((N, 4 * H), jnp.float32),   # gx: input->gate projection
            pltpu.VMEM((N, H), jnp.float32),       # layer-1 hidden sequence
            pltpu.VMEM((N, H), jnp.float32),       # layer-2 hidden sequence
            pltpu.VMEM((B_pad, H), jnp.float32),   # h state
            pltpu.VMEM((B_pad, H), jnp.float32),   # c state
        ],
    )(x_flat,
      l1["wih_t"], l1["whh_t"], l1["b"],
      l2["wih_t"], l2["whh_t"], l2["b"],
      kp["fc_w"], kp["fc_b"])

    out = out_flat.reshape(T, B_pad, V_pad)[:, :B, :V]         # (T, B, V)
    return jnp.transpose(out, (1, 0, 2))                       # (B, T, V)


# ----------------------------------------------------------------------------
# Parameter init (PyTorch-style uniform(-1/sqrt(H), 1/sqrt(H))) + kernel prep
# ----------------------------------------------------------------------------
def init_params(key, input_size, hidden_size, num_layers):
    k = 1.0 / np.sqrt(hidden_size)
    layers = []
    for layer in range(num_layers):
        din = input_size if layer == 0 else hidden_size
        key, k1, k2, k3, k4 = jax.random.split(key, 5)
        w_ih = jax.random.uniform(k1, (4 * hidden_size, din), jnp.float32, -k, k)
        w_hh = jax.random.uniform(k2, (4 * hidden_size, hidden_size), jnp.float32, -k, k)
        b_ih = jax.random.uniform(k3, (4 * hidden_size,), jnp.float32, -k, k)
        b_hh = jax.random.uniform(k4, (4 * hidden_size,), jnp.float32, -k, k)
        layers.append({
            "wih_t": w_ih.T,                               # (Din, 4H)
            "whh_t": w_hh.T,                               # (H, 4H)
            "b": (b_ih + b_hh).reshape(1, 4 * hidden_size),
        })
    key, k5, k6 = jax.random.split(key, 3)
    w_fc = jax.random.uniform(k5, (input_size, hidden_size), jnp.float32, -k, k)
    b_fc = jax.random.uniform(k6, (input_size,), jnp.float32, -k, k)
    return {
        "lstm": layers,
        "fc": {"w_t": w_fc.T, "b": b_fc.reshape(1, input_size)},
    }


def prepare_kernel_params(params):
    """One-time prep: bf16 matmul weights + lane-padded (V -> 128) FC head."""
    H = params["lstm"][0]["whh_t"].shape[0]
    V = params["fc"]["w_t"].shape[1]
    V_pad = ((V + 127) // 128) * 128
    wfc_pad = jnp.zeros((H, V_pad), jnp.bfloat16).at[:, :V].set(
        params["fc"]["w_t"].astype(jnp.bfloat16))
    bfc_pad = jnp.zeros((1, V_pad), jnp.float32).at[:, :V].set(params["fc"]["b"])
    layers = []
    for lyr in params["lstm"]:
        layers.append({
            "wih_t": lyr["wih_t"].astype(jnp.bfloat16),
            "whh_t": lyr["whh_t"].astype(jnp.bfloat16),
            "b": lyr["b"],                     # biases stay f32
        })
    return {"lstm": layers, "fc_w": wfc_pad, "fc_b": bfc_pad}


# ----------------------------------------------------------------------------
# Pure-JAX f32 reference (for a correctness cross-check)
# ----------------------------------------------------------------------------
def reference_forward(x_btd, params):
    B, T, _ = x_btd.shape
    h_seq = x_btd
    for layer in params["lstm"]:
        H = layer["whh_t"].shape[0]
        h = jnp.zeros((B, H), jnp.float32)
        c = jnp.zeros((B, H), jnp.float32)
        outs = []
        for t in range(T):
            gates = h_seq[:, t, :] @ layer["wih_t"] + h @ layer["whh_t"] + layer["b"]
            i_g = jax.nn.sigmoid(gates[:, 0 * H:1 * H])
            f_g = jax.nn.sigmoid(gates[:, 1 * H:2 * H])
            g_g = jnp.tanh(gates[:, 2 * H:3 * H])
            o_g = jax.nn.sigmoid(gates[:, 3 * H:4 * H])
            c = f_g * c + i_g * g_g
            h = o_g * jnp.tanh(c)
            outs.append(h)
        h_seq = jnp.stack(outs, axis=1)
    return h_seq @ params["fc"]["w_t"] + params["fc"]["b"]


# ----------------------------------------------------------------------------
if __name__ == "__main__":
    INPUT_SIZE = 32      # vocab size (input_size in the module)
    HIDDEN = 128         # module default hidden_size
    NUM_LAYERS = 2       # fused kernel is specialized to the module default
    BATCH = 2
    SEQ = 8

    root = jax.random.PRNGKey(0)
    pkey, xkey = jax.random.split(root)
    params = init_params(pkey, INPUT_SIZE, HIDDEN, NUM_LAYERS)
    kparams = prepare_kernel_params(params)
    x = jax.random.normal(xkey, (BATCH, SEQ, INPUT_SIZE), jnp.float32)

    out = name_generator_lstm_forward(x, kparams)
    out = jax.block_until_ready(out)
    assert out.shape == (BATCH, SEQ, INPUT_SIZE), out.shape

    ref = jax.block_until_ready(reference_forward(x, params))
    # bf16 MXU operands (f32 accumulate) vs. the f32 reference: loosened tol.
    np.testing.assert_allclose(np.asarray(out), np.asarray(ref),
                               rtol=5e-2, atol=5e-2)

    print("KERNEL_OK")
</pallas_src>

<mosaic_0001>
module attributes {stable_mosaic.version = 11 : i64} {
  func.func @fused_name_lstm_kernel(%arg0: memref<64x32xbf16, #tpu.memory_space<vmem>>, %arg1: memref<32x512xbf16, #tpu.memory_space<vmem>>, %arg2: memref<128x512xbf16, #tpu.memory_space<vmem>>, %arg3: memref<1x512xf32, #tpu.memory_space<vmem>>, %arg4: memref<128x512xbf16, #tpu.memory_space<vmem>>, %arg5: memref<128x512xbf16, #tpu.memory_space<vmem>>, %arg6: memref<1x512xf32, #tpu.memory_space<vmem>>, %arg7: memref<128x128xbf16, #tpu.memory_space<vmem>>, %arg8: memref<1x128xf32, #tpu.memory_space<vmem>>, %arg9: memref<64x128xf32, #tpu.memory_space<vmem>>, %arg10: memref<64x512xf32, #tpu.memory_space<vmem>>, %arg11: memref<64x128xf32, #tpu.memory_space<vmem>>, %arg12: memref<64x128xf32, #tpu.memory_space<vmem>>, %arg13: memref<8x128xf32, #tpu.memory_space<vmem>>, %arg14: memref<8x128xf32, #tpu.memory_space<vmem>>) attributes {dimension_semantics = [], scalar_prefetch = 0 : i64, scratch_operands = 5 : i64, tpu.core_type = #tpu.core_type<tc>} {
    %c0 = arith.constant 0 : index
    %c0_0 = arith.constant 0 : index
    %0 = vector.load %arg0[%c0, %c0_0] : memref<64x32xbf16, #tpu.memory_space<vmem>>, vector<64x32xbf16>
    %c0_1 = arith.constant 0 : index
    %c0_2 = arith.constant 0 : index
    %1 = vector.load %arg1[%c0_1, %c0_2] : memref<32x512xbf16, #tpu.memory_space<vmem>>, vector<32x512xbf16>
    %cst = arith.constant dense<0.000000e+00> : vector<64x512xf32>
    %2 = tpu.matmul %0, %1, %cst {dimension_numbers = #tpu.dot_dimension_numbers<[1], [0], [0], [1], [0, 0, 1, 1], [], []>} : vector<64x32xbf16>, vector<32x512xbf16>, vector<64x512xf32> -> vector<64x512xf32>
    %c0_3 = arith.constant 0 : index
    %c0_4 = arith.constant 0 : index
    %3 = vector.load %arg3[%c0_3, %c0_4] : memref<1x512xf32, #tpu.memory_space<vmem>>, vector<1x512xf32>
    %4 = vector.broadcast %3 : vector<1x512xf32> to vector<64x512xf32>
    %5 = arith.addf %2, %4 : vector<64x512xf32>
    %c0_5 = arith.constant 0 : index
    %c0_6 = arith.constant 0 : index
    %6 = vector.load %arg10[%c0_5, %c0_6] : memref<64x512xf32, #tpu.memory_space<vmem>>, vector<64x512xf32>
    tpu.vector_store %arg10[%c0_5, %c0_6], %5 {strides = array<i32>} : memref<64x512xf32, #tpu.memory_space<vmem>>, vector<64x512xf32>,
    %cst_7 = arith.constant 0.000000e+00 : f32
    %7 = vector.broadcast %cst_7 : f32 to vector<8x128xf32>
    %c0_8 = arith.constant 0 : index
    %c0_9 = arith.constant 0 : index
    %8 = vector.load %arg13[%c0_8, %c0_9] : memref<8x128xf32, #tpu.memory_space<vmem>>, vector<8x128xf32>
    tpu.vector_store %arg13[%c0_8, %c0_9], %7 {strides = array<i32>} : memref<8x128xf32, #tpu.memory_space<vmem>>, vector<8x128xf32>,
    %cst_10 = arith.constant 0.000000e+00 : f32
    %9 = vector.broadcast %cst_10 : f32 to vector<8x128xf32>
    %c0_11 = arith.constant 0 : index
    %c0_12 = arith.constant 0 : index
    %10 = vector.load %arg14[%c0_11, %c0_12] : memref<8x128xf32, #tpu.memory_space<vmem>>, vector<8x128xf32>
    tpu.vector_store %arg14[%c0_11, %c0_12], %9 {strides = array<i32>} : memref<8x128xf32, #tpu.memory_space<vmem>>, vector<8x128xf32>,
    %c0_i32 = arith.constant 0 : i32
    %c8_i32 = arith.constant 8 : i32
    %11 = arith.muli %c0_i32, %c8_i32 : i32
    %12 = tpu.assume_multiple %11, 8 : i32
    %13 = arith.index_cast %12 : i32 to index
    %c0_13 = arith.constant 0 : index
    %14 = vector.load %arg10[%13, %c0_13] : memref<64x512xf32, #tpu.memory_space<vmem>>, vector<8x512xf32>
    %c0_14 = arith.constant 0 : index
    %c0_15 = arith.constant 0 : index
    %15 = vector.load %arg13[%c0_14, %c0_15] : memref<8x128xf32, #tpu.memory_space<vmem>>, vector<8x128xf32>
    %16 = arith.truncf %15 : vector<8x128xf32> to vector<8x128xbf16>
    %c0_16 = arith.constant 0 : index
    %c0_17 = arith.constant 0 : index
    %17 = vector.load %arg2[%c0_16, %c0_17] : memref<128x512xbf16, #tpu.memory_space<vmem>>, vector<128x512xbf16>
    %cst_18 = arith.constant dense<0.000000e+00> : vector<8x512xf32>
    %18 = tpu.matmul %16, %17, %cst_18 {dimension_numbers = #tpu.dot_dimension_numbers<[1], [0], [0], [1], [0, 0, 1, 1], [], []>} : vector<8x128xbf16>, vector<128x512xbf16>, vector<8x512xf32> -> vector<8x512xf32>
    %19 = arith.addf %14, %18 : vector<8x512xf32>
    %20 = vector.extract_strided_slice %19 {offsets = [0, 0], sizes = [8, 128], strides = [1, 1]} : vector<8x512xf32> to vector<8x128xf32>
    %21 = arith.negf %20 : vector<8x128xf32>
    %22 = math.exp %21 : vector<8x128xf32>
    %cst_19 = arith.constant 1.000000e+00 : f32
    %23 = vector.broadcast %cst_19 : f32 to vector<8x128xf32>
    %24 = arith.addf %23, %22 : vector<8x128xf32>
    %25 = arith.divf %23, %24 : vector<8x128xf32>
    %26 = vector.extract_strided_slice %19 {offsets = [0, 128], sizes = [8, 128], strides = [1, 1]} : vector<8x512xf32> to vector<8x128xf32>
    %27 = arith.negf %26 : vector<8x128xf32>
    %28 = math.exp %27 : vector<8x128xf32>
    %cst_20 = arith.constant 1.000000e+00 : f32
    %29 = vector.broadcast %cst_20 : f32 to vector<8x128xf32>
    %30 = arith.addf %29, %28 : vector<8x128xf32>
    %31 = arith.divf %29, %30 : vector<8x128xf32>
    %32 = vector.extract_strided_slice %19 {offsets = [0, 256], sizes = [8, 128], strides = [1, 1]} : vector<8x512xf32> to vector<8x128xf32>
    %33 = math.tanh %32 : vector<8x128xf32>
    %34 = vector.extract_strided_slice %19 {offsets = [0, 384], sizes = [8, 128], strides = [1, 1]} : vector<8x512xf32> to vector<8x128xf32>
    %35 = arith.negf %34 : vector<8x128xf32>
    %36 = math.exp %35 : vector<8x128xf32>
    %cst_21 = arith.constant 1.000000e+00 : f32
    %37 = vector.broadcast %cst_21 : f32 to vector<8x128xf32>
    %38 = arith.addf %37, %36 : vector<8x128xf32>
    %39 = arith.divf %37, %38 : vector<8x128xf32>
    %c0_22 = arith.constant 0 : index
    %c0_23 = arith.constant 0 : index
    %40 = vector.load %arg14[%c0_22, %c0_23] : memref<8x128xf32, #tpu.memory_space<vmem>>, vector<8x128xf32>
    %41 = arith.mulf %31, %40 : vector<8x128xf32>
    %42 = arith.mulf %25, %33 : vector<8x128xf32>
    %43 = arith.addf %41, %42 : vector<8x128xf32>
    %44 = math.tanh %43 : vector<8x128xf32>
    %45 = arith.mulf %39, %44 : vector<8x128xf32>
    %c0_24 = arith.constant 0 : index
    %c0_25 = arith.constant 0 : index
    %46 = vector.load %arg14[%c0_24, %c0_25] : memref<8x128xf32, #tpu.memory_space<vmem>>, vector<8x128xf32>
    tpu.vector_store %arg14[%c0_24, %c0_25], %43 {strides = array<i32>} : memref<8x128xf32, #tpu.memory_space<vmem>>, vector<8x128xf32>,
    %c0_26 = arith.constant 0 : index
    %c0_27 = arith.constant 0 : index
    %47 = vector.load %arg13[%c0_26, %c0_27] : memref<8x128xf32, #tpu.memory_space<vmem>>, vector<8x128xf32>
    tpu.vector_store %arg13[%c0_26, %c0_27], %45 {strides = array<i32>} : memref<8x128xf32, #tpu.memory_space<vmem>>, vector<8x128xf32>,
    %48 = arith.index_cast %12 : i32 to index
    %c0_28 = arith.constant 0 : index
    %49 = vector.load %arg11[%48, %c0_28] : memref<64x128xf32, #tpu.memory_space<vmem>>, vector<8x128xf32>
    tpu.vector_store %arg11[%48, %c0_28], %45 {strides = array<i32>} : memref<64x128xf32, #tpu.memory_space<vmem>>, vector<8x128xf32>,
    %c1_i32 = arith.constant 1 : i32
    %c8_i32_29 = arith.constant 8 : i32
    %50 = arith.muli %c1_i32, %c8_i32_29 : i32
    %51 = tpu.assume_multiple %50, 8 : i32
    %52 = arith.index_cast %51 : i32 to index
    %c0_30 = arith.constant 0 : index
    %53 = vector.load %arg10[%52, %c0_30] : memref<64x512xf32, #tpu.memory_space<vmem>>, vector<8x512xf32>
    %c0_31 = arith.constant 0 : index
    %c0_32 = arith.constant 0 : index
    %54 = vector.load %arg13[%c0_31, %c0_32] : memref<8x128xf32, #tpu.memory_space<vmem>>, vector<8x128xf32>
    %55 = arith.truncf %54 : vector<8x128xf32> to vector<8x128xbf16>
    %c0_33 = arith.constant 0 : index
    %c0_34 = arith.constant 0 : index
    %56 = vector.load %arg2[%c0_33, %c0_34] : memref<128x512xbf16, #tpu.memory_space<vmem>>, vector<128x512xbf16>
    %cst_35 = arith.constant dense<0.000000e+00> : vector<8x512xf32>
    %57 = tpu.matmul %55, %56, %cst_35 {dimension_numbers = #tpu.dot_dimension_numbers<[1], [0], [0], [1], [0, 0, 1, 1], [], []>} : vector<8x128xbf16>, vector<128x512xbf16>, vector<8x512xf32> -> vector<8x512xf32>
    %58 = arith.addf %53, %57 : vector<8x512xf32>
    %59 = vector.extract_strided_slice %58 {offsets = [0, 0], sizes = [8, 128], strides = [1, 1]} : vector<8x512xf32> to vector<8x128xf32>
    %60 = arith.negf %59 : vector<8x128xf32>
    %61 = math.exp %60 : vector<8x128xf32>
    %cst_36 = arith.constant 1.000000e+00 : f32
    %62 = vector.broadcast %cst_36 : f32 to vector<8x128xf32>
    %63 = arith.addf %62, %61 : vector<8x128xf32>
    %64 = arith.divf %62, %63 : vector<8x128xf32>
    %65 = vector.extract_strided_slice %58 {offsets = [0, 128], sizes = [8, 128], strides = [1, 1]} : vector<8x512xf32> to vector<8x128xf32>
    %66 = arith.negf %65 : vector<8x128xf32>
    %67 = math.exp %66 : vector<8x128xf32>
    %cst_37 = arith.constant 1.000000e+00 : f32
    %68 = vector.broadcast %cst_37 : f32 to vector<8x128xf32>
    %69 = arith.addf %68, %67 : vector<8x128xf32>
    %70 = arith.divf %68, %69 : vector<8x128xf32>
    %71 = vector.extract_strided_slice %58 {offsets = [0, 256], sizes = [8, 128], strides = [1, 1]} : vector<8x512xf32> to vector<8x128xf32>
    %72 = math.tanh %71 : vector<8x128xf32>
    %73 = vector.extract_strided_slice %58 {offsets = [0, 384], sizes = [8, 128], strides = [1, 1]} : vector<8x512xf32> to vector<8x128xf32>
    %74 = arith.negf %73 : vector<8x128xf32>
    %75 = math.exp %74 : vector<8x128xf32>
    %cst_38 = arith.constant 1.000000e+00 : f32
    %76 = vector.broadcast %cst_38 : f32 to vector<8x128xf32>
    %77 = arith.addf %76, %75 : vector<8x128xf32>
    %78 = arith.divf %76, %77 : vector<8x128xf32>
    %c0_39 = arith.constant 0 : index
    %c0_40 = arith.constant 0 : index
    %79 = vector.load %arg14[%c0_39, %c0_40] : memref<8x128xf32, #tpu.memory_space<vmem>>, vector<8x128xf32>
    %80 = arith.mulf %70, %79 : vector<8x128xf32>
    %81 = arith.mulf %64, %72 : vector<8x128xf32>
    %82 = arith.addf %80, %81 : vector<8x128xf32>
    %83 = math.tanh %82 : vector<8x128xf32>
    %84 = arith.mulf %78, %83 : vector<8x128xf32>
    %c0_41 = arith.constant 0 : index
    %c0_42 = arith.constant 0 : index
    %85 = vector.load %arg14[%c0_41, %c0_42] : memref<8x128xf32, #tpu.memory_space<vmem>>, vector<8x128xf32>
    tpu.vector_store %arg14[%c0_41, %c0_42], %82 {strides = array<i32>} : memref<8x128xf32, #tpu.memory_space<vmem>>, vector<8x128xf32>,
    %c0_43 = arith.constant 0 : index
    %c0_44 = arith.constant 0 : index
    %86 = vector.load %arg13[%c0_43, %c0_44] : memref<8x128xf32, #tpu.memory_space<vmem>>, vector<8x128xf32>
    tpu.vector_store %arg13[%c0_43, %c0_44], %84 {strides = array<i32>} : memref<8x128xf32, #tpu.memory_space<vmem>>, vector<8x128xf32>,
    %87 = arith.index_cast %51 : i32 to index
    %c0_45 = arith.constant 0 : index
    %88 = vector.load %arg11[%87, %c0_45] : memref<64x128xf32, #tpu.memory_space<vmem>>, vector<8x128xf32>
    tpu.vector_store %arg11[%87, %c0_45], %84 {strides = array<i32>} : memref<64x128xf32, #tpu.memory_space<vmem>>, vector<8x128xf32>,
    %c2_i32 = arith.constant 2 : i32
    %c8_i32_46 = arith.constant 8 : i32
    %89 = arith.muli %c2_i32, %c8_i32_46 : i32
    %90 = tpu.assume_multiple %89, 8 : i32
    %91 = arith.index_cast %90 : i32 to index
    %c0_47 = arith.constant 0 : index
    %92 = vector.load %arg10[%91, %c0_47] : memref<64x512xf32, #tpu.memory_space<vmem>>, vector<8x512xf32>
    %c0_48 = arith.constant 0 : index
    %c0_49 = arith.constant 0 : index
    %93 = vector.load %arg13[%c0_48, %c0_49] : memref<8x128xf32, #tpu.memory_space<vmem>>, vector<8x128xf32>
    %94 = arith.truncf %93 : vector<8x128xf32> to vector<8x128xbf16>
    %c0_50 = arith.constant 0 : index
    %c0_51 = arith.constant 0 : index
    %95 = vector.load %arg2[%c0_50, %c0_51] : memref<128x512xbf16, #tpu.memory_space<vmem>>, vector<128x512xbf16>
    %cst_52 = arith.constant dense<0.000000e+00> : vector<8x512xf32>
    %96 = tpu.matmul %94, %95, %cst_52 {dimension_numbers = #tpu.dot_dimension_numbers<[1], [0], [0], [1], [0, 0, 1, 1], [], []>} : vector<8x128xbf16>, vector<128x512xbf16>, vector<8x512xf32> -> vector<8x512xf32>
    %97 = arith.addf %92, %96 : vector<8x512xf32>
    %98 = vector.extract_strided_slice %97 {offsets = [0, 0], sizes = [8, 128], strides = [1, 1]} : vector<8x512xf32> to vector<8x128xf32>
    %99 = arith.negf %98 : vector<8x128xf32>
    %100 = math.exp %99 : vector<8x128xf32>
    %cst_53 = arith.constant 1.000000e+00 : f32
    %101 = vector.broadcast %cst_53 : f32 to vector<8x128xf32>
    %102 = arith.addf %101, %100 : vector<8x128xf32>
    %103 = arith.divf %101, %102 : vector<8x128xf32>
    %104 = vector.extract_strided_slice %97 {offsets = [0, 128], sizes = [8, 128], strides = [1, 1]} : vector<8x512xf32> to vector<8x128xf32>
    %105 = arith.negf %104 : vector<8x128xf32>
    %106 = math.exp %105 : vector<8x128xf32>
    %cst_54 = arith.constant 1.000000e+00 : f32
    %107 = vector.broadcast %cst_54 : f32 to vector<8x128xf32>
    %108 = arith.addf %107, %106 : vector<8x128xf32>
    %109 = arith.divf %107, %108 : vector<8x128xf32>
    %110 = vector.extract_strided_slice %97 {offsets = [0, 256], sizes = [8, 128], strides = [1, 1]} : vector<8x512xf32> to vector<8x128xf32>
    %111 = math.tanh %110 : vector<8x128xf32>
    %112 = vector.extract_strided_slice %97 {offsets = [0, 384], sizes = [8, 128], strides = [1, 1]} : vector<8x512xf32> to vector<8x128xf32>
    %113 = arith.negf %112 : vector<8x128xf32>
    %114 = math.exp %113 : vector<8x128xf32>
    %cst_55 = arith.constant 1.000000e+00 : f32
    %115 = vector.broadcast %cst_55 : f32 to vector<8x128xf32>
    %116 = arith.addf %115, %114 : vector<8x128xf32>
    %117 = arith.divf %115, %116 : vector<8x128xf32>
    %c0_56 = arith.constant 0 : index
    %c0_57 = arith.constant 0 : index
    %118 = vector.load %arg14[%c0_56, %c0_57] : memref<8x128xf32, #tpu.memory_space<vmem>>, vector<8x128xf32>
    %119 = arith.mulf %109, %118 : vector<8x128xf32>
    %120 = arith.mulf %103, %111 : vector<8x128xf32>
    %121 = arith.addf %119, %120 : vector<8x128xf32>
    %122 = math.tanh %121 : vector<8x128xf32>
    %123 = arith.mulf %117, %122 : vector<8x128xf32>
    %c0_58 = arith.constant 0 : index
    %c0_59 = arith.constant 0 : index
    %124 = vector.load %arg14[%c0_58, %c0_59] : memref<8x128xf32, #tpu.memory_space<vmem>>, vector<8x128xf32>
    tpu.vector_store %arg14[%c0_58, %c0_59], %121 {strides = array<i32>} : memref<8x128xf32, #tpu.memory_space<vmem>>, vector<8x128xf32>,
    %c0_60 = arith.constant 0 : index
    %c0_61 = arith.constant 0 : index
    %125 = vector.load %arg13[%c0_60, %c0_61] : memref<8x128xf32, #tpu.memory_space<vmem>>, vector<8x128xf32>
    tpu.vector_store %arg13[%c0_60, %c0_61], %123 {strides = array<i32>} : memref<8x128xf32, #tpu.memory_space<vmem>>, vector<8x128xf32>,
    %126 = arith.index_cast %90 : i32 to index
    %c0_62 = arith.constant 0 : index
    %127 = vector.load %arg11[%126, %c0_62] : memref<64x128xf32, #tpu.memory_space<vmem>>, vector<8x128xf32>
    tpu.vector_store %arg11[%126, %c0_62], %123 {strides = array<i32>} : memref<64x128xf32, #tpu.memory_space<vmem>>, vector<8x128xf32>,
    %c3_i32 = arith.constant 3 : i32
    %c8_i32_63 = arith.constant 8 : i32
    %128 = arith.muli %c3_i32, %c8_i32_63 : i32
    %129 = tpu.assume_multiple %128, 8 : i32
    %130 = arith.index_cast %129 : i32 to index
    %c0_64 = arith.constant 0 : index
    %131 = vector.load %arg10[%130, %c0_64] : memref<64x512xf32, #tpu.memory_space<vmem>>, vector<8x512xf32>
    %c0_65 = arith.constant 0 : index
    %c0_66 = arith.constant 0 : index
    %132 = vector.load %arg13[%c0_65, %c0_66] : memref<8x128xf32, #tpu.memory_space<vmem>>, vector<8x128xf32>
    %133 = arith.truncf %132 : vector<8x128xf32> to vector<8x128xbf16>
    %c0_67 = arith.constant 0 : index
    %c0_68 = arith.constant 0 : index
    %134 = vector.load %arg2[%c0_67, %c0_68] : memref<128x512xbf16, #tpu.memory_space<vmem>>, vector<128x512xbf16>
    %cst_69 = arith.constant dense<0.000000e+00> : vector<8x512xf32>
    %135 = tpu.matmul %133, %134, %cst_69 {dimension_numbers = #tpu.dot_dimension_numbers<[1], [0], [0], [1], [0, 0, 1, 1], [], []>} : vector<8x128xbf16>, vector<128x512xbf16>, vector<8x512xf32> -> vector<8x512xf32>
    %136 = arith.addf %131, %135 : vector<8x512xf32>
    %137 = vector.extract_strided_slice %136 {offsets = [0, 0], sizes = [8, 128], strides = [1, 1]} : vector<8x512xf32> to vector<8x128xf32>
    %138 = arith.negf %137 : vector<8x128xf32>
    %139 = math.exp %138 : vector<8x128xf32>
    %cst_70 = arith.constant 1.000000e+00 : f32
    %140 = vector.broadcast %cst_70 : f32 to vector<8x128xf32>
    %141 = arith.addf %140, %139 : vector<8x128xf32>
    %142 = arith.divf %140, %141 : vector<8x128xf32>
    %143 = vector.extract_strided_slice %136 {offsets = [0, 128], sizes = [8, 128], strides = [1, 1]} : vector<8x512xf32> to vector<8x128xf32>
    %144 = arith.negf %143 : vector<8x128xf32>
    %145 = math.exp %144 : vector<8x128xf32>
    %cst_71 = arith.constant 1.000000e+00 : f32
    %146 = vector.broadcast %cst_71 : f32 to vector<8x128xf32>
    %147 = arith.addf %146, %145 : vector<8x128xf32>
    %148 = arith.divf %146, %147 : vector<8x128xf32>
    %149 = vector.extract_strided_slice %136 {offsets = [0, 256], sizes = [8, 128], strides = [1, 1]} : vector<8x512xf32> to vector<8x128xf32>
    %150 = math.tanh %149 : vector<8x128xf32>
    %151 = vector.extract_strided_slice %136 {offsets = [0, 384], sizes = [8, 128], strides = [1, 1]} : vector<8x512xf32> to vector<8x128xf32>
    %152 = arith.negf %151 : vector<8x128xf32>
    %153 = math.exp %152 : vector<8x128xf32>
    %cst_72 = arith.constant 1.000000e+00 : f32
    %154 = vector.broadcast %cst_72 : f32 to vector<8x128xf32>
    %155 = arith.addf %154, %153 : vector<8x128xf32>
    %156 = arith.divf %154, %155 : vector<8x128xf32>
    %c0_73 = arith.constant 0 : index
    %c0_74 = arith.constant 0 : index
    %157 = vector.load %arg14[%c0_73, %c0_74] : memref<8x128xf32, #tpu.memory_space<vmem>>, vector<8x128xf32>
    %158 = arith.mulf %148, %157 : vector<8x128xf32>
    %159 = arith.mulf %142, %150 : vector<8x128xf32>
    %160 = arith.addf %158, %159 : vector<8x128xf32>
    %161 = math.tanh %160 : vector<8x128xf32>
    %162 = arith.mulf %156, %161 : vector<8x128xf32>
    %c0_75 = arith.constant 0 : index
    %c0_76 = arith.constant 0 : index
    %163 = vector.load %arg14[%c0_75, %c0_76] : memref<8x128xf32, #tpu.memory_space<vmem>>, vector<8x128xf32>
    tpu.vector_store %arg14[%c0_75, %c0_76], %160 {strides = array<i32>} : memref<8x128xf32, #tpu.memory_space<vmem>>, vector<8x128xf32>,
    %c0_77 = arith.constant 0 : index
    %c0_78 = arith.constant 0 : index
    %164 = vector.load %arg13[%c0_77, %c0_78] : memref<8x128xf32, #tpu.memory_space<vmem>>, vector<8x128xf32>
    tpu.vector_store %arg13[%c0_77, %c0_78], %162 {strides = array<i32>} : memref<8x128xf32, #tpu.memory_space<vmem>>, vector<8x128xf32>,
    %165 = arith.index_cast %129 : i32 to index
    %c0_79 = arith.constant 0 : index
    %166 = vector.load %arg11[%165, %c0_79] : memref<64x128xf32, #tpu.memory_space<vmem>>, vector<8x128xf32>
    tpu.vector_store %arg11[%165, %c0_79], %162 {strides = array<i32>} : memref<64x128xf32, #tpu.memory_space<vmem>>, vector<8x128xf32>,
    %c4_i32 = arith.constant 4 : i32
    %c8_i32_80 = arith.constant 8 : i32
    %167 = arith.muli %c4_i32, %c8_i32_80 : i32
    %168 = tpu.assume_multiple %167, 8 : i32
    %169 = arith.index_cast %168 : i32 to index
    %c0_81 = arith.constant 0 : index
    %170 = vector.load %arg10[%169, %c0_81] : memref<64x512xf32, #tpu.memory_space<vmem>>, vector<8x512xf32>
    %c0_82 = arith.constant 0 : index
    %c0_83 = arith.constant 0 : index
    %171 = vector.load %arg13[%c0_82, %c0_83] : memref<8x128xf32, #tpu.memory_space<vmem>>, vector<8x128xf32>
    %172 = arith.truncf %171 : vector<8x128xf32> to vector<8x128xbf16>
    %c0_84 = arith.constant 0 : index
    %c0_85 = arith.constant 0 : index
    %173 = vector.load %arg2[%c0_84, %c0_85] : memref<128x512xbf16, #tpu.memory_space<vmem>>, vector<128x512xbf16>
    %cst_86 = arith.constant dense<0.000000e+00> : vector<8x512xf32>
    %174 = tpu.matmul %172, %173, %cst_86 {dimension_numbers = #tpu.dot_dimension_numbers<[1], [0], [0], [1], [0, 0, 1, 1], [], []>} : vector<8x128xbf16>, vector<128x512xbf16>, vector<8x512xf32> -> vector<8x512xf32>
    %175 = arith.addf %170, %174 : vector<8x512xf32>
    %176 = vector.extract_strided_slice %175 {offsets = [0, 0], sizes = [8, 128], strides = [1, 1]} : vector<8x512xf32> to vector<8x128xf32>
    %177 = arith.negf %176 : vector<8x128xf32>
    %178 = math.exp %177 : vector<8x128xf32>
    %cst_87 = arith.constant 1.000000e+00 : f32
    %179 = vector.broadcast %cst_87 : f32 to vector<8x128xf32>
    %180 = arith.addf %179, %178 : vector<8x128xf32>
    %181 = arith.divf %179, %180 : vector<8x128xf32>
    %182 = vector.extract_strided_slice %175 {offsets = [0, 128], sizes = [8, 128], strides = [1, 1]} : vector<8x512xf32> to vector<8x128xf32>
    %183 = arith.negf %182 : vector<8x128xf32>
    %184 = math.exp %183 : vector<8x128xf32>
    %cst_88 = arith.constant 1.000000e+00 : f32
    %185 = vector.broadcast %cst_88 : f32 to vector<8x128xf32>
    %186 = arith.addf %185, %184 : vector<8x128xf32>
    %187 = arith.divf %185, %186 : vector<8x128xf32>
    %188 = vector.extract_strided_slice %175 {offsets = [0, 256], sizes = [8, 128], strides = [1, 1]} : vector<8x512xf32> to vector<8x128xf32>
    %189 = math.tanh %188 : vector<8x128xf32>
    %190 = vector.extract_strided_slice %175 {offsets = [0, 384], sizes = [8, 128], strides = [1, 1]} : vector<8x512xf32> to vector<8x128xf32>
    %191 = arith.negf %190 : vector<8x128xf32>
    %192 = math.exp %191 : vector<8x128xf32>
    %cst_89 = arith.constant 1.000000e+00 : f32
    %193 = vector.broadcast %cst_89 : f32 to vector<8x128xf32>
    %194 = arith.addf %193, %192 : vector<8x128xf32>
    %195 = arith.divf %193, %194 : vector<8x128xf32>
    %c0_90 = arith.constant 0 : index
    %c0_91 = arith.constant 0 : index
    %196 = vector.load %arg14[%c0_90, %c0_91] : memref<8x128xf32, #tpu.memory_space<vmem>>, vector<8x128xf32>
    %197 = arith.mulf %187, %196 : vector<8x128xf32>
    %198 = arith.mulf %181, %189 : vector<8x128xf32>
    %199 = arith.addf %197, %198 : vector<8x128xf32>
    %200 = math.tanh %199 : vector<8x128xf32>
    %201 = arith.mulf %195, %200 : vector<8x128xf32>
    %c0_92 = arith.constant 0 : index
    %c0_93 = arith.constant 0 : index
    %202 = vector.load %arg14[%c0_92, %c0_93] : memref<8x128xf32, #tpu.memory_space<vmem>>, vector<8x128xf32>
    tpu.vector_store %arg14[%c0_92, %c0_93], %199 {strides = array<i32>} : memref<8x128xf32, #tpu.memory_space<vmem>>, vector<8x128xf32>,
    %c0_94 = arith.constant 0 : index
    %c0_95 = arith.constant 0 : index
    %203 = vector.load %arg13[%c0_94, %c0_95] : memref<8x128xf32, #tpu.memory_space<vmem>>, vector<8x128xf32>
    tpu.vector_store %arg13[%c0_94, %c0_95], %201 {strides = array<i32>} : memref<8x128xf32, #tpu.memory_space<vmem>>, vector<8x128xf32>,
    %204 = arith.index_cast %168 : i32 to index
    %c0_96 = arith.constant 0 : index
    %205 = vector.load %arg11[%204, %c0_96] : memref<64x128xf32, #tpu.memory_space<vmem>>, vector<8x128xf32>
    tpu.vector_store %arg11[%204, %c0_96], %201 {strides = array<i32>} : memref<64x128xf32, #tpu.memory_space<vmem>>, vector<8x128xf32>,
    %c5_i32 = arith.constant 5 : i32
    %c8_i32_97 = arith.constant 8 : i32
    %206 = arith.muli %c5_i32, %c8_i32_97 : i32
    %207 = tpu.assume_multiple %206, 8 : i32
    %208 = arith.index_cast %207 : i32 to index
    %c0_98 = arith.constant 0 : index
    %209 = vector.load %arg10[%208, %c0_98] : memref<64x512xf32, #tpu.memory_space<vmem>>, vector<8x512xf32>
    %c0_99 = arith.constant 0 : index
    %c0_100 = arith.constant 0 : index
    %210 = vector.load %arg13[%c0_99, %c0_100] : memref<8x128xf32, #tpu.memory_space<vmem>>, vector<8x128xf32>
    %211 = arith.truncf %210 : vector<8x128xf32> to vector<8x128xbf16>
    %c0_101 = arith.constant 0 : index
    %c0_102 = arith.constant 0 : index
    %212 = vector.load %arg2[%c0_101, %c0_102] : memref<128x512xbf16, #tpu.memory_space<vmem>>, vector<128x512xbf16>
    %cst_103 = arith.constant dense<0.000000e+00> : vector<8x512xf32>
    %213 = tpu.matmul %211, %212, %cst_103 {dimension_numbers = #tpu.dot_dimension_numbers<[1], [0], [0], [1], [0, 0, 1, 1], [], []>} : vector<8x128xbf16>, vector<128x512xbf16>, vector<8x512xf32> -> vector<8x512xf32>
    %214 = arith.addf %209, %213 : vector<8x512xf32>
    %215 = vector.extract_strided_slice %214 {offsets = [0, 0], sizes = [8, 128], strides = [1, 1]} : vector<8x512xf32> to vector<8x128xf32>
    %216 = arith.negf %215 : vector<8x128xf32>
    %217 = math.exp %216 : vector<8x128xf32>
    %cst_104 = arith.constant 1.000000e+00 : f32
    %218 = vector.broadcast %cst_104 : f32 to vector<8x128xf32>
    %219 = arith.addf %218, %217 : vector<8x128xf32>
    %220 = arith.divf %218, %219 : vector<8x128xf32>
    %221 = vector.extract_strided_slice %214 {offsets = [0, 128], sizes = [8, 128], strides = [1, 1]} : vector<8x512xf32> to vector<8x128xf32>
    %222 = arith.negf %221 : vector<8x128xf32>
    %223 = math.exp %222 : vector<8x128xf32>
    %cst_105 = arith.constant 1.000000e+00 : f32
    %224 = vector.broadcast %cst_105 : f32 to vector<8x128xf32>
    %225 = arith.addf %224, %223 : vector<8x128xf32>
    %226 = arith.divf %224, %225 : vector<8x128xf32>
    %227 = vector.extract_strided_slice %214 {offsets = [0, 256], sizes = [8, 128], strides = [1, 1]} : vector<8x512xf32> to vector<8x128xf32>
    %228 = math.tanh %227 : vector<8x128xf32>
    %229 = vector.extract_strided_slice %214 {offsets = [0, 384], sizes = [8, 128], strides = [1, 1]} : vector<8x512xf32> to vector<8x128xf32>
    %230 = arith.negf %229 : vector<8x128xf32>
    %231 = math.exp %230 : vector<8x128xf32>
    %cst_106 = arith.constant 1.000000e+00 : f32
    %232 = vector.broadcast %cst_106 : f32 to vector<8x128xf32>
    %233 = arith.addf %232, %231 : vector<8x128xf32>
    %234 = arith.divf %232, %233 : vector<8x128xf32>
    %c0_107 = arith.constant 0 : index
    %c0_108 = arith.constant 0 : index
    %235 = vector.load %arg14[%c0_107, %c0_108] : memref<8x128xf32, #tpu.memory_space<vmem>>, vector<8x128xf32>
    %236 = arith.mulf %226, %235 : vector<8x128xf32>
    %237 = arith.mulf %220, %228 : vector<8x128xf32>
    %238 = arith.addf %236, %237 : vector<8x128xf32>
    %239 = math.tanh %238 : vector<8x128xf32>
    %240 = arith.mulf %234, %239 : vector<8x128xf32>
    %c0_109 = arith.constant 0 : index
    %c0_110 = arith.constant 0 : index
    %241 = vector.load %arg14[%c0_109, %c0_110] : memref<8x128xf32, #tpu.memory_space<vmem>>, vector<8x128xf32>
    tpu.vector_store %arg14[%c0_109, %c0_110], %238 {strides = array<i32>} : memref<8x128xf32, #tpu.memory_space<vmem>>, vector<8x128xf32>,
    %c0_111 = arith.constant 0 : index
    %c0_112 = arith.constant 0 : index
    %242 = vector.load %arg13[%c0_111, %c0_112] : memref<8x128xf32, #tpu.memory_space<vmem>>, vector<8x128xf32>
    tpu.vector_store %arg13[%c0_111, %c0_112], %240 {strides = array<i32>} : memref<8x128xf32, #tpu.memory_space<vmem>>, vector<8x128xf32>,
    %243 = arith.index_cast %207 : i32 to index
    %c0_113 = arith.constant 0 : index
    %244 = vector.load %arg11[%243, %c0_113] : memref<64x128xf32, #tpu.memory_space<vmem>>, vector<8x128xf32>
    tpu.vector_store %arg11[%243, %c0_113], %240 {strides = array<i32>} : memref<64x128xf32, #tpu.memory_space<vmem>>, vector<8x128xf32>,
    %c6_i32 = arith.constant 6 : i32
    %c8_i32_114 = arith.constant 8 : i32
    %245 = arith.muli %c6_i32, %c8_i32_114 : i32
    %246 = tpu.assume_multiple %245, 8 : i32
    %247 = arith.index_cast %246 : i32 to index
    %c0_115 = arith.constant 0 : index
    %248 = vector.load %arg10[%247, %c0_115] : memref<64x512xf32, #tpu.memory_space<vmem>>, vector<8x512xf32>
    %c0_116 = arith.constant 0 : index
    %c0_117 = arith.constant 0 : index
    %249 = vector.load %arg13[%c0_116, %c0_117] : memref<8x128xf32, #tpu.memory_space<vmem>>, vector<8x128xf32>
    %250 = arith.truncf %249 : vector<8x128xf32> to vector<8x128xbf16>
    %c0_118 = arith.constant 0 : index
    %c0_119 = arith.constant 0 : index
    %251 = vector.load %arg2[%c0_118, %c0_119] : memref<128x512xbf16, #tpu.memory_space<vmem>>, vector<128x512xbf16>
    %cst_120 = arith.constant dense<0.000000e+00> : vector<8x512xf32>
    %252 = tpu.matmul %250, %251, %cst_120 {dimension_numbers = #tpu.dot_dimension_numbers<[1], [0], [0], [1], [0, 0, 1, 1], [], []>} : vector<8x128xbf16>, vector<128x512xbf16>, vector<8x512xf32> -> vector<8x512xf32>
    %253 = arith.addf %248, %252 : vector<8x512xf32>
    %254 = vector.extract_strided_slice %253 {offsets = [0, 0], sizes = [8, 128], strides = [1, 1]} : vector<8x512xf32> to vector<8x128xf32>
    %255 = arith.negf %254 : vector<8x128xf32>
    %256 = math.exp %255 : vector<8x128xf32>
    %cst_121 = arith.constant 1.000000e+00 : f32
    %257 = vector.broadcast %cst_121 : f32 to vector<8x128xf32>
    %258 = arith.addf %257, %256 : vector<8x128xf32>
    %259 = arith.divf %257, %258 : vector<8x128xf32>
    %260 = vector.extract_strided_slice %253 {offsets = [0, 128], sizes = [8, 128], strides = [1, 1]} : vector<8x512xf32> to vector<8x128xf32>
    %261 = arith.negf %260 : vector<8x128xf32>
    %262 = math.exp %261 : vector<8x128xf32>
    %cst_122 = arith.constant 1.000000e+00 : f32
    %263 = vector.broadcast %cst_122 : f32 to vector<8x128xf32>
    %264 = arith.addf %263, %262 : vector<8x128xf32>
    %265 = arith.divf %263, %264 : vector<8x128xf32>
    %266 = vector.extract_strided_slice %253 {offsets = [0, 256], sizes = [8, 128], strides = [1, 1]} : vector<8x512xf32> to vector<8x128xf32>
    %267 = math.tanh %266 : vector<8x128xf32>
    %268 = vector.extract_strided_slice %253 {offsets = [0, 384], sizes = [8, 128], strides = [1, 1]} : vector<8x512xf32> to vector<8x128xf32>
    %269 = arith.negf %268 : vector<8x128xf32>
    %270 = math.exp %269 : vector<8x128xf32>
    %cst_123 = arith.constant 1.000000e+00 : f32
    %271 = vector.broadcast %cst_123 : f32 to vector<8x128xf32>
    %272 = arith.addf %271, %270 : vector<8x128xf32>
    %273 = arith.divf %271, %272 : vector<8x128xf32>
    %c0_124 = arith.constant 0 : index
    %c0_125 = arith.constant 0 : index
    %274 = vector.load %arg14[%c0_124, %c0_125] : memref<8x128xf32, #tpu.memory_space<vmem>>, vector<8x128xf32>
    %275 = arith.mulf %265, %274 : vector<8x128xf32>
    %276 = arith.mulf %259, %267 : vector<8x128xf32>
    %277 = arith.addf %275, %276 : vector<8x128xf32>
    %278 = math.tanh %277 : vector<8x128xf32>
    %279 = arith.mulf %273, %278 : vector<8x128xf32>
    %c0_126 = arith.constant 0 : index
    %c0_127 = arith.constant 0 : index
    %280 = vector.load %arg14[%c0_126, %c0_127] : memref<8x128xf32, #tpu.memory_space<vmem>>, vector<8x128xf32>
    tpu.vector_store %arg14[%c0_126, %c0_127], %277 {strides = array<i32>} : memref<8x128xf32, #tpu.memory_space<vmem>>, vector<8x128xf32>,
    %c0_128 = arith.constant 0 : index
    %c0_129 = arith.constant 0 : index
    %281 = vector.load %arg13[%c0_128, %c0_129] : memref<8x128xf32, #tpu.memory_space<vmem>>, vector<8x128xf32>
    tpu.vector_store %arg13[%c0_128, %c0_129], %279 {strides = array<i32>} : memref<8x128xf32, #tpu.memory_space<vmem>>, vector<8x128xf32>,
    %282 = arith.index_cast %246 : i32 to index
    %c0_130 = arith.constant 0 : index
    %283 = vector.load %arg11[%282, %c0_130] : memref<64x128xf32, #tpu.memory_space<vmem>>, vector<8x128xf32>
    tpu.vector_store %arg11[%282, %c0_130], %279 {strides = array<i32>} : memref<64x128xf32, #tpu.memory_space<vmem>>, vector<8x128xf32>,
    %c7_i32 = arith.constant 7 : i32
    %c8_i32_131 = arith.constant 8 : i32
    %284 = arith.muli %c7_i32, %c8_i32_131 : i32
    %285 = tpu.assume_multiple %284, 8 : i32
    %286 = arith.index_cast %285 : i32 to index
    %c0_132 = arith.constant 0 : index
    %287 = vector.load %arg10[%286, %c0_132] : memref<64x512xf32, #tpu.memory_space<vmem>>, vector<8x512xf32>
    %c0_133 = arith.constant 0 : index
    %c0_134 = arith.constant 0 : index
    %288 = vector.load %arg13[%c0_133, %c0_134] : memref<8x128xf32, #tpu.memory_space<vmem>>, vector<8x128xf32>
    %289 = arith.truncf %288 : vector<8x128xf32> to vector<8x128xbf16>
    %c0_135 = arith.constant 0 : index
    %c0_136 = arith.constant 0 : index
    %290 = vector.load %arg2[%c0_135, %c0_136] : memref<128x512xbf16, #tpu.memory_space<vmem>>, vector<128x512xbf16>
    %cst_137 = arith.constant dense<0.000000e+00> : vector<8x512xf32>
    %291 = tpu.matmul %289, %290, %cst_137 {dimension_numbers = #tpu.dot_dimension_numbers<[1], [0], [0], [1], [0, 0, 1, 1], [], []>} : vector<8x128xbf16>, vector<128x512xbf16>, vector<8x512xf32> -> vector<8x512xf32>
    %292 = arith.addf %287, %291 : vector<8x512xf32>
    %293 = vector.extract_strided_slice %292 {offsets = [0, 0], sizes = [8, 128], strides = [1, 1]} : vector<8x512xf32> to vector<8x128xf32>
    %294 = arith.negf %293 : vector<8x128xf32>
    %295 = math.exp %294 : vector<8x128xf32>
    %cst_138 = arith.constant 1.000000e+00 : f32
    %296 = vector.broadcast %cst_138 : f32 to vector<8x128xf32>
    %297 = arith.addf %296, %295 : vector<8x128xf32>
    %298 = arith.divf %296, %297 : vector<8x128xf32>
    %299 = vector.extract_strided_slice %292 {offsets = [0, 128], sizes = [8, 128], strides = [1, 1]} : vector<8x512xf32> to vector<8x128xf32>
    %300 = arith.negf %299 : vector<8x128xf32>
    %301 = math.exp %300 : vector<8x128xf32>
    %cst_139 = arith.constant 1.000000e+00 : f32
    %302 = vector.broadcast %cst_139 : f32 to vector<8x128xf32>
    %303 = arith.addf %302, %301 : vector<8x128xf32>
    %304 = arith.divf %302, %303 : vector<8x128xf32>
    %305 = vector.extract_strided_slice %292 {offsets = [0, 256], sizes = [8, 128], strides = [1, 1]} : vector<8x512xf32> to vector<8x128xf32>
    %306 = math.tanh %305 : vector<8x128xf32>
    %307 = vector.extract_strided_slice %292 {offsets = [0, 384], sizes = [8, 128], strides = [1, 1]} : vector<8x512xf32> to vector<8x128xf32>
    %308 = arith.negf %307 : vector<8x128xf32>
    %309 = math.exp %308 : vector<8x128xf32>
    %cst_140 = arith.constant 1.000000e+00 : f32
    %310 = vector.broadcast %cst_140 : f32 to vector<8x128xf32>
    %311 = arith.addf %310, %309 : vector<8x128xf32>
    %312 = arith.divf %310, %311 : vector<8x128xf32>
    %c0_141 = arith.constant 0 : index
    %c0_142 = arith.constant 0 : index
    %313 = vector.load %arg14[%c0_141, %c0_142] : memref<8x128xf32, #tpu.memory_space<vmem>>, vector<8x128xf32>
    %314 = arith.mulf %304, %313 : vector<8x128xf32>
    %315 = arith.mulf %298, %306 : vector<8x128xf32>
    %316 = arith.addf %314, %315 : vector<8x128xf32>
    %317 = math.tanh %316 : vector<8x128xf32>
    %318 = arith.mulf %312, %317 : vector<8x128xf32>
    %c0_143 = arith.constant 0 : index
    %c0_144 = arith.constant 0 : index
    %319 = vector.load %arg14[%c0_143, %c0_144] : memref<8x128xf32, #tpu.memory_space<vmem>>, vector<8x128xf32>
    tpu.vector_store %arg14[%c0_143, %c0_144], %316 {strides = array<i32>} : memref<8x128xf32, #tpu.memory_space<vmem>>, vector<8x128xf32>,
    %c0_145 = arith.constant 0 : index
    %c0_146 = arith.constant 0 : index
    %320 = vector.load %arg13[%c0_145, %c0_146] : memref<8x128xf32, #tpu.memory_space<vmem>>, vector<8x128xf32>
    tpu.vector_store %arg13[%c0_145, %c0_146], %318 {strides = array<i32>} : memref<8x128xf32, #tpu.memory_space<vmem>>, vector<8x128xf32>,
    %321 = arith.index_cast %285 : i32 to index
    %c0_147 = arith.constant 0 : index
    %322 = vector.load %arg11[%321, %c0_147] : memref<64x128xf32, #tpu.memory_space<vmem>>, vector<8x128xf32>
    tpu.vector_store %arg11[%321, %c0_147], %318 {strides = array<i32>} : memref<64x128xf32, #tpu.memory_space<vmem>>, vector<8x128xf32>,
    %c8_i32_148 = arith.constant 8 : i32
    %c0_149 = arith.constant 0 : index
    %c0_150 = arith.constant 0 : index
    %323 = vector.load %arg11[%c0_149, %c0_150] : memref<64x128xf32, #tpu.memory_space<vmem>>, vector<64x128xf32>
    %324 = arith.truncf %323 : vector<64x128xf32> to vector<64x128xbf16>
    %c0_151 = arith.constant 0 : index
    %c0_152 = arith.constant 0 : index
    %325 = vector.load %arg4[%c0_151, %c0_152] : memref<128x512xbf16, #tpu.memory_space<vmem>>, vector<128x512xbf16>
    %cst_153 = arith.constant dense<0.000000e+00> : vector<64x512xf32>
    %326 = tpu.matmul %324, %325, %cst_153 {dimension_numbers = #tpu.dot_dimension_numbers<[1], [0], [0], [1], [0, 0, 1, 1], [], []>} : vector<64x128xbf16>, vector<128x512xbf16>, vector<64x512xf32> -> vector<64x512xf32>
    %c0_154 = arith.constant 0 : index
    %c0_155 = arith.constant 0 : index
    %327 = vector.load %arg6[%c0_154, %c0_155] : memref<1x512xf32, #tpu.memory_space<vmem>>, vector<1x512xf32>
    %328 = vector.broadcast %327 : vector<1x512xf32> to vector<64x512xf32>
    %329 = arith.addf %326, %328 : vector<64x512xf32>
    %c0_156 = arith.constant 0 : index
    %c0_157 = arith.constant 0 : index
    %330 = vector.load %arg10[%c0_156, %c0_157] : memref<64x512xf32, #tpu.memory_space<vmem>>, vector<64x512xf32>
    tpu.vector_store %arg10[%c0_156, %c0_157], %329 {strides = array<i32>} : memref<64x512xf32, #tpu.memory_space<vmem>>, vector<64x512xf32>,
    %cst_158 = arith.constant 0.000000e+00 : f32
    %331 = vector.broadcast %cst_158 : f32 to vector<8x128xf32>
    %c0_159 = arith.constant 0 : index
    %c0_160 = arith.constant 0 : index
    %332 = vector.load %arg13[%c0_159, %c0_160] : memref<8x128xf32, #tpu.memory_space<vmem>>, vector<8x128xf32>
    tpu.vector_store %arg13[%c0_159, %c0_160], %331 {strides = array<i32>} : memref<8x128xf32, #tpu.memory_space<vmem>>, vector<8x128xf32>,
    %cst_161 = arith.constant 0.000000e+00 : f32
    %333 = vector.broadcast %cst_161 : f32 to vector<8x128xf32>
    %c0_162 = arith.constant 0 : index
    %c0_163 = arith.constant 0 : index
    %334 = vector.load %arg14[%c0_162, %c0_163] : memref<8x128xf32, #tpu.memory_space<vmem>>, vector<8x128xf32>
    tpu.vector_store %arg14[%c0_162, %c0_163], %333 {strides = array<i32>} : memref<8x128xf32, #tpu.memory_space<vmem>>, vector<8x128xf32>,
    %c0_i32_164 = arith.constant 0 : i32
    %c8_i32_165 = arith.constant 8 : i32
    %335 = arith.muli %c0_i32_164, %c8_i32_165 : i32
    %336 = tpu.assume_multiple %335, 8 : i32
    %337 = arith.index_cast %336 : i32 to index
    %c0_166 = arith.constant 0 : index
    %338 = vector.load %arg10[%337, %c0_166] : memref<64x512xf32, #tpu.memory_space<vmem>>, vector<8x512xf32>
    %c0_167 = arith.constant 0 : index
    %c0_168 = arith.constant 0 : index
    %339 = vector.load %arg13[%c0_167, %c0_168] : memref<8x128xf32, #tpu.memory_space<vmem>>, vector<8x128xf32>
    %340 = arith.truncf %339 : vector<8x128xf32> to vector<8x128xbf16>
    %c0_169 = arith.constant 0 : index
    %c0_170 = arith.constant 0 : index
    %341 = vector.load %arg5[%c0_169, %c0_170] : memref<128x512xbf16, #tpu.memory_space<vmem>>, vector<128x512xbf16>
    %cst_171 = arith.constant dense<0.000000e+00> : vector<8x512xf32>
    %342 = tpu.matmul %340, %341, %cst_171 {dimension_numbers = #tpu.dot_dimension_numbers<[1], [0], [0], [1], [0, 0, 1, 1], [], []>} : vector<8x128xbf16>, vector<128x512xbf16>, vector<8x512xf32> -> vector<8x512xf32>
    %343 = arith.addf %338, %342 : vector<8x512xf32>
    %344 = vector.extract_strided_slice %343 {offsets = [0, 0], sizes = [8, 128], strides = [1, 1]} : vector<8x512xf32> to vector<8x128xf32>
    %345 = arith.negf %344 : vector<8x128xf32>
    %346 = math.exp %345 : vector<8x128xf32>
    %cst_172 = arith.constant 1.000000e+00 : f32
    %347 = vector.broadcast %cst_172 : f32 to vector<8x128xf32>
    %348 = arith.addf %347, %346 : vector<8x128xf32>
    %349 = arith.divf %347, %348 : vector<8x128xf32>
    %350 = vector.extract_strided_slice %343 {offsets = [0, 128], sizes = [8, 128], strides = [1, 1]} : vector<8x512xf32> to vector<8x128xf32>
    %351 = arith.negf %350 : vector<8x128xf32>
    %352 = math.exp %351 : vector<8x128xf32>
    %cst_173 = arith.constant 1.000000e+00 : f32
    %353 = vector.broadcast %cst_173 : f32 to vector<8x128xf32>
    %354 = arith.addf %353, %352 : vector<8x128xf32>
    %355 = arith.divf %353, %354 : vector<8x128xf32>
    %356 = vector.extract_strided_slice %343 {offsets = [0, 256], sizes = [8, 128], strides = [1, 1]} : vector<8x512xf32> to vector<8x128xf32>
    %357 = math.tanh %356 : vector<8x128xf32>
    %358 = vector.extract_strided_slice %343 {offsets = [0, 384], sizes = [8, 128], strides = [1, 1]} : vector<8x512xf32> to vector<8x128xf32>
    %359 = arith.negf %358 : vector<8x128xf32>
    %360 = math.exp %359 : vector<8x128xf32>
    %cst_174 = arith.constant 1.000000e+00 : f32
    %361 = vector.broadcast %cst_174 : f32 to vector<8x128xf32>
    %362 = arith.addf %361, %360 : vector<8x128xf32>
    %363 = arith.divf %361, %362 : vector<8x128xf32>
    %c0_175 = arith.constant 0 : index
    %c0_176 = arith.constant 0 : index
    %364 = vector.load %arg14[%c0_175, %c0_176] : memref<8x128xf32, #tpu.memory_space<vmem>>, vector<8x128xf32>
    %365 = arith.mulf %355, %364 : vector<8x128xf32>
    %366 = arith.mulf %349, %357 : vector<8x128xf32>
    %367 = arith.addf %365, %366 : vector<8x128xf32>
    %368 = math.tanh %367 : vector<8x128xf32>
    %369 = arith.mulf %363, %368 : vector<8x128xf32>
    %c0_177 = arith.constant 0 : index
    %c0_178 = arith.constant 0 : index
    %370 = vector.load %arg14[%c0_177, %c0_178] : memref<8x128xf32, #tpu.memory_space<vmem>>, vector<8x128xf32>
    tpu.vector_store %arg14[%c0_177, %c0_178], %367 {strides = array<i32>} : memref<8x128xf32, #tpu.memory_space<vmem>>, vector<8x128xf32>,
    %c0_179 = arith.constant 0 : index
    %c0_180 = arith.constant 0 : index
    %371 = vector.load %arg13[%c0_179, %c0_180] : memref<8x128xf32, #tpu.memory_space<vmem>>, vector<8x128xf32>
    tpu.vector_store %arg13[%c0_179, %c0_180], %369 {strides = array<i32>} : memref<8x128xf32, #tpu.memory_space<vmem>>, vector<8x128xf32>,
    %372 = arith.index_cast %336 : i32 to index
    %c0_181 = arith.constant 0 : index
    %373 = vector.load %arg12[%372, %c0_181] : memref<64x128xf32, #tpu.memory_space<vmem>>, vector<8x128xf32>
    tpu.vector_store %arg12[%372, %c0_181], %369 {strides = array<i32>} : memref<64x128xf32, #tpu.memory_space<vmem>>, vector<8x128xf32>,
    %c1_i32_182 = arith.constant 1 : i32
    %c8_i32_183 = arith.constant 8 : i32
    %374 = arith.muli %c1_i32_182, %c8_i32_183 : i32
    %375 = tpu.assume_multiple %374, 8 : i32
    %376 = arith.index_cast %375 : i32 to index
    %c0_184 = arith.constant 0 : index
    %377 = vector.load %arg10[%376, %c0_184] : memref<64x512xf32, #tpu.memory_space<vmem>>, vector<8x512xf32>
    %c0_185 = arith.constant 0 : index
    %c0_186 = arith.constant 0 : index
    %378 = vector.load %arg13[%c0_185, %c0_186] : memref<8x128xf32, #tpu.memory_space<vmem>>, vector<8x128xf32>
    %379 = arith.truncf %378 : vector<8x128xf32> to vector<8x128xbf16>
    %c0_187 = arith.constant 0 : index
    %c0_188 = arith.constant 0 : index
    %380 = vector.load %arg5[%c0_187, %c0_188] : memref<128x512xbf16, #tpu.memory_space<vmem>>, vector<128x512xbf16>
    %cst_189 = arith.constant dense<0.000000e+00> : vector<8x512xf32>
    %381 = tpu.matmul %379, %380, %cst_189 {dimension_numbers = #tpu.dot_dimension_numbers<[1], [0], [0], [1], [0, 0, 1, 1], [], []>} : vector<8x128xbf16>, vector<128x512xbf16>, vector<8x512xf32> -> vector<8x512xf32>
    %382 = arith.addf %377, %381 : vector<8x512xf32>
    %383 = vector.extract_strided_slice %382 {offsets = [0, 0], sizes = [8, 128], strides = [1, 1]} : vector<8x512xf32> to vector<8x128xf32>
    %384 = arith.negf %383 : vector<8x128xf32>
    %385 = math.exp %384 : vector<8x128xf32>
    %cst_190 = arith.constant 1.000000e+00 : f32
    %386 = vector.broadcast %cst_190 : f32 to vector<8x128xf32>
    %387 = arith.addf %386, %385 : vector<8x128xf32>
    %388 = arith.divf %386, %387 : vector<8x128xf32>
    %389 = vector.extract_strided_slice %382 {offsets = [0, 128], sizes = [8, 128], strides = [1, 1]} : vector<8x512xf32> to vector<8x128xf32>
    %390 = arith.negf %389 : vector<8x128xf32>
    %391 = math.exp %390 : vector<8x128xf32>
    %cst_191 = arith.constant 1.000000e+00 : f32
    %392 = vector.broadcast %cst_191 : f32 to vector<8x128xf32>
    %393 = arith.addf %392, %391 : vector<8x128xf32>
    %394 = arith.divf %392, %393 : vector<8x128xf32>
    %395 = vector.extract_strided_slice %382 {offsets = [0, 256], sizes = [8, 128], strides = [1, 1]} : vector<8x512xf32> to vector<8x128xf32>
    %396 = math.tanh %395 : vector<8x128xf32>
    %397 = vector.extract_strided_slice %382 {offsets = [0, 384], sizes = [8, 128], strides = [1, 1]} : vector<8x512xf32> to vector<8x128xf32>
    %398 = arith.negf %397 : vector<8x128xf32>
    %399 = math.exp %398 : vector<8x128xf32>
    %cst_192 = arith.constant 1.000000e+00 : f32
    %400 = vector.broadcast %cst_192 : f32 to vector<8x128xf32>
    %401 = arith.addf %400, %399 : vector<8x128xf32>
    %402 = arith.divf %400, %401 : vector<8x128xf32>
    %c0_193 = arith.constant 0 : index
    %c0_194 = arith.constant 0 : index
    %403 = vector.load %arg14[%c0_193, %c0_194] : memref<8x128xf32, #tpu.memory_space<vmem>>, vector<8x128xf32>
    %404 = arith.mulf %394, %403 : vector<8x128xf32>
    %405 = arith.mulf %388, %396 : vector<8x128xf32>
    %406 = arith.addf %404, %405 : vector<8x128xf32>
    %407 = math.tanh %406 : vector<8x128xf32>
    %408 = arith.mulf %402, %407 : vector<8x128xf32>
    %c0_195 = arith.constant 0 : index
    %c0_196 = arith.constant 0 : index
    %409 = vector.load %arg14[%c0_195, %c0_196] : memref<8x128xf32, #tpu.memory_space<vmem>>, vector<8x128xf32>
    tpu.vector_store %arg14[%c0_195, %c0_196], %406 {strides = array<i32>} : memref<8x128xf32, #tpu.memory_space<vmem>>, vector<8x128xf32>,
    %c0_197 = arith.constant 0 : index
    %c0_198 = arith.constant 0 : index
    %410 = vector.load %arg13[%c0_197, %c0_198] : memref<8x128xf32, #tpu.memory_space<vmem>>, vector<8x128xf32>
    tpu.vector_store %arg13[%c0_197, %c0_198], %408 {strides = array<i32>} : memref<8x128xf32, #tpu.memory_space<vmem>>, vector<8x128xf32>,
    %411 = arith.index_cast %375 : i32 to index
    %c0_199 = arith.constant 0 : index
    %412 = vector.load %arg12[%411, %c0_199] : memref<64x128xf32, #tpu.memory_space<vmem>>, vector<8x128xf32>
    tpu.vector_store %arg12[%411, %c0_199], %408 {strides = array<i32>} : memref<64x128xf32, #tpu.memory_space<vmem>>, vector<8x128xf32>,
    %c2_i32_200 = arith.constant 2 : i32
    %c8_i32_201 = arith.constant 8 : i32
    %413 = arith.muli %c2_i32_200, %c8_i32_201 : i32
    %414 = tpu.assume_multiple %413, 8 : i32
    %415 = arith.index_cast %414 : i32 to index
    %c0_202 = arith.constant 0 : index
    %416 = vector.load %arg10[%415, %c0_202] : memref<64x512xf32, #tpu.memory_space<vmem>>, vector<8x512xf32>
    %c0_203 = arith.constant 0 : index
    %c0_204 = arith.constant 0 : index
    %417 = vector.load %arg13[%c0_203, %c0_204] : memref<8x128xf32, #tpu.memory_space<vmem>>, vector<8x128xf32>
    %418 = arith.truncf %417 : vector<8x128xf32> to vector<8x128xbf16>
    %c0_205 = arith.constant 0 : index
    %c0_206 = arith.constant 0 : index
    %419 = vector.load %arg5[%c0_205, %c0_206] : memref<128x512xbf16, #tpu.memory_space<vmem>>, vector<128x512xbf16>
    %cst_207 = arith.constant dense<0.000000e+00> : vector<8x512xf32>
    %420 = tpu.matmul %418, %419, %cst_207 {dimension_numbers = #tpu.dot_dimension_numbers<[1], [0], [0], [1], [0, 0, 1, 1], [], []>} : vector<8x128xbf16>, vector<128x512xbf16>, vector<8x512xf32> -> vector<8x512xf32>
    %421 = arith.addf %416, %420 : vector<8x512xf32>
    %422 = vector.extract_strided_slice %421 {offsets = [0, 0], sizes = [8, 128], strides = [1, 1]} : vector<8x512xf32> to vector<8x128xf32>
    %423 = arith.negf %422 : vector<8x128xf32>
    %424 = math.exp %423 : vector<8x128xf32>
    %cst_208 = arith.constant 1.000000e+00 : f32
    %425 = vector.broadcast %cst_208 : f32 to vector<8x128xf32>
    %426 = arith.addf %425, %424 : vector<8x128xf32>
    %427 = arith.divf %425, %426 : vector<8x128xf32>
    %428 = vector.extract_strided_slice %421 {offsets = [0, 128], sizes = [8, 128], strides = [1, 1]} : vector<8x512xf32> to vector<8x128xf32>
    %429 = arith.negf %428 : vector<8x128xf32>
    %430 = math.exp %429 : vector<8x128xf32>
    %cst_209 = arith.constant 1.000000e+00 : f32
    %431 = vector.broadcast %cst_209 : f32 to vector<8x128xf32>
    %432 = arith.addf %431, %430 : vector<8x128xf32>
    %433 = arith.divf %431, %432 : vector<8x128xf32>
    %434 = vector.extract_strided_slice %421 {offsets = [0, 256], sizes = [8, 128], strides = [1, 1]} : vector<8x512xf32> to vector<8x128xf32>
    %435 = math.tanh %434 : vector<8x128xf32>
    %436 = vector.extract_strided_slice %421 {offsets = [0, 384], sizes = [8, 128], strides = [1, 1]} : vector<8x512xf32> to vector<8x128xf32>
    %437 = arith.negf %436 : vector<8x128xf32>
    %438 = math.exp %437 : vector<8x128xf32>
    %cst_210 = arith.constant 1.000000e+00 : f32
    %439 = vector.broadcast %cst_210 : f32 to vector<8x128xf32>
    %440 = arith.addf %439, %438 : vector<8x128xf32>
    %441 = arith.divf %439, %440 : vector<8x128xf32>
    %c0_211 = arith.constant 0 : index
    %c0_212 = arith.constant 0 : index
    %442 = vector.load %arg14[%c0_211, %c0_212] : memref<8x128xf32, #tpu.memory_space<vmem>>, vector<8x128xf32>
    %443 = arith.mulf %433, %442 : vector<8x128xf32>
    %444 = arith.mulf %427, %435 : vector<8x128xf32>
    %445 = arith.addf %443, %444 : vector<8x128xf32>
    %446 = math.tanh %445 : vector<8x128xf32>
    %447 = arith.mulf %441, %446 : vector<8x128xf32>
    %c0_213 = arith.constant 0 : index
    %c0_214 = arith.constant 0 : index
    %448 = vector.load %arg14[%c0_213, %c0_214] : memref<8x128xf32, #tpu.memory_space<vmem>>, vector<8x128xf32>
    tpu.vector_store %arg14[%c0_213, %c0_214], %445 {strides = array<i32>} : memref<8x128xf32, #tpu.memory_space<vmem>>, vector<8x128xf32>,
    %c0_215 = arith.constant 0 : index
    %c0_216 = arith.constant 0 : index
    %449 = vector.load %arg13[%c0_215, %c0_216] : memref<8x128xf32, #tpu.memory_space<vmem>>, vector<8x128xf32>
    tpu.vector_store %arg13[%c0_215, %c0_216], %447 {strides = array<i32>} : memref<8x128xf32, #tpu.memory_space<vmem>>, vector<8x128xf32>,
    %450 = arith.index_cast %414 : i32 to index
    %c0_217 = arith.constant 0 : index
    %451 = vector.load %arg12[%450, %c0_217] : memref<64x128xf32, #tpu.memory_space<vmem>>, vector<8x128xf32>
    tpu.vector_store %arg12[%450, %c0_217], %447 {strides = array<i32>} : memref<64x128xf32, #tpu.memory_space<vmem>>, vector<8x128xf32>,
    %c3_i32_218 = arith.constant 3 : i32
    %c8_i32_219 = arith.constant 8 : i32
    %452 = arith.muli %c3_i32_218, %c8_i32_219 : i32
    %453 = tpu.assume_multiple %452, 8 : i32
    %454 = arith.index_cast %453 : i32 to index
    %c0_220 = arith.constant 0 : index
    %455 = vector.load %arg10[%454, %c0_220] : memref<64x512xf32, #tpu.memory_space<vmem>>, vector<8x512xf32>
    %c0_221 = arith.constant 0 : index
    %c0_222 = arith.constant 0 : index
    %456 = vector.load %arg13[%c0_221, %c0_222] : memref<8x128xf32, #tpu.memory_space<vmem>>, vector<8x128xf32>
    %457 = arith.truncf %456 : vector<8x128xf32> to vector<8x128xbf16>
    %c0_223 = arith.constant 0 : index
    %c0_224 = arith.constant 0 : index
    %458 = vector.load %arg5[%c0_223, %c0_224] : memref<128x512xbf16, #tpu.memory_space<vmem>>, vector<128x512xbf16>
    %cst_225 = arith.constant dense<0.000000e+00> : vector<8x512xf32>
    %459 = tpu.matmul %457, %458, %cst_225 {dimension_numbers = #tpu.dot_dimension_numbers<[1], [0], [0], [1], [0, 0, 1, 1], [], []>} : vector<8x128xbf16>, vector<128x512xbf16>, vector<8x512xf32> -> vector<8x512xf32>
    %460 = arith.addf %455, %459 : vector<8x512xf32>
    %461 = vector.extract_strided_slice %460 {offsets = [0, 0], sizes = [8, 128], strides = [1, 1]} : vector<8x512xf32> to vector<8x128xf32>
    %462 = arith.negf %461 : vector<8x128xf32>
    %463 = math.exp %462 : vector<8x128xf32>
    %cst_226 = arith.constant 1.000000e+00 : f32
    %464 = vector.broadcast %cst_226 : f32 to vector<8x128xf32>
    %465 = arith.addf %464, %463 : vector<8x128xf32>
    %466 = arith.divf %464, %465 : vector<8x128xf32>
    %467 = vector.extract_strided_slice %460 {offsets = [0, 128], sizes = [8, 128], strides = [1, 1]} : vector<8x512xf32> to vector<8x128xf32>
    %468 = arith.negf %467 : vector<8x128xf32>
    %469 = math.exp %468 : vector<8x128xf32>
    %cst_227 = arith.constant 1.000000e+00 : f32
    %470 = vector.broadcast %cst_227 : f32 to vector<8x128xf32>
    %471 = arith.addf %470, %469 : vector<8x128xf32>
    %472 = arith.divf %470, %471 : vector<8x128xf32>
    %473 = vector.extract_strided_slice %460 {offsets = [0, 256], sizes = [8, 128], strides = [1, 1]} : vector<8x512xf32> to vector<8x128xf32>
    %474 = math.tanh %473 : vector<8x128xf32>
    %475 = vector.extract_strided_slice %460 {offsets = [0, 384], sizes = [8, 128], strides = [1, 1]} : vector<8x512xf32> to vector<8x128xf32>
    %476 = arith.negf %475 : vector<8x128xf32>
    %477 = math.exp %476 : vector<8x128xf32>
    %cst_228 = arith.constant 1.000000e+00 : f32
    %478 = vector.broadcast %cst_228 : f32 to vector<8x128xf32>
    %479 = arith.addf %478, %477 : vector<8x128xf32>
    %480 = arith.divf %478, %479 : vector<8x128xf32>
    %c0_229 = arith.constant 0 : index
    %c0_230 = arith.constant 0 : index
    %481 = vector.load %arg14[%c0_229, %c0_230] : memref<8x128xf32, #tpu.memory_space<vmem>>, vector<8x128xf32>
    %482 = arith.mulf %472, %481 : vector<8x128xf32>
    %483 = arith.mulf %466, %474 : vector<8x128xf32>
    %484 = arith.addf %482, %483 : vector<8x128xf32>
    %485 = math.tanh %484 : vector<8x128xf32>
    %486 = arith.mulf %480, %485 : vector<8x128xf32>
    %c0_231 = arith.constant 0 : index
    %c0_232 = arith.constant 0 : index
    %487 = vector.load %arg14[%c0_231, %c0_232] : memref<8x128xf32, #tpu.memory_space<vmem>>, vector<8x128xf32>
    tpu.vector_store %arg14[%c0_231, %c0_232], %484 {strides = array<i32>} : memref<8x128xf32, #tpu.memory_space<vmem>>, vector<8x128xf32>,
    %c0_233 = arith.constant 0 : index
    %c0_234 = arith.constant 0 : index
    %488 = vector.load %arg13[%c0_233, %c0_234] : memref<8x128xf32, #tpu.memory_space<vmem>>, vector<8x128xf32>
    tpu.vector_store %arg13[%c0_233, %c0_234], %486 {strides = array<i32>} : memref<8x128xf32, #tpu.memory_space<vmem>>, vector<8x128xf32>,
    %489 = arith.index_cast %453 : i32 to index
    %c0_235 = arith.constant 0 : index
    %490 = vector.load %arg12[%489, %c0_235] : memref<64x128xf32, #tpu.memory_space<vmem>>, vector<8x128xf32>
    tpu.vector_store %arg12[%489, %c0_235], %486 {strides = array<i32>} : memref<64x128xf32, #tpu.memory_space<vmem>>, vector<8x128xf32>,
    %c4_i32_236 = arith.constant 4 : i32
    %c8_i32_237 = arith.constant 8 : i32
    %491 = arith.muli %c4_i32_236, %c8_i32_237 : i32
    %492 = tpu.assume_multiple %491, 8 : i32
    %493 = arith.index_cast %492 : i32 to index
    %c0_238 = arith.constant 0 : index
    %494 = vector.load %arg10[%493, %c0_238] : memref<64x512xf32, #tpu.memory_space<vmem>>, vector<8x512xf32>
    %c0_239 = arith.constant 0 : index
    %c0_240 = arith.constant 0 : index
    %495 = vector.load %arg13[%c0_239, %c0_240] : memref<8x128xf32, #tpu.memory_space<vmem>>, vector<8x128xf32>
    %496 = arith.truncf %495 : vector<8x128xf32> to vector<8x128xbf16>
    %c0_241 = arith.constant 0 : index
    %c0_242 = arith.constant 0 : index
    %497 = vector.load %arg5[%c0_241, %c0_242] : memref<128x512xbf16, #tpu.memory_space<vmem>>, vector<128x512xbf16>
    %cst_243 = arith.constant dense<0.000000e+00> : vector<8x512xf32>
    %498 = tpu.matmul %496, %497, %cst_243 {dimension_numbers = #tpu.dot_dimension_numbers<[1], [0], [0], [1], [0, 0, 1, 1], [], []>} : vector<8x128xbf16>, vector<128x512xbf16>, vector<8x512xf32> -> vector<8x512xf32>
    %499 = arith.addf %494, %498 : vector<8x512xf32>
    %500 = vector.extract_strided_slice %499 {offsets = [0, 0], sizes = [8, 128], strides = [1, 1]} : vector<8x512xf32> to vector<8x128xf32>
    %501 = arith.negf %500 : vector<8x128xf32>
    %502 = math.exp %501 : vector<8x128xf32>
    %cst_244 = arith.constant 1.000000e+00 : f32
    %503 = vector.broadcast %cst_244 : f32 to vector<8x128xf32>
    %504 = arith.addf %503, %502 : vector<8x128xf32>
    %505 = arith.divf %503, %504 : vector<8x128xf32>
    %506 = vector.extract_strided_slice %499 {offsets = [0, 128], sizes = [8, 128], strides = [1, 1]} : vector<8x512xf32> to vector<8x128xf32>
    %507 = arith.negf %506 : vector<8x128xf32>
    %508 = math.exp %507 : vector<8x128xf32>
    %cst_245 = arith.constant 1.000000e+00 : f32
    %509 = vector.broadcast %cst_245 : f32 to vector<8x128xf32>
    %510 = arith.addf %509, %508 : vector<8x128xf32>
    %511 = arith.divf %509, %510 : vector<8x128xf32>
    %512 = vector.extract_strided_slice %499 {offsets = [0, 256], sizes = [8, 128], strides = [1, 1]} : vector<8x512xf32> to vector<8x128xf32>
    %513 = math.tanh %512 : vector<8x128xf32>
    %514 = vector.extract_strided_slice %499 {offsets = [0, 384], sizes = [8, 128], strides = [1, 1]} : vector<8x512xf32> to vector<8x128xf32>
    %515 = arith.negf %514 : vector<8x128xf32>
    %516 = math.exp %515 : vector<8x128xf32>
    %cst_246 = arith.constant 1.000000e+00 : f32
    %517 = vector.broadcast %cst_246 : f32 to vector<8x128xf32>
    %518 = arith.addf %517, %516 : vector<8x128xf32>
    %519 = arith.divf %517, %518 : vector<8x128xf32>
    %c0_247 = arith.constant 0 : index
    %c0_248 = arith.constant 0 : index
    %520 = vector.load %arg14[%c0_247, %c0_248] : memref<8x128xf32, #tpu.memory_space<vmem>>, vector<8x128xf32>
    %521 = arith.mulf %511, %520 : vector<8x128xf32>
    %522 = arith.mulf %505, %513 : vector<8x128xf32>
    %523 = arith.addf %521, %522 : vector<8x128xf32>
    %524 = math.tanh %523 : vector<8x128xf32>
    %525 = arith.mulf %519, %524 : vector<8x128xf32>
    %c0_249 = arith.constant 0 : index
    %c0_250 = arith.constant 0 : index
    %526 = vector.load %arg14[%c0_249, %c0_250] : memref<8x128xf32, #tpu.memory_space<vmem>>, vector<8x128xf32>
    tpu.vector_store %arg14[%c0_249, %c0_250], %523 {strides = array<i32>} : memref<8x128xf32, #tpu.memory_space<vmem>>, vector<8x128xf32>,
    %c0_251 = arith.constant 0 : index
    %c0_252 = arith.constant 0 : index
    %527 = vector.load %arg13[%c0_251, %c0_252] : memref<8x128xf32, #tpu.memory_space<vmem>>, vector<8x128xf32>
    tpu.vector_store %arg13[%c0_251, %c0_252], %525 {strides = array<i32>} : memref<8x128xf32, #tpu.memory_space<vmem>>, vector<8x128xf32>,
    %528 = arith.index_cast %492 : i32 to index
    %c0_253 = arith.constant 0 : index
    %529 = vector.load %arg12[%528, %c0_253] : memref<64x128xf32, #tpu.memory_space<vmem>>, vector<8x128xf32>
    tpu.vector_store %arg12[%528, %c0_253], %525 {strides = array<i32>} : memref<64x128xf32, #tpu.memory_space<vmem>>, vector<8x128xf32>,
    %c5_i32_254 = arith.constant 5 : i32
    %c8_i32_255 = arith.constant 8 : i32
    %530 = arith.muli %c5_i32_254, %c8_i32_255 : i32
    %531 = tpu.assume_multiple %530, 8 : i32
    %532 = arith.index_cast %531 : i32 to index
    %c0_256 = arith.constant 0 : index
    %533 = vector.load %arg10[%532, %c0_256] : memref<64x512xf32, #tpu.memory_space<vmem>>, vector<8x512xf32>
    %c0_257 = arith.constant 0 : index
    %c0_258 = arith.constant 0 : index
    %534 = vector.load %arg13[%c0_257, %c0_258] : memref<8x128xf32, #tpu.memory_space<vmem>>, vector<8x128xf32>
    %535 = arith.truncf %534 : vector<8x128xf32> to vector<8x128xbf16>
    %c0_259 = arith.constant 0 : index
    %c0_260 = arith.constant 0 : index
    %536 = vector.load %arg5[%c0_259, %c0_260] : memref<128x512xbf16, #tpu.memory_space<vmem>>, vector<128x512xbf16>
    %cst_261 = arith.constant dense<0.000000e+00> : vector<8x512xf32>
    %537 = tpu.matmul %535, %536, %cst_261 {dimension_numbers = #tpu.dot_dimension_numbers<[1], [0], [0], [1], [0, 0, 1, 1], [], []>} : vector<8x128xbf16>, vector<128x512xbf16>, vector<8x512xf32> -> vector<8x512xf32>
    %538 = arith.addf %533, %537 : vector<8x512xf32>
    %539 = vector.extract_strided_slice %538 {offsets = [0, 0], sizes = [8, 128], strides = [1, 1]} : vector<8x512xf32> to vector<8x128xf32>
    %540 = arith.negf %539 : vector<8x128xf32>
    %541 = math.exp %540 : vector<8x128xf32>
    %cst_262 = arith.constant 1.000000e+00 : f32
    %542 = vector.broadcast %cst_262 : f32 to vector<8x128xf32>
    %543 = arith.addf %542, %541 : vector<8x128xf32>
    %544 = arith.divf %542, %543 : vector<8x128xf32>
    %545 = vector.extract_strided_slice %538 {offsets = [0, 128], sizes = [8, 128], strides = [1, 1]} : vector<8x512xf32> to vector<8x128xf32>
    %546 = arith.negf %545 : vector<8x128xf32>
    %547 = math.exp %546 : vector<8x128xf32>
    %cst_263 = arith.constant 1.000000e+00 : f32
    %548 = vector.broadcast %cst_263 : f32 to vector<8x128xf32>
    %549 = arith.addf %548, %547 : vector<8x128xf32>
    %550 = arith.divf %548, %549 : vector<8x128xf32>
    %551 = vector.extract_strided_slice %538 {offsets = [0, 256], sizes = [8, 128], strides = [1, 1]} : vector<8x512xf32> to vector<8x128xf32>
    %552 = math.tanh %551 : vector<8x128xf32>
    %553 = vector.extract_strided_slice %538 {offsets = [0, 384], sizes = [8, 128], strides = [1, 1]} : vector<8x512xf32> to vector<8x128xf32>
    %554 = arith.negf %553 : vector<8x128xf32>
    %555 = math.exp %554 : vector<8x128xf32>
    %cst_264 = arith.constant 1.000000e+00 : f32
    %556 = vector.broadcast %cst_264 : f32 to vector<8x128xf32>
    %557 = arith.addf %556, %555 : vector<8x128xf32>
    %558 = arith.divf %556, %557 : vector<8x128xf32>
    %c0_265 = arith.constant 0 : index
    %c0_266 = arith.constant 0 : index
    %559 = vector.load %arg14[%c0_265, %c0_266] : memref<8x128xf32, #tpu.memory_space<vmem>>, vector<8x128xf32>
    %560 = arith.mulf %550, %559 : vector<8x128xf32>
    %561 = arith.mulf %544, %552 : vector<8x128xf32>
    %562 = arith.addf %560, %561 : vector<8x128xf32>
    %563 = math.tanh %562 : vector<8x128xf32>
    %564 = arith.mulf %558, %563 : vector<8x128xf32>
    %c0_267 = arith.constant 0 : index
    %c0_268 = arith.constant 0 : index
    %565 = vector.load %arg14[%c0_267, %c0_268] : memref<8x128xf32, #tpu.memory_space<vmem>>, vector<8x128xf32>
    tpu.vector_store %arg14[%c0_267, %c0_268], %562 {strides = array<i32>} : memref<8x128xf32, #tpu.memory_space<vmem>>, vector<8x128xf32>,
    %c0_269 = arith.constant 0 : index
    %c0_270 = arith.constant 0 : index
    %566 = vector.load %arg13[%c0_269, %c0_270] : memref<8x128xf32, #tpu.memory_space<vmem>>, vector<8x128xf32>
    tpu.vector_store %arg13[%c0_269, %c0_270], %564 {strides = array<i32>} : memref<8x128xf32, #tpu.memory_space<vmem>>, vector<8x128xf32>,
    %567 = arith.index_cast %531 : i32 to index
    %c0_271 = arith.constant 0 : index
    %568 = vector.load %arg12[%567, %c0_271] : memref<64x128xf32, #tpu.memory_space<vmem>>, vector<8x128xf32>
    tpu.vector_store %arg12[%567, %c0_271], %564 {strides = array<i32>} : memref<64x128xf32, #tpu.memory_space<vmem>>, vector<8x128xf32>,
    %c6_i32_272 = arith.constant 6 : i32
    %c8_i32_273 = arith.constant 8 : i32
    %569 = arith.muli %c6_i32_272, %c8_i32_273 : i32
    %570 = tpu.assume_multiple %569, 8 : i32
    %571 = arith.index_cast %570 : i32 to index
    %c0_274 = arith.constant 0 : index
    %572 = vector.load %arg10[%571, %c0_274] : memref<64x512xf32, #tpu.memory_space<vmem>>, vector<8x512xf32>
    %c0_275 = arith.constant 0 : index
    %c0_276 = arith.constant 0 : index
    %573 = vector.load %arg13[%c0_275, %c0_276] : memref<8x128xf32, #tpu.memory_space<vmem>>, vector<8x128xf32>
    %574 = arith.truncf %573 : vector<8x128xf32> to vector<8x128xbf16>
    %c0_277 = arith.constant 0 : index
    %c0_278 = arith.constant 0 : index
    %575 = vector.load %arg5[%c0_277, %c0_278] : memref<128x512xbf16, #tpu.memory_space<vmem>>, vector<128x512xbf16>
    %cst_279 = arith.constant dense<0.000000e+00> : vector<8x512xf32>
    %576 = tpu.matmul %574, %575, %cst_279 {dimension_numbers = #tpu.dot_dimension_numbers<[1], [0], [0], [1], [0, 0, 1, 1], [], []>} : vector<8x128xbf16>, vector<128x512xbf16>, vector<8x512xf32> -> vector<8x512xf32>
    %577 = arith.addf %572, %576 : vector<8x512xf32>
    %578 = vector.extract_strided_slice %577 {offsets = [0, 0], sizes = [8, 128], strides = [1, 1]} : vector<8x512xf32> to vector<8x128xf32>
    %579 = arith.negf %578 : vector<8x128xf32>
    %580 = math.exp %579 : vector<8x128xf32>
    %cst_280 = arith.constant 1.000000e+00 : f32
    %581 = vector.broadcast %cst_280 : f32 to vector<8x128xf32>
    %582 = arith.addf %581, %580 : vector<8x128xf32>
    %583 = arith.divf %581, %582 : vector<8x128xf32>
    %584 = vector.extract_strided_slice %577 {offsets = [0, 128], sizes = [8, 128], strides = [1, 1]} : vector<8x512xf32> to vector<8x128xf32>
    %585 = arith.negf %584 : vector<8x128xf32>
    %586 = math.exp %585 : vector<8x128xf32>
    %cst_281 = arith.constant 1.000000e+00 : f32
    %587 = vector.broadcast %cst_281 : f32 to vector<8x128xf32>
    %588 = arith.addf %587, %586 : vector<8x128xf32>
    %589 = arith.divf %587, %588 : vector<8x128xf32>
    %590 = vector.extract_strided_slice %577 {offsets = [0, 256], sizes = [8, 128], strides = [1, 1]} : vector<8x512xf32> to vector<8x128xf32>
    %591 = math.tanh %590 : vector<8x128xf32>
    %592 = vector.extract_strided_slice %577 {offsets = [0, 384], sizes = [8, 128], strides = [1, 1]} : vector<8x512xf32> to vector<8x128xf32>
    %593 = arith.negf %592 : vector<8x128xf32>
    %594 = math.exp %593 : vector<8x128xf32>
    %cst_282 = arith.constant 1.000000e+00 : f32
    %595 = vector.broadcast %cst_282 : f32 to vector<8x128xf32>
    %596 = arith.addf %595, %594 : vector<8x128xf32>
    %597 = arith.divf %595, %596 : vector<8x128xf32>
    %c0_283 = arith.constant 0 : index
    %c0_284 = arith.constant 0 : index
    %598 = vector.load %arg14[%c0_283, %c0_284] : memref<8x128xf32, #tpu.memory_space<vmem>>, vector<8x128xf32>
    %599 = arith.mulf %589, %598 : vector<8x128xf32>
    %600 = arith.mulf %583, %591 : vector<8x128xf32>
    %601 = arith.addf %599, %600 : vector<8x128xf32>
    %602 = math.tanh %601 : vector<8x128xf32>
    %603 = arith.mulf %597, %602 : vector<8x128xf32>
    %c0_285 = arith.constant 0 : index
    %c0_286 = arith.constant 0 : index
    %604 = vector.load %arg14[%c0_285, %c0_286] : memref<8x128xf32, #tpu.memory_space<vmem>>, vector<8x128xf32>
    tpu.vector_store %arg14[%c0_285, %c0_286], %601 {strides = array<i32>} : memref<8x128xf32, #tpu.memory_space<vmem>>, vector<8x128xf32>,
    %c0_287 = arith.constant 0 : index
    %c0_288 = arith.constant 0 : index
    %605 = vector.load %arg13[%c0_287, %c0_288] : memref<8x128xf32, #tpu.memory_space<vmem>>, vector<8x128xf32>
    tpu.vector_store %arg13[%c0_287, %c0_288], %603 {strides = array<i32>} : memref<8x128xf32, #tpu.memory_space<vmem>>, vector<8x128xf32>,
    %606 = arith.index_cast %570 : i32 to index
    %c0_289 = arith.constant 0 : index
    %607 = vector.load %arg12[%606, %c0_289] : memref<64x128xf32, #tpu.memory_space<vmem>>, vector<8x128xf32>
    tpu.vector_store %arg12[%606, %c0_289], %603 {strides = array<i32>} : memref<64x128xf32, #tpu.memory_space<vmem>>, vector<8x128xf32>,
    %c7_i32_290 = arith.constant 7 : i32
    %c8_i32_291 = arith.constant 8 : i32
    %608 = arith.muli %c7_i32_290, %c8_i32_291 : i32
    %609 = tpu.assume_multiple %608, 8 : i32
    %610 = arith.index_cast %609 : i32 to index
    %c0_292 = arith.constant 0 : index
    %611 = vector.load %arg10[%610, %c0_292] : memref<64x512xf32, #tpu.memory_space<vmem>>, vector<8x512xf32>
    %c0_293 = arith.constant 0 : index
    %c0_294 = arith.constant 0 : index
    %612 = vector.load %arg13[%c0_293, %c0_294] : memref<8x128xf32, #tpu.memory_space<vmem>>, vector<8x128xf32>
    %613 = arith.truncf %612 : vector<8x128xf32> to vector<8x128xbf16>
    %c0_295 = arith.constant 0 : index
    %c0_296 = arith.constant 0 : index
    %614 = vector.load %arg5[%c0_295, %c0_296] : memref<128x512xbf16, #tpu.memory_space<vmem>>, vector<128x512xbf16>
    %cst_297 = arith.constant dense<0.000000e+00> : vector<8x512xf32>
    %615 = tpu.matmul %613, %614, %cst_297 {dimension_numbers = #tpu.dot_dimension_numbers<[1], [0], [0], [1], [0, 0, 1, 1], [], []>} : vector<8x128xbf16>, vector<128x512xbf16>, vector<8x512xf32> -> vector<8x512xf32>
    %616 = arith.addf %611, %615 : vector<8x512xf32>
    %617 = vector.extract_strided_slice %616 {offsets = [0, 0], sizes = [8, 128], strides = [1, 1]} : vector<8x512xf32> to vector<8x128xf32>
    %618 = arith.negf %617 : vector<8x128xf32>
    %619 = math.exp %618 : vector<8x128xf32>
    %cst_298 = arith.constant 1.000000e+00 : f32
    %620 = vector.broadcast %cst_298 : f32 to vector<8x128xf32>
    %621 = arith.addf %620, %619 : vector<8x128xf32>
    %622 = arith.divf %620, %621 : vector<8x128xf32>
    %623 = vector.extract_strided_slice %616 {offsets = [0, 128], sizes = [8, 128], strides = [1, 1]} : vector<8x512xf32> to vector<8x128xf32>
    %624 = arith.negf %623 : vector<8x128xf32>
    %625 = math.exp %624 : vector<8x128xf32>
    %cst_299 = arith.constant 1.000000e+00 : f32
    %626 = vector.broadcast %cst_299 : f32 to vector<8x128xf32>
    %627 = arith.addf %626, %625 : vector<8x128xf32>
    %628 = arith.divf %626, %627 : vector<8x128xf32>
    %629 = vector.extract_strided_slice %616 {offsets = [0, 256], sizes = [8, 128], strides = [1, 1]} : vector<8x512xf32> to vector<8x128xf32>
    %630 = math.tanh %629 : vector<8x128xf32>
    %631 = vector.extract_strided_slice %616 {offsets = [0, 384], sizes = [8, 128], strides = [1, 1]} : vector<8x512xf32> to vector<8x128xf32>
    %632 = arith.negf %631 : vector<8x128xf32>
    %633 = math.exp %632 : vector<8x128xf32>
    %cst_300 = arith.constant 1.000000e+00 : f32
    %634 = vector.broadcast %cst_300 : f32 to vector<8x128xf32>
    %635 = arith.addf %634, %633 : vector<8x128xf32>
    %636 = arith.divf %634, %635 : vector<8x128xf32>
    %c0_301 = arith.constant 0 : index
    %c0_302 = arith.constant 0 : index
    %637 = vector.load %arg14[%c0_301, %c0_302] : memref<8x128xf32, #tpu.memory_space<vmem>>, vector<8x128xf32>
    %638 = arith.mulf %628, %637 : vector<8x128xf32>
    %639 = arith.mulf %622, %630 : vector<8x128xf32>
    %640 = arith.addf %638, %639 : vector<8x128xf32>
    %641 = math.tanh %640 : vector<8x128xf32>
    %642 = arith.mulf %636, %641 : vector<8x128xf32>
    %c0_303 = arith.constant 0 : index
    %c0_304 = arith.constant 0 : index
    %643 = vector.load %arg14[%c0_303, %c0_304] : memref<8x128xf32, #tpu.memory_space<vmem>>, vector<8x128xf32>
    tpu.vector_store %arg14[%c0_303, %c0_304], %640 {strides = array<i32>} : memref<8x128xf32, #tpu.memory_space<vmem>>, vector<8x128xf32>,
    %c0_305 = arith.constant 0 : index
    %c0_306 = arith.constant 0 : index
    %644 = vector.load %arg13[%c0_305, %c0_306] : memref<8x128xf32, #tpu.memory_space<vmem>>, vector<8x128xf32>
    tpu.vector_store %arg13[%c0_305, %c0_306], %642 {strides = array<i32>} : memref<8x128xf32, #tpu.memory_space<vmem>>, vector<8x128xf32>,
    %645 = arith.index_cast %609 : i32 to index
    %c0_307 = arith.constant 0 : index
    %646 = vector.load %arg12[%645, %c0_307] : memref<64x128xf32, #tpu.memory_space<vmem>>, vector<8x128xf32>
    tpu.vector_store %arg12[%645, %c0_307], %642 {strides = array<i32>} : memref<64x128xf32, #tpu.memory_space<vmem>>, vector<8x128xf32>,
    %c8_i32_308 = arith.constant 8 : i32
    %c0_309 = arith.constant 0 : index
    %c0_310 = arith.constant 0 : index
    %647 = vector.load %arg12[%c0_309, %c0_310] : memref<64x128xf32, #tpu.memory_space<vmem>>, vector<64x128xf32>
    %648 = arith.truncf %647 : vector<64x128xf32> to vector<64x128xbf16>
    %c0_311 = arith.constant 0 : index
    %c0_312 = arith.constant 0 : index
    %649 = vector.load %arg7[%c0_311, %c0_312] : memref<128x128xbf16, #tpu.memory_space<vmem>>, vector<128x128xbf16>
    %cst_313 = arith.constant dense<0.000000e+00> : vector<64x128xf32>
    %650 = tpu.matmul %648, %649, %cst_313 {dimension_numbers = #tpu.dot_dimension_numbers<[1], [0], [0], [1], [0, 0, 1, 1], [], []>} : vector<64x128xbf16>, vector<128x128xbf16>, vector<64x128xf32> -> vector<64x128xf32>
    %c0_314 = arith.constant 0 : index
    %c0_315 = arith.constant 0 : index
    %651 = vector.load %arg8[%c0_314, %c0_315] : memref<1x128xf32, #tpu.memory_space<vmem>>, vector<1x128xf32>
    %652 = vector.broadcast %651 : vector<1x128xf32> to vector<64x128xf32>
    %653 = arith.addf %650, %652 : vector<64x128xf32>
    %c0_316 = arith.constant 0 : index
    %c0_317 = arith.constant 0 : index
    %654 = vector.load %arg9[%c0_316, %c0_317] : memref<64x128xf32, #tpu.memory_space<vmem>>, vector<64x128xf32>
    tpu.vector_store %arg9[%c0_316, %c0_317], %653 {strides = array<i32>} : memref<64x128xf32, #tpu.memory_space<vmem>>, vector<64x128xf32>,
    return
  }
}

</mosaic_0001>

<bundles_post_ra>
// kernel: name_generator_lstm_forward.1
= control target key start
LH: loop header
LB: loop body
LE: loop exit
PB: predicated region body
PF: predicated region fallthrough
CT: control target
= control target key end

     0   :  { %14 = vsyncpa [#allocation8], 0  ;;  %s8590_s0 = inlined_call_operand.vmem [shape: bf16[64,32], index: 0, kind: input, shape index: {}]   ;;  %s8591_s1 = inlined_call_operand.vmem [shape: bf16[32,512], index: 1, kind: input, shape index: {}]   ;;  %s8592_s2 = inlined_call_operand.hbm [shape: bf16[128,512], index: 2, kind: input, shape index: {}]   ;;  %s8593_s3 = inlined_call_operand.vmem [shape: f32[1,512], index: 3, kind: input, shape index: {}]   ;;  %s8594_s4 = inlined_call_operand.hbm [shape: bf16[128,512], index: 4, kind: input, shape index: {}]   ;;  %s8595_s5 = inlined_call_operand.hbm [shape: bf16[128,512], index: 5, kind: input, shape index: {}]   ;;  %s8596_s6 = inlined_call_operand.vmem [shape: f32[1,512], index: 6, kind: input, shape index: {}]   ;;  %s8597_s7 = inlined_call_operand.hbm [shape: bf16[128,128], index: 7, kind: input, shape index: {}]   ;;  %s8598_s8 = inlined_call_operand.vmem [shape: f32[1,128], index: 8, kind: input, shape index: {}]   ;;  %s8599_s9 = inlined_call_operand.vmem [shape: f32[64,128], index: 9, kind: output, shape index: {}]  }
   0x1   :  { %15 = vsyncpa [#allocation10], 0 }
   0x2   :  { %16 = vsyncpa [#allocation13], 0  ;;  %s7281_s30 = smov [#allocation9]   ;;  %s7282_s11 = smov [#allocation7]  }
   0x3   :  { %s40_s10 = sshll.u32 %s7281_s30, 4  ;;  %s26_s12 = sshll.u32 %s7282_s11, 4  ;;  %s41_s10 = int_to_ptr.vmem [resolvable:$true] %s40_s10  ;;  %s27_s12 = int_to_ptr.vmem [resolvable:$true] %s26_s12 }
   0x4   :  { %s7203_s13 = scalar_lea.vmem %s41_s10, 4096  ;;  %p7208_p1 = scmp.lt.s32.totalorder %s41_s10, %s41_s10 }
   0x5   :  { %p7204_p0 = scmp.ne.s32.totalorder %s41_s10, %s7203_s13  ;;  %p7209_p2 = scmp.lt.s32.totalorder %s7203_s13, %s7203_s13 }
   0x7   :  { %p7210_p3 = por %p7209_p2, %p7208_p1 }
   0x9   :  { %p7211_p4 = pnand %p7210_p3, %p7204_p0 }
   0xb   :  { %7214 = shalt.err (!%p7211_p4)
}
   0xc   :  { %s7283_s14 = smov 256   ;;  %s7284_s15 = smov 16  }
   0xd   :  { %46 = dma.hbm_to_vmem [thread:$0]  %s8594_s4, 4096, %s41_s10, [#allocation10], %s7283_s14, %s7283_s14, %s7284_s15  }
   0xe   :  { %s7223_s18 = scalar_lea.vmem %s27_s12, 4096  ;;  %p7228_p6 = scmp.lt.s32.totalorder %s27_s12, %s27_s12 }
   0xf   :  { %p7224_p5 = scmp.ne.s32.totalorder %s27_s12, %s7223_s18  ;;  %p7229_p7 = scmp.lt.s32.totalorder %s7223_s18, %s7223_s18 }
  0x11   :  { %p7230_p8 = por %p7229_p7, %p7228_p6 }
  0x13   :  { %p7231_p9 = pnand %p7230_p8, %p7224_p5 }
  0x15   :  { %7234 = shalt.err (!%p7231_p9)
}
  0x16   :  { %32 = dma.hbm_to_vmem [thread:$0]  %s8592_s2, 4096, %s27_s12, [#allocation8], %s7283_s14, %s7283_s14, %s7284_s15  }
  0x17   :  { %s7285_s21 = smov [#allocation11]   ;;  %s7286_s23 = smov [#allocation12]  }
  0x18   :  { %s52_s22 = sshll.u32 %s7285_s21, 4  ;;  %s66_s24 = sshll.u32 %s7286_s23, 4  ;;  %s53_s22 = int_to_ptr.vmem [resolvable:$true] %s52_s22  ;;  %s67_s24 = int_to_ptr.vmem [resolvable:$true] %s66_s24 }
  0x19   :  { %s7243_s25 = scalar_lea.vmem %s53_s22, 4096  ;;  %p7248_p11 = scmp.lt.s32.totalorder %s53_s22, %s53_s22 }
  0x1a   :  { %p7244_p10 = scmp.ne.s32.totalorder %s53_s22, %s7243_s25  ;;  %p7249_p12 = scmp.lt.s32.totalorder %s7243_s25, %s7243_s25 }
  0x1c   :  { %p7250_p13 = por %p7249_p12, %p7248_p11 }
  0x1e   :  { %p7251_p0 = pnand %p7250_p13, %p7244_p10 }
  0x20   :  { %7254 = shalt.err (!%p7251_p0)
}
  0x21   :  { %58 = dma.hbm_to_vmem [thread:$0]  %s8595_s5, 4096, %s53_s22, [#allocation10], %s7283_s14, %s7283_s14, %s7284_s15  }
  0x22   :  { %s7263_s27 = scalar_lea.vmem %s67_s24, 1024  ;;  %p7268_p2 = scmp.lt.s32.totalorder %s67_s24, %s67_s24 }
  0x23   :  { %p7264_p1 = scmp.ne.s32.totalorder %s67_s24, %s7263_s27  ;;  %p7269_p3 = scmp.lt.s32.totalorder %s7263_s27, %s7263_s27 }
  0x25   :  { %p7270_p4 = por %p7269_p3, %p7268_p2 }
  0x27   :  { %p7271_p5 = pnand %p7270_p4, %p7264_p1 }
  0x29   :  { %7274 = shalt.err (!%p7271_p5)
}
  0x2a   :  { %s7287_s2 = smov 64   ;;  %s7288_s28 = smov 4  }
  0x2b   :  { %72 = dma.hbm_to_vmem [thread:$0]  %s8597_s7, 1024, %s67_s24, [#allocation13], %s7287_s2, %s7287_s2, %s7288_s28  }
  0x2c   :  { %7275 = dma.done.wait [#allocation8], 4096  }
  0x2d   :  { %7276 = vsyncadd [#allocation8], 4294963200 }
  0x2e   :  { %7277 = dma.done.wait [#allocation10], 8192  }
  0x2f   :  { %7278 = vsyncadd [#allocation10], 4294959104 }
  0x30   :  { %7279 = dma.done.wait [#allocation13], 1024  }
  0x31   :  { %7280 = vsyncadd [#allocation13], 4294966272  ;;  %v8604_v0 = vmov 0   ;;  %v6652_v1 = vld [vmem:[%s8591_s1 + $0x24] ss:$16 sps:$4 sm:$0xff]   ;;  %vm186_vm0 = vcmask 261120   ;;  %v106_v46 = vlaneseq }
  0x32   :  { %231 = vmatprep.mubr.bf16.mxu1 %v8604_v0  ;;  %612 = vmatprep.mubr.bf16.mxu0 %v8604_v0  ;;  %v7358_v2 = vld [vmem:[#allocation7 + $0xe4] ss:$16 sps:$4 sm:$0xff]   ;;  %v6656_v3 = vld [vmem:[%s8591_s1 + $0x20] ss:$16 sps:$4 sm:$0xff]   ;;  %v6665_v10 = vld [vmem:[%s8591_s1 + $0x28] ss:$16 sps:$4 sm:$0xff]  }
  0x33   :  { %211 = vmatprep.subr.bf16.mxu1 %v6652_v1  ;;  %v7363_v4 = vld [vmem:[#allocation7 + $0xe0] ss:$16 sps:$4 sm:$0xff]   ;;  %580 = vmatprep.subr.bf16.mxu0 %v7358_v2  ;;  %v6658_v5 = vld [vmem:[%s8591_s1 + $0x4] ss:$16 sps:$4 sm:$0xff]   ;;  %v6667_v11 = vld [vmem:[%s8591_s1 + $0x2c] ss:$16 sps:$4 sm:$0xff]  }
  0x34   :  { %212 = vmatpush1.bf16.msra.mxu1 %v6656_v3  ;;  %581 = vmatpush1.bf16.msra.mxu0 %v7363_v4  ;;  %v7370_v6 = vld [vmem:[#allocation7 + $0xc4] ss:$16 sps:$4 sm:$0xff]   ;;  %v6662_v7 = vld [vmem:[%s8591_s1] ss:$16 sps:$4 sm:$0xff]   ;;  %v6674_v17 = vld [vmem:[%s8590_s0 + $0x8] sm:$0xff]   ;;  %v8602_v30 = vmov 0.0|0.0  }
  0x35   :  { %213 = vmatprep.subr.bf16.mxu1 %v6658_v5  ;;  %v7375_v8 = vld [vmem:[#allocation7 + $0xc0] ss:$16 sps:$4 sm:$0xff]   ;;  %582 = vmatprep.subr.bf16.mxu0 %v7370_v6  ;;  %v7388_v12 = vld [vmem:[#allocation7 + $0xa4] ss:$16 sps:$4 sm:$0xff]   ;;  %v6684_v19 = vld [vmem:[%s8591_s1 + $0xc] ss:$16 sps:$4 sm:$0xff]  }
  0x36   :  { %v6664_v9 = vld [vmem:[%s8590_s0] sm:$0xff]   ;;  %v6682_v21 = vld [vmem:[%s8591_s1 + $0x8] ss:$16 sps:$4 sm:$0xff]   ;;  %v7426_v24 = vld [vmem:[#allocation7 + $0xec] ss:$16 sps:$4 sm:$0xff]   ;;  %v7541_v47 = vshrl.u32 %v106_v46, 7 }
  0x37   :  { %v7390_v13 = vld [vmem:[#allocation7 + $0xa0] ss:$16 sps:$4 sm:$0xff]   ;;  %v7392_v14 = vld [vmem:[#allocation7 + $0x84] ss:$16 sps:$4 sm:$0xff]   ;;  %v6691_v29 = vld [vmem:[%s8590_s0 + $0x18] sm:$0xff]  }
  0x38   :  { %214 = vmatpush1.bf16.msra.mxu1 %v6662_v7  ;;  %583 = vmatpush1.bf16.msra.mxu0 %v7375_v8  ;;  %v7397_v15 = vld [vmem:[#allocation7 + $0x80] ss:$16 sps:$4 sm:$0xff]   ;;  %v7401_v16 = vld [vmem:[#allocation7 + $0x64] ss:$16 sps:$4 sm:$0xff]   ;;  %v7455_v31 = vld [vmem:[#allocation7 + $0xe8] ss:$16 sps:$4 sm:$0xff]  }
  0x39   :  { %284 = vmatprep.subr.bf16.mxu1 %v6667_v11  ;;  %584 = vmatprep.subr.bf16.mxu0 %v7388_v12  ;;  %v7406_v18 = vld [vmem:[#allocation7 + $0x60] ss:$16 sps:$4 sm:$0xff]   ;;  %v7413_v20 = vld [vmem:[#allocation7 + $0x44] ss:$16 sps:$4 sm:$0xff]   ;;  %v7457_v32 = vld [vmem:[#allocation7 + $0xcc] ss:$16 sps:$4 sm:$0xff]  }
  0x3a   :  { %v7419_v22 = vld [vmem:[#allocation7 + $0x40] ss:$16 sps:$4 sm:$0xff]   ;;  %v7423_v23 = vld [vmem:[#allocation7 + $0x24] ss:$16 sps:$4 sm:$0xff]   ;;  %v7461_v33 = vld [vmem:[#allocation7 + $0xc8] ss:$16 sps:$4 sm:$0xff]  }
  0x3b   :  { %5997 = vmatmul.mubr.msk.bf16.vlgmr.msra.gmra.mxu1 %vm186_vm0, %v6664_v9  ;;  %v6681_v25 = vld [vmem:[%s8590_s0 + $0x10] sm:$0xff]   ;;  %v7464_v34 = vld [vmem:[#allocation7 + $0xac] ss:$16 sps:$4 sm:$0xff]   ;;  %v7470_v35 = vld [vmem:[#allocation7 + $0xa8] ss:$16 sps:$4 sm:$0xff]   ;;  %8610 = vst [vmem:[#allocation17_spill] sm:$0xff] %v7541_v47 }
  0x3c   :  { %285 = vmatpush1.bf16.msra.mxu1 %v6665_v10  ;;  %585 = vmatpush1.bf16.msra.mxu0 %v7390_v13  ;;  %v7433_v26 = vld [vmem:[#allocation7 + $0x20] ss:$16 sps:$4 sm:$0xff]   ;;  %v7436_v27 = vld [vmem:[#allocation7 + $0x4] ss:$16 sps:$4 sm:$0xff]   ;;  %v7473_v36 = vld [vmem:[#allocation7 + $0x8c] ss:$16 sps:$4 sm:$0xff]  }
  0x3d   :  { %586 = vmatprep.subr.bf16.mxu0 %v7392_v14  ;;  %241 = vmatprep.mubr.bf16.mxu1 %v8604_v0  ;;  %v7440_v28 = vld [vmem:[#allocation7] ss:$16 sps:$4 sm:$0xff]   ;;  %v7478_v37 = vld [vmem:[#allocation7 + $0x88] ss:$16 sps:$4 sm:$0xff]   ;;  %v7482_v38 = vld [vmem:[#allocation7 + $0x6c] ss:$16 sps:$4 sm:$0xff]  }
  0x3e   :  { %286 = vmatprep.subr.bf16.mxu1 %v6684_v19  ;;  %v7488_v39 = vld [vmem:[#allocation7 + $0x68] ss:$16 sps:$4 sm:$0xff]   ;;  %v7491_v40 = vld [vmem:[#allocation7 + $0x4c] ss:$16 sps:$4 sm:$0xff]   ;;  %v8601_v48 = vsub.s32 0, %v7541_v47  ;;  %v8600_v51 = vsub.s32 1, %v7541_v47 }
  0x3f   :  { %v7496_v41 = vld [vmem:[#allocation7 + $0x48] ss:$16 sps:$4 sm:$0xff]   ;;  %v7500_v42 = vld [vmem:[#allocation7 + $0x2c] ss:$16 sps:$4 sm:$0xff]   ;;  %v104_v49 = vld [vmem:[%s8593_s3] sm:$0xf] }
  0x40   :  { %587 = vmatpush1.bf16.msra.mxu0 %v7397_v15  ;;  %287 = vmatpush1.bf16.msra.mxu1 %v6682_v21  ;;  %v7506_v43 = vld [vmem:[#allocation7 + $0x28] ss:$16 sps:$4 sm:$0xff]   ;;  %v7509_v44 = vld [vmem:[#allocation7 + $0xc] ss:$16 sps:$4 sm:$0xff]   ;;  %v109_v53 = vrot.slane %v104_v49, %v8601_v48  ;;  %v113_v55 = vrot.slane %v104_v49, %v8600_v51  ;;  %v8607_v48 = vsub.s32 3, %v7541_v47 }
  0x41   :  { %588 = vmatprep.subr.bf16.mxu0 %v7401_v16  ;;  %621 = vmatprep.subr.bf16.mxu1 %v7426_v24  ;;  %v7514_v45 = vld [vmem:[#allocation7 + $0x8] ss:$16 sps:$4 sm:$0xff]  }
  0x43   :  { %5998 = vmatmul.mubr.msk.bf16.gmra.mxu1 %vm186_vm0, %v6674_v17 }
  0x44   :  { %589 = vmatpush1.bf16.msra.mxu0 %v7406_v18  ;;  %251 = vmatprep.mubr.bf16.mxu1 %v8604_v0 }
  0x45   :  { %590 = vmatprep.subr.bf16.mxu0 %v7413_v20 }
  0x48   :  { %591 = vmatpush1.bf16.msra.mxu0 %v7419_v22 }
  0x49   :  { %592 = vmatprep.subr.bf16.mxu0 %v7423_v23 }
  0x4b   :  { %5999 = vmatmul.mubr.msk.bf16.gmra.mxu1 %vm186_vm0, %v6681_v25 }
  0x4c   :  { %593 = vmatpush1.bf16.msra.mxu0 %v7433_v26  ;;  %261 = vmatprep.mubr.bf16.mxu1 %v8604_v0 }
  0x4d   :  { %594 = vmatprep.subr.bf16.mxu0 %v7436_v27 }
  0x50   :  { %595 = vmatpush1.bf16.msra.mxu0 %v7440_v28 }
  0x51   :  { %895 = vmatprep.subr.bf16.mxu0 %v7358_v2 }
  0x53   :  { %6000 = vmatmul.mubr.msk.bf16.gmra.mxu1 %vm186_vm0, %v6691_v29  ;;  %613 = vmatmul.mubr.bf16.vlgmr.msra.gmra.mxu0 %v8602_v30 }
  0x54   :  { %304 = vmatprep.mubr.bf16.mxu1 %v8604_v0  ;;  %896 = vmatpush1.bf16.msra.mxu0 %v7363_v4 }
  0x55   :  { %897 = vmatprep.subr.bf16.mxu0 %v7370_v6  ;;  %927 = vmatprep.mubr.bf16.mxu0 %v8604_v0 }
  0x58   :  { %898 = vmatpush1.bf16.msra.mxu0 %v7375_v8 }
  0x59   :  { %899 = vmatprep.subr.bf16.mxu0 %v7388_v12 }
  0x5b   :  { %6001 = vmatmul.mubr.msk.bf16.vlgmr.msra.gmra.mxu1 %vm186_vm0, %v6664_v9 }
  0x5c   :  { %622 = vmatpush1.bf16.msra.mxu1 %v7455_v31  ;;  %314 = vmatprep.mubr.bf16.mxu1 %v8604_v0 }
  0x5d   :  { %623 = vmatprep.subr.bf16.mxu1 %v7457_v32  ;;  %900 = vmatpush1.bf16.msra.mxu0 %v7390_v13 }
  0x5e   :  { %901 = vmatprep.subr.bf16.mxu0 %v7392_v14 }
  0x60   :  { %624 = vmatpush1.bf16.msra.mxu1 %v7461_v33 }
  0x61   :  { %625 = vmatprep.subr.bf16.mxu1 %v7464_v34  ;;  %902 = vmatpush1.bf16.msra.mxu0 %v7397_v15 }
  0x62   :  { %903 = vmatprep.subr.bf16.mxu0 %v7401_v16 }
  0x63   :  { %6002 = vmatmul.mubr.msk.bf16.gmra.mxu1 %vm186_vm0, %v6674_v17 }
  0x64   :  { %626 = vmatpush1.bf16.msra.mxu1 %v7470_v35  ;;  %324 = vmatprep.mubr.bf16.mxu1 %v8604_v0 }
  0x65   :  { %627 = vmatprep.subr.bf16.mxu1 %v7473_v36  ;;  %904 = vmatpush1.bf16.msra.mxu0 %v7406_v18 }
  0x66   :  { %905 = vmatprep.subr.bf16.mxu0 %v7413_v20 }
  0x68   :  { %628 = vmatpush1.bf16.msra.mxu1 %v7478_v37 }
  0x69   :  { %629 = vmatprep.subr.bf16.mxu1 %v7482_v38  ;;  %906 = vmatpush1.bf16.msra.mxu0 %v7419_v22 }
  0x6a   :  { %907 = vmatprep.subr.bf16.mxu0 %v7423_v23 }
  0x6b   :  { %6003 = vmatmul.mubr.msk.bf16.gmra.mxu1 %vm186_vm0, %v6681_v25 }
  0x6c   :  { %630 = vmatpush1.bf16.msra.mxu1 %v7488_v39  ;;  %334 = vmatprep.mubr.bf16.mxu1 %v8604_v0 }
  0x6d   :  { %631 = vmatprep.subr.bf16.mxu1 %v7491_v40  ;;  %908 = vmatpush1.bf16.msra.mxu0 %v7433_v26 }
  0x6e   :  { %909 = vmatprep.subr.bf16.mxu0 %v7436_v27 }
  0x70   :  { %632 = vmatpush1.bf16.msra.mxu1 %v7496_v41 }
  0x71   :  { %633 = vmatprep.subr.bf16.mxu1 %v7500_v42  ;;  %910 = vmatpush1.bf16.msra.mxu0 %v7440_v28 }
  0x72   :  { %1211 = vmatprep.subr.bf16.mxu0 %v7358_v2 }
  0x73   :  { %6004 = vmatmul.mubr.msk.bf16.gmra.mxu1 %vm186_vm0, %v6691_v29 }
  0x74   :  { %634 = vmatpush1.bf16.msra.mxu1 %v7506_v43  ;;  %653 = vmatprep.mubr.bf16.mxu1 %v8604_v0 }
  0x75   :  { %635 = vmatprep.subr.bf16.mxu1 %v7509_v44 }
  0x78   :  { %636 = vmatpush1.bf16.msra.mxu1 %v7514_v45 }
  0x79   :  { %936 = vmatprep.subr.bf16.mxu1 %v7426_v24 }
  0x7b   :  { %654 = vmatmul.mubr.bf16.vlgmr.msra.gmra.mxu1 %v8602_v30 }
  0x7c   :  { %937 = vmatpush1.bf16.msra.mxu1 %v7455_v31  ;;  %968 = vmatprep.mubr.bf16.mxu1 %v8604_v0 }
  0x7d   :  { %938 = vmatprep.subr.bf16.mxu1 %v7457_v32 }
  0x80   :  { %939 = vmatpush1.bf16.msra.mxu1 %v7461_v33 }
  0x81   :  { %940 = vmatprep.subr.bf16.mxu1 %v7464_v34 }
  0x84   :  { %941 = vmatpush1.bf16.msra.mxu1 %v7470_v35 }
  0x85   :  { %942 = vmatprep.subr.bf16.mxu1 %v7473_v36 }
  0x88   :  { %943 = vmatpush1.bf16.msra.mxu1 %v7478_v37 }
  0x89   :  { %944 = vmatprep.subr.bf16.mxu1 %v7482_v38 }
  0x8c   :  { %945 = vmatpush1.bf16.msra.mxu1 %v7488_v39 }
  0x8d   :  { %946 = vmatprep.subr.bf16.mxu1 %v7491_v40 }
  0x90   :  { %947 = vmatpush1.bf16.msra.mxu1 %v7496_v41 }
  0x91   :  { %948 = vmatprep.subr.bf16.mxu1 %v7500_v42 }
  0x94   :  { %949 = vmatpush1.bf16.msra.mxu1 %v7506_v43 }
  0x95   :  { %950 = vmatprep.subr.bf16.mxu1 %v7509_v44 }
  0x98   :  { %951 = vmatpush1.bf16.msra.mxu1 %v7514_v45 }
  0x99   :  { %1252 = vmatprep.subr.bf16.mxu1 %v7426_v24 }
  0xfb   :  { %v233_v50 = vpop.f32.mrf.mxu1 }
  0xfd   :  { %v235_v52 = vpop.f32.mrf.mxu1 }
  0xff   :  { %v237_v54 = vpop.f32.mrf.mxu1 }
 0x100   :  { %v7552_v56 = vadd.f32 %v237_v54, %v109_v53 }
 0x101   :  { %v239_v57 = vpop.f32.mrf.mxu1 }
 0x102   :  { %v7554_v58 = vadd.f32 %v239_v57, %v113_v55 }
 0x103   :  { %v243_v59 = vpop.f32.mrf.mxu1 }
 0x104   :  { %v7556_v60 = vadd.f32 %v243_v59, %v109_v53 }
 0x105   :  { %v245_v61 = vpop.f32.mrf.mxu1 }
 0x106   :  { %v7558_v62 = vadd.f32 %v245_v61, %v113_v55 }
 0x107   :  { %v247_v63 = vpop.f32.mrf.mxu1 }
 0x108   :  { %v7560_v1 = vadd.f32 %v247_v63, %v109_v53 }
 0x109   :  { %v249_v2 = vpop.f32.mrf.mxu1 }
 0x10a   :  { %v7562_v3 = vadd.f32 %v249_v2, %v113_v55 }
 0x10b   :  { %v253_v5 = vpop.f32.mrf.mxu1 }
 0x10c   :  { %v7564_v7 = vadd.f32 %v253_v5, %v109_v53 }
 0x10d   :  { %v255_v9 = vpop.f32.mrf.mxu1 }
 0x10e   :  { %8611 = vst [vmem:[#allocation18_spill] sm:$0xff] %v7564_v7  ;;  %v7566_v10 = vadd.f32 %v255_v9, %v113_v55 }
 0x10f   :  { %v257_v11 = vpop.f32.mrf.mxu1 }
 0x110   :  { %8612 = vst [vmem:[#allocation19_spill] sm:$0xff] %v7566_v10  ;;  %v7568_v17 = vadd.f32 %v257_v11, %v109_v53  ;;  %v8606_v11 = vsub.s32 2, %v7541_v47 }
 0x111   :  { %v259_v19 = vpop.f32.mrf.mxu1 }
 0x112   :  { %8613 = vst [vmem:[#allocation20_spill] sm:$0xff] %v7568_v17  ;;  %v7570_v21 = vadd.f32 %v259_v19, %v113_v55  ;;  %v117_v0 = vrot.slane %v104_v49, %v8606_v11 }
 0x113   :  { %v263_v25 = vpop.f32.mrf.mxu1  ;;  %v614_v29 = vpop.f32.mrf.mxu0 }
 0x114   :  { %8614 = vst [vmem:[#allocation21_spill] sm:$0xff] %v7570_v21  ;;  %v7572_v46 = vadd.f32 %v263_v25, %v109_v53  ;;  %v236_v25 = vadd.f32 %v235_v52, %v113_v55 }
 0x115   :  { %v265_v54 = vpop.f32.mrf.mxu1  ;;  %v616_v57 = vpop.f32.mrf.mxu0 }
 0x116   :  { %8615 = vst [vmem:[#allocation22_spill] sm:$0xff] %v7572_v46  ;;  %v7574_v59 = vadd.f32 %v265_v54, %v113_v55  ;;  %v234_v54 = vadd.f32 %v233_v50, %v109_v53  ;;  %v663_v46 = vadd.f32 %v616_v57, %v236_v25 }
 0x117   :  { %v267_v61 = vpop.f32.mrf.mxu1  ;;  %v618_v63 = vpop.f32.mrf.mxu0 }
 0x118   :  { %8616 = vst [vmem:[#allocation23_spill] sm:$0xff] %v7574_v59  ;;  %v7576_v2 = vadd.f32 %v267_v61, %v109_v53  ;;  %v121_v61 = vrot.slane %v104_v49, %v8607_v48  ;;  %v6038_v21 = vmul.f32 -1.442695, %v663_v46 }
 0x119   :  { %v269_v5 = vpop.f32.mrf.mxu1  ;;  %v619_v9 = vpop.f32.mrf.mxu0 }
 0x11a   :  { %8617 = vst [vmem:[#allocation24_spill] sm:$0xff] %v7576_v2  ;;  %v7578_v51 = vadd.f32 %v269_v5, %v113_v55  ;;  %v662_v5 = vadd.f32 %v614_v29, %v234_v54  ;;  %6937 = vpow2.f32 %v6038_v21 }
 0x11b   :  { %v306_v19 = vpop.f32.mrf.mxu1 }
 0x11c   :  { %8618 = vst [vmem:[#allocation25_spill] sm:$0xff] %v7578_v51  ;;  %v6037_v52 = vmul.f32 -1.442695, %v662_v5 }
 0x11d   :  { %v308_v30 = vpop.f32.mrf.mxu1 }
 0x11e   :  { %6939 = vpow2.f32 %v6037_v52 }
 0x11f   :  { %v310_v59 = vpop.f32.mrf.mxu1 }
 0x120   :  { %v7586_v63 = vadd.f32 %v310_v59, %v117_v0 }
 0x121   :  { %v312_v9 = vpop.f32.mrf.mxu1 }
 0x122   :  { %v7588_v51 = vadd.f32 %v312_v9, %v121_v61 }
 0x123   :  { %v316_v2 = vpop.f32.mrf.mxu1 }
 0x124   :  { %v7590_v17 = vadd.f32 %v316_v2, %v117_v0 }
 0x125   :  { %v318_v55 = vpop.f32.mrf.mxu1 }
 0x126   :  { %v7592_v10 = vadd.f32 %v318_v55, %v121_v61 }
 0x127   :  { %v320_v50 = vpop.f32.mrf.mxu1 }
 0x128   :  { %v7594_v53 = vadd.f32 %v320_v50, %v117_v0  ;;  %v6938_v50 = vpop.eup %6937 }
 0x129   :  { %v322_v49 = vpop.f32.mrf.mxu1 }
 0x12a   :  { %8619 = vst [vmem:[#allocation26_spill] sm:$0xff] %v7594_v53  ;;  %v7596_v57 = vadd.f32 %v322_v49, %v121_v61 }
 0x12b   :  { %v326_v29 = vpop.f32.mrf.mxu1  ;;  %v6940_v11 = vpop.eup %6939 }
 0x12c   :  { %v7598_v59 = vadd.f32 %v326_v29, %v117_v0  ;;  %v675_v29 = vadd.f32 1.0, %v6938_v50 }
 0x12d   :  { %v328_v25 = vpop.f32.mrf.mxu1 }
 0x12e   :  { %8620 = vst [vmem:[#allocation27_spill] sm:$0xff] %v7598_v59  ;;  %v7600_v54 = vadd.f32 %v328_v25, %v121_v61  ;;  %v669_v25 = vadd.f32 1.0, %v6940_v11  ;;  %6941 = vrcp.f32 %v675_v29 }
 0x12f   :  { %v330_v46 = vpop.f32.mrf.mxu1 }
 0x130   :  { %8621 = vst [vmem:[#allocation28_spill] sm:$0xff] %v7600_v54  ;;  %v7602_v2 = vadd.f32 %v330_v46, %v117_v0  ;;  %v307_v54 = vadd.f32 %v306_v19, %v117_v0  ;;  %6943 = vrcp.f32 %v669_v25 }
 0x131   :  { %v332_v5 = vpop.f32.mrf.mxu1 }
 0x132   :  { %8622 = vst [vmem:[#allocation29_spill] sm:$0xff] %v7602_v2  ;;  %v7604_v9 = vadd.f32 %v332_v5, %v121_v61  ;;  %v309_v5 = vadd.f32 %v308_v30, %v121_v61 }
 0x133   :  { %v336_v55 = vpop.f32.mrf.mxu1 }
 0x134   :  { %8623 = vst [vmem:[#allocation30_spill] sm:$0xff] %v7604_v9  ;;  %v7606_v21 = vadd.f32 %v336_v55, %v117_v0 }
 0x135   :  { %v338_v52 = vpop.f32.mrf.mxu1 }
 0x136   :  { %8624 = vst [vmem:[#allocation31_spill] sm:$0xff] %v7606_v21  ;;  %v7608_v49 = vadd.f32 %v338_v52, %v121_v61 }
 0x137   :  { %v340_v48 = vpop.f32.mrf.mxu1 }
 0x138   :  { %8625 = vst [vmem:[#allocation32_spill] sm:$0xff] %v7608_v49  ;;  %v7610_v47 = vadd.f32 %v340_v48, %v117_v0 }
 0x139   :  { %v342_v59 = vpop.f32.mrf.mxu1 }
 0x13a   :  { %8626 = vst [vmem:[#allocation33_spill] sm:$0xff] %v7610_v47  ;;  %v7612_v46 = vadd.f32 %v342_v59, %v121_v61 }
 0x13b   :  { %v655_v2 = vpop.f32.mrf.mxu1  ;;  %v6942_v50 = vpop.eup %6941 }
 0x13c   :  { %v664_v9 = vadd.f32 %v655_v2, %v307_v54  ;;  %v686_v11 = vmul.f32 0.0, %v6942_v50 }
 0x13d   :  { %v657_v55 = vpop.f32.mrf.mxu1  ;;  %v6944_v48 = vpop.eup %6943 }
 0x13e   :  { %6945 = vtanh.f32 %v664_v9  ;;  %v665_v21 = vadd.f32 %v657_v55, %v309_v5 }
 0x13f   :  { %v659_v7 = vpop.f32.mrf.mxu1 }
 0x140   :  { %v6039_v52 = vmul.f32 -1.442695, %v665_v21 }
 0x141   :  { %v660_v49 = vpop.f32.mrf.mxu1 }
 0x142   :  { %6947 = vpow2.f32 %v6039_v52 }
 0x14b   :  { %v6946_v47 = vpop.eup %6945 }
 0x14c   :  { %v687_v53 = vmul.f32 %v6946_v47, %v6944_v48  ;;  %v8627_v47 = vmov 0   ;;  %v7721_v48 = vld [vmem:[#allocation7] ss:$16 sps:$4 sm:$0xff]  }
 0x14e   :  { %v7614_v0 = vadd.f32 %v687_v53, %v686_v11 }
 0x14f   :  { %v6948_v19 = vpop.eup %6947 }
 0x150   :  { %v682_v59 = vadd.f32 1.0, %v6948_v19  ;;  %6949 = vtanh.f32 %v7614_v0 }
 0x152   :  { %6951 = vrcp.f32 %v682_v59 }
 0x15d   :  { %v6950_v30 = vpop.eup %6949 }
 0x15f   :  { %v6952_v61 = vpop.eup %6951 }
 0x160   :  { %v7617_v54 = vmul.f32 %v6952_v61, %v6950_v30 }
 0x162   :  { %v702_v7 = vpack.c.bf16 %v7617_v54, %v7617_v54 }
 0x164   :  { %928 = vmatmul.mubr.bf16.vlgmr.msra.gmra.mxu0 %v702_v7  ;;  %969 = vmatmul.mubr.bf16.vlgmr.msra.gmra.mxu1 %v702_v7 }
 0x165   :  { %1212 = vmatpush1.bf16.msra.mxu0 %v7363_v4  ;;  %1253 = vmatpush1.bf16.msra.mxu1 %v7455_v31 }
 0x166   :  { %1213 = vmatprep.subr.bf16.mxu0 %v7370_v6  ;;  %1254 = vmatprep.subr.bf16.mxu1 %v7457_v32 }
 0x167   :  { %1243 = vmatprep.mubr.bf16.mxu0 %v8627_v47  ;;  %1284 = vmatprep.mubr.bf16.mxu1 %v8627_v47 }
 0x169   :  { %1214 = vmatpush1.bf16.msra.mxu0 %v7375_v8  ;;  %1255 = vmatpush1.bf16.msra.mxu1 %v7461_v33 }
 0x16a   :  { %1215 = vmatprep.subr.bf16.mxu0 %v7388_v12  ;;  %1256 = vmatprep.subr.bf16.mxu1 %v7464_v34 }
 0x16d   :  { %1216 = vmatpush1.bf16.msra.mxu0 %v7390_v13  ;;  %1257 = vmatpush1.bf16.msra.mxu1 %v7470_v35 }
 0x16e   :  { %1217 = vmatprep.subr.bf16.mxu0 %v7392_v14  ;;  %1258 = vmatprep.subr.bf16.mxu1 %v7473_v36 }
 0x171   :  { %1218 = vmatpush1.bf16.msra.mxu0 %v7397_v15  ;;  %1259 = vmatpush1.bf16.msra.mxu1 %v7478_v37 }
 0x172   :  { %1219 = vmatprep.subr.bf16.mxu0 %v7401_v16  ;;  %1260 = vmatprep.subr.bf16.mxu1 %v7482_v38 }
 0x175   :  { %1220 = vmatpush1.bf16.msra.mxu0 %v7406_v18  ;;  %1261 = vmatpush1.bf16.msra.mxu1 %v7488_v39 }
 0x176   :  { %1221 = vmatprep.subr.bf16.mxu0 %v7413_v20  ;;  %1262 = vmatprep.subr.bf16.mxu1 %v7491_v40 }
 0x179   :  { %1222 = vmatpush1.bf16.msra.mxu0 %v7419_v22  ;;  %1263 = vmatpush1.bf16.msra.mxu1 %v7496_v41 }
 0x17a   :  { %1223 = vmatprep.subr.bf16.mxu0 %v7423_v23  ;;  %1264 = vmatprep.subr.bf16.mxu1 %v7500_v42 }
 0x17d   :  { %1224 = vmatpush1.bf16.msra.mxu0 %v7433_v26  ;;  %1265 = vmatpush1.bf16.msra.mxu1 %v7506_v43 }
 0x17e   :  { %1225 = vmatprep.subr.bf16.mxu0 %v7436_v27  ;;  %1266 = vmatprep.subr.bf16.mxu1 %v7509_v44 }
 0x181   :  { %1226 = vmatpush1.bf16.msra.mxu0 %v7440_v28  ;;  %1267 = vmatpush1.bf16.msra.mxu1 %v7514_v45 }
 0x182   :  { %1568 = vmatprep.subr.bf16.mxu1 %v7426_v24 }
 0x224   :  { %v929_v4 = vpop.f32.mrf.mxu0  ;;  %v970_v6 = vpop.f32.mrf.mxu1 }
 0x225   :  { %v977_v8 = vadd.f32 %v929_v4, %v7552_v56  ;;  %v979_v24 = vadd.f32 %v970_v6, %v7586_v63 }
 0x226   :  { %v931_v12 = vpop.f32.mrf.mxu0  ;;  %v972_v13 = vpop.f32.mrf.mxu1 }
 0x227   :  { %v6072_v14 = vmul.f32 -1.442695, %v977_v8  ;;  %v978_v15 = vadd.f32 %v931_v12, %v7554_v58  ;;  %v980_v26 = vadd.f32 %v972_v13, %v7588_v51 }
 0x228   :  { %v933_v16 = vpop.f32.mrf.mxu0  ;;  %v974_v18 = vpop.f32.mrf.mxu1 }
 0x229   :  { %6953 = vpow2.f32 %v6072_v14  ;;  %v6073_v20 = vmul.f32 -1.442695, %v978_v15  ;;  %v6074_v27 = vmul.f32 -1.442695, %v980_v26 }
 0x22a   :  { %v934_v22 = vpop.f32.mrf.mxu0  ;;  %v975_v23 = vpop.f32.mrf.mxu1 }
 0x22b   :  { %6955 = vpow2.f32 %v6073_v20 }
 0x22c   :  { %6957 = vtanh.f32 %v979_v24 }
 0x22d   :  { %6959 = vpow2.f32 %v6074_v27 }
 0x236   :  { %v6954_v28 = vpop.eup %6953 }
 0x237   :  { %v984_v53 = vadd.f32 1.0, %v6954_v28 }
 0x238   :  { %v6956_v56 = vpop.eup %6955 }
 0x239   :  { %6961 = vrcp.f32 %v984_v53  ;;  %v990_v2 = vadd.f32 1.0, %v6956_v56  ;;  %v6958_v58 = vpop.eup %6957 }
 0x23a   :  { %v6960_v9 = vpop.eup %6959 }
 0x23b   :  { %6963 = vrcp.f32 %v990_v2  ;;  %v997_v25 = vadd.f32 1.0, %v6960_v9  ;;  %v7743_v9 = vld [vmem:[#allocation7 + $0xec] ss:$16 sps:$4 sm:$0xff]  }
 0x23d   :  { %6965 = vrcp.f32 %v997_v25  ;;  %v7755_v25 = vld [vmem:[#allocation7 + $0xa4] ss:$16 sps:$4 sm:$0xff]  }
 0x246   :  { %v6962_v21 = vpop.eup %6961 }
 0x247   :  { %v1002_v49 = vmul.f32 %v6962_v21, %v6958_v58  ;;  %v7745_v21 = vld [vmem:[#allocation7 + $0xe8] ss:$16 sps:$4 sm:$0xff]  }
 0x248   :  { %v6964_v29 = vpop.eup %6963 }
 0x249   :  { %v1001_v5 = vmul.f32 %v6964_v29, %v7614_v0  ;;  %v7751_v29 = vld [vmem:[#allocation7 + $0xc8] ss:$16 sps:$4 sm:$0xff]  }
 0x24a   :  { %v6966_v63 = vpop.eup %6965 }
 0x24b   :  { %v7659_v51 = vadd.f32 %v1002_v49, %v1001_v5  ;;  %v7749_v49 = vld [vmem:[#allocation7 + $0xcc] ss:$16 sps:$4 sm:$0xff]  }
 0x24c   :  { %v7757_v5 = vld [vmem:[#allocation7 + $0xac] ss:$16 sps:$4 sm:$0xff]  }
 0x24d   :  { %6967 = vtanh.f32 %v7659_v51 }
 0x25a   :  { %v6968_v55 = vpop.eup %6967 }
 0x25b   :  { %v7662_v52 = vmul.f32 %v6968_v55, %v6966_v63  ;;  %v7761_v63 = vld [vmem:[#allocation7 + $0xa8] ss:$16 sps:$4 sm:$0xff]   ;;  %v7768_v55 = vld [vmem:[#allocation7 + $0x8c] ss:$16 sps:$4 sm:$0xff]  }
 0x25d   :  { %v1018_v50 = vpack.c.bf16 %v7662_v52, %v7662_v52 }
 0x25f   :  { %1244 = vmatmul.mubr.bf16.vlgmr.msra.gmra.mxu0 %v1018_v50  ;;  %1285 = vmatmul.mubr.bf16.vlgmr.msra.gmra.mxu1 %v1018_v50  ;;  %v7770_v50 = vld [vmem:[#allocation7 + $0x88] ss:$16 sps:$4 sm:$0xff]  }
 0x260   :  { %1569 = vmatpush1.bf16.msra.mxu1 %v7455_v31  ;;  %1559 = vmatprep.mubr.bf16.mxu0 %v8627_v47  ;;  %v7683_v31 = vld [vmem:[#allocation7 + $0xe4] ss:$16 sps:$4 sm:$0xff]  }
 0x261   :  { %1570 = vmatprep.subr.bf16.mxu1 %v7457_v32  ;;  %1600 = vmatprep.mubr.bf16.mxu1 %v8627_v47  ;;  %v7685_v32 = vld [vmem:[#allocation7 + $0xe0] ss:$16 sps:$4 sm:$0xff]  }
 0x262   :  { %1527 = vmatprep.subr.bf16.mxu0 %v7683_v31 }
 0x263   :  { %1528 = vmatpush1.bf16.msra.mxu0 %v7685_v32 }
 0x264   :  { %1571 = vmatpush1.bf16.msra.mxu1 %v7461_v33  ;;  %v7689_v33 = vld [vmem:[#allocation7 + $0xc4] ss:$16 sps:$4 sm:$0xff]  }
 0x265   :  { %1572 = vmatprep.subr.bf16.mxu1 %v7464_v34  ;;  %v7691_v34 = vld [vmem:[#allocation7 + $0xc0] ss:$16 sps:$4 sm:$0xff]   ;;  %1529 = vmatprep.subr.bf16.mxu0 %v7689_v33 }
 0x267   :  { %1530 = vmatpush1.bf16.msra.mxu0 %v7691_v34 }
 0x268   :  { %1573 = vmatpush1.bf16.msra.mxu1 %v7470_v35  ;;  %v7193_v35 = vld [vmem:[#allocation7 + $0xa4] ss:$16 sps:$4 sm:$0xff]  }
 0x269   :  { %1574 = vmatprep.subr.bf16.mxu1 %v7473_v36  ;;  %1531 = vmatprep.subr.bf16.mxu0 %v7193_v35  ;;  %v7194_v36 = vld [vmem:[#allocation7 + $0xa0] ss:$16 sps:$4 sm:$0xff]   ;;  %v7772_v35 = vld [vmem:[#allocation7 + $0x6c] ss:$16 sps:$4 sm:$0xff]  }
 0x26b   :  { %1532 = vmatpush1.bf16.msra.mxu0 %v7194_v36  ;;  %v7777_v36 = vld [vmem:[#allocation7 + $0x68] ss:$16 sps:$4 sm:$0xff]  }
 0x26c   :  { %1575 = vmatpush1.bf16.msra.mxu1 %v7478_v37  ;;  %v7695_v37 = vld [vmem:[#allocation7 + $0x84] ss:$16 sps:$4 sm:$0xff]  }
 0x26d   :  { %1576 = vmatprep.subr.bf16.mxu1 %v7482_v38  ;;  %v7697_v38 = vld [vmem:[#allocation7 + $0x80] ss:$16 sps:$4 sm:$0xff]   ;;  %1533 = vmatprep.subr.bf16.mxu0 %v7695_v37 }
 0x26f   :  { %1534 = vmatpush1.bf16.msra.mxu0 %v7697_v38 }
 0x270   :  { %1577 = vmatpush1.bf16.msra.mxu1 %v7488_v39  ;;  %v7699_v39 = vld [vmem:[#allocation7 + $0x64] ss:$16 sps:$4 sm:$0xff]  }
 0x271   :  { %1578 = vmatprep.subr.bf16.mxu1 %v7491_v40  ;;  %v7703_v40 = vld [vmem:[#allocation7 + $0x60] ss:$16 sps:$4 sm:$0xff]   ;;  %1535 = vmatprep.subr.bf16.mxu0 %v7699_v39 }
 0x273   :  { %1536 = vmatpush1.bf16.msra.mxu0 %v7703_v40 }
 0x274   :  { %1579 = vmatpush1.bf16.msra.mxu1 %v7496_v41  ;;  %v7706_v41 = vld [vmem:[#allocation7 + $0x44] ss:$16 sps:$4 sm:$0xff]  }
 0x275   :  { %1580 = vmatprep.subr.bf16.mxu1 %v7500_v42  ;;  %v7709_v42 = vld [vmem:[#allocation7 + $0x40] ss:$16 sps:$4 sm:$0xff]   ;;  %1537 = vmatprep.subr.bf16.mxu0 %v7706_v41 }
 0x277   :  { %1538 = vmatpush1.bf16.msra.mxu0 %v7709_v42 }
 0x278   :  { %1581 = vmatpush1.bf16.msra.mxu1 %v7506_v43  ;;  %v7712_v43 = vld [vmem:[#allocation7 + $0x24] ss:$16 sps:$4 sm:$0xff]  }
 0x279   :  { %1582 = vmatprep.subr.bf16.mxu1 %v7509_v44  ;;  %v7715_v44 = vld [vmem:[#allocation7 + $0x20] ss:$16 sps:$4 sm:$0xff]   ;;  %1539 = vmatprep.subr.bf16.mxu0 %v7712_v43 }
 0x27b   :  { %1540 = vmatpush1.bf16.msra.mxu0 %v7715_v44 }
 0x27c   :  { %1583 = vmatpush1.bf16.msra.mxu1 %v7514_v45  ;;  %v7718_v45 = vld [vmem:[#allocation7 + $0x4] ss:$16 sps:$4 sm:$0xff]  }
 0x27d   :  { %1541 = vmatprep.subr.bf16.mxu0 %v7718_v45  ;;  %1884 = vmatprep.subr.bf16.mxu1 %v7743_v9 }
 0x27f   :  { %1542 = vmatpush1.bf16.msra.mxu0 %v7721_v48 }
 0x280   :  { %1843 = vmatprep.subr.bf16.mxu0 %v7683_v31 }
 0x31f   :  { %v1245_v11 = vpop.f32.mrf.mxu0  ;;  %v1286_v0 = vpop.f32.mrf.mxu1 }
 0x320   :  { %v1293_v19 = vadd.f32 %v1245_v11, %v7556_v60  ;;  %v1295_v15 = vadd.f32 %v1286_v0, %v7590_v17  ;;  %v7781_v11 = vld [vmem:[#allocation7 + $0x4c] ss:$16 sps:$4 sm:$0xff]   ;;  %v7785_v0 = vld [vmem:[#allocation7 + $0x48] ss:$16 sps:$4 sm:$0xff]  }
 0x321   :  { %v1247_v59 = vpop.f32.mrf.mxu0  ;;  %v1288_v30 = vpop.f32.mrf.mxu1 }
 0x322   :  { %v6107_v61 = vmul.f32 -1.442695, %v1293_v19  ;;  %v1294_v7 = vadd.f32 %v1247_v59, %v7558_v62  ;;  %v1296_v14 = vadd.f32 %v1288_v30, %v7592_v10  ;;  %v7789_v19 = vld [vmem:[#allocation7 + $0x2c] ss:$16 sps:$4 sm:$0xff]   ;;  %v7793_v59 = vld [vmem:[#allocation7 + $0x28] ss:$16 sps:$4 sm:$0xff]  }
 0x323   :  { %v1249_v4 = vpop.f32.mrf.mxu0  ;;  %v1290_v6 = vpop.f32.mrf.mxu1  ;;  %v7797_v30 = vld [vmem:[#allocation7 + $0xc] ss:$16 sps:$4 sm:$0xff]  }
 0x324   :  { %6969 = vpow2.f32 %v6107_v61  ;;  %v6108_v8 = vmul.f32 -1.442695, %v1294_v7  ;;  %v6109_v16 = vmul.f32 -1.442695, %v1296_v14  ;;  %v7801_v61 = vld [vmem:[#allocation7 + $0x8] ss:$16 sps:$4 sm:$0xff]  }
 0x325   :  { %v1250_v12 = vpop.f32.mrf.mxu0  ;;  %v1291_v13 = vpop.f32.mrf.mxu1 }
 0x326   :  { %6971 = vpow2.f32 %v6108_v8 }
 0x327   :  { %6973 = vtanh.f32 %v1295_v15 }
 0x328   :  { %6975 = vpow2.f32 %v6109_v16 }
 0x331   :  { %v6970_v18 = vpop.eup %6969 }
 0x332   :  { %v1300_v20 = vadd.f32 1.0, %v6970_v18 }
 0x333   :  { %v6972_v60 = vpop.eup %6971 }
 0x334   :  { %6977 = vrcp.f32 %v1300_v20  ;;  %v1306_v22 = vadd.f32 1.0, %v6972_v60  ;;  %v6974_v62 = vpop.eup %6973 }
 0x335   :  { %v6976_v23 = vpop.eup %6975 }
 0x336   :  { %6979 = vrcp.f32 %v1306_v22  ;;  %v1313_v28 = vadd.f32 1.0, %v6976_v23 }
 0x338   :  { %6981 = vrcp.f32 %v1313_v28 }
 0x341   :  { %v6978_v26 = vpop.eup %6977 }
 0x342   :  { %v1318_v24 = vmul.f32 %v6978_v26, %v6974_v62  ;;  %v8628_v62 = vld [vmem:[#allocation26_spill] sm:$0xff] }
 0x343   :  { %v6980_v27 = vpop.eup %6979 }
 0x344   :  { %v1317_v53 = vmul.f32 %v6980_v27, %v7659_v51  ;;  %v7759_v51 = vld [vmem:[#allocation7 + $0xa0] ss:$16 sps:$4 sm:$0xff]  }
 0x345   :  { %v6982_v17 = vpop.eup %6981 }
 0x346   :  { %v7731_v10 = vadd.f32 %v1318_v24, %v1317_v53 }
 0x348   :  { %6983 = vtanh.f32 %v7731_v10 }
 0x355   :  { %v6984_v56 = vpop.eup %6983 }
 0x356   :  { %v7734_v2 = vmul.f32 %v6984_v56, %v6982_v17 }
 0x358   :  { %v1334_v58 = vpack.c.bf16 %v7734_v2, %v7734_v2 }
 0x35a   :  { %1560 = vmatmul.mubr.bf16.vlgmr.msra.gmra.mxu0 %v1334_v58  ;;  %1601 = vmatmul.mubr.bf16.vlgmr.msra.gmra.mxu1 %v1334_v58 }
 0x35b   :  { %1844 = vmatpush1.bf16.msra.mxu0 %v7685_v32  ;;  %1875 = vmatprep.mubr.bf16.mxu0 %v8627_v47 }
 0x35c   :  { %1845 = vmatprep.subr.bf16.mxu0 %v7689_v33  ;;  %1916 = vmatprep.mubr.bf16.mxu1 %v8627_v47 }
 0x35d   :  { %1885 = vmatpush1.bf16.msra.mxu1 %v7745_v21 }
 0x35e   :  { %1886 = vmatprep.subr.bf16.mxu1 %v7749_v49 }
 0x35f   :  { %1846 = vmatpush1.bf16.msra.mxu0 %v7691_v34 }
 0x360   :  { %1847 = vmatprep.subr.bf16.mxu0 %v7755_v25 }
 0x361   :  { %1887 = vmatpush1.bf16.msra.mxu1 %v7751_v29 }
 0x362   :  { %1888 = vmatprep.subr.bf16.mxu1 %v7757_v5 }
 0x363   :  { %1848 = vmatpush1.bf16.msra.mxu0 %v7759_v51 }
 0x364   :  { %1849 = vmatprep.subr.bf16.mxu0 %v7695_v37 }
 0x365   :  { %1889 = vmatpush1.bf16.msra.mxu1 %v7761_v63 }
 0x366   :  { %1890 = vmatprep.subr.bf16.mxu1 %v7768_v55 }
 0x367   :  { %1850 = vmatpush1.bf16.msra.mxu0 %v7697_v38 }
 0x368   :  { %1851 = vmatprep.subr.bf16.mxu0 %v7699_v39 }
 0x369   :  { %1891 = vmatpush1.bf16.msra.mxu1 %v7770_v50 }
 0x36a   :  { %1892 = vmatprep.subr.bf16.mxu1 %v7772_v35 }
 0x36b   :  { %1852 = vmatpush1.bf16.msra.mxu0 %v7703_v40 }
 0x36c   :  { %1853 = vmatprep.subr.bf16.mxu0 %v7706_v41 }
 0x36d   :  { %1893 = vmatpush1.bf16.msra.mxu1 %v7777_v36 }
 0x36e   :  { %1894 = vmatprep.subr.bf16.mxu1 %v7781_v11 }
 0x36f   :  { %1854 = vmatpush1.bf16.msra.mxu0 %v7709_v42 }
 0x370   :  { %1855 = vmatprep.subr.bf16.mxu0 %v7712_v43 }
 0x371   :  { %1895 = vmatpush1.bf16.msra.mxu1 %v7785_v0 }
 0x372   :  { %1896 = vmatprep.subr.bf16.mxu1 %v7789_v19 }
 0x373   :  { %1856 = vmatpush1.bf16.msra.mxu0 %v7715_v44 }
 0x374   :  { %1857 = vmatprep.subr.bf16.mxu0 %v7718_v45 }
 0x375   :  { %1897 = vmatpush1.bf16.msra.mxu1 %v7793_v59 }
 0x376   :  { %1898 = vmatprep.subr.bf16.mxu1 %v7797_v30 }
 0x377   :  { %1858 = vmatpush1.bf16.msra.mxu0 %v7721_v48 }
 0x378   :  { %2159 = vmatprep.subr.bf16.mxu0 %v7683_v31 }
 0x379   :  { %1899 = vmatpush1.bf16.msra.mxu1 %v7801_v61 }
 0x37a   :  { %2200 = vmatprep.subr.bf16.mxu1 %v7743_v9 }
 0x41a   :  { %v1561_v7 = vpop.f32.mrf.mxu0  ;;  %v1602_v4 = vpop.f32.mrf.mxu1 }
 0x41b   :  { %v1609_v6 = vadd.f32 %v1561_v7, %v7560_v1  ;;  %v1611_v23 = vadd.f32 %v1602_v4, %v8628_v62 }
 0x41c   :  { %v1563_v8 = vpop.f32.mrf.mxu0  ;;  %v1604_v12 = vpop.f32.mrf.mxu1 }
 0x41d   :  { %v6142_v13 = vmul.f32 -1.442695, %v1609_v6  ;;  %v1610_v14 = vadd.f32 %v1563_v8, %v7562_v3  ;;  %v1612_v22 = vadd.f32 %v1604_v12, %v7596_v57 }
 0x41e   :  { %v1565_v15 = vpop.f32.mrf.mxu0  ;;  %v1606_v16 = vpop.f32.mrf.mxu1 }
 0x41f   :  { %6985 = vpow2.f32 %v6142_v13  ;;  %v6143_v18 = vmul.f32 -1.442695, %v1610_v14  ;;  %v6144_v26 = vmul.f32 -1.442695, %v1612_v22  ;;  %v8629_v15 = vld [vmem:[#allocation18_spill] sm:$0xff]  ;;  %v8630_v22 = vld [vmem:[#allocation19_spill] sm:$0xff] }
 0x420   :  { %v1566_v20 = vpop.f32.mrf.mxu0  ;;  %v1607_v60 = vpop.f32.mrf.mxu1 }
 0x421   :  { %6987 = vpow2.f32 %v6143_v18 }
 0x422   :  { %6989 = vtanh.f32 %v1611_v23 }
 0x423   :  { %6991 = vpow2.f32 %v6144_v26 }
 0x42c   :  { %v6986_v24 = vpop.eup %6985 }
 0x42d   :  { %v1616_v27 = vadd.f32 1.0, %v6986_v24 }
 0x42e   :  { %v6988_v1 = vpop.eup %6987 }
 0x42f   :  { %6993 = vrcp.f32 %v1616_v27  ;;  %v1622_v28 = vadd.f32 1.0, %v6988_v1  ;;  %v6990_v3 = vpop.eup %6989 }
 0x430   :  { %v6992_v53 = vpop.eup %6991 }
 0x431   :  { %6995 = vrcp.f32 %v1622_v28  ;;  %v1629_v7 = vadd.f32 1.0, %v6992_v53  ;;  %v8631_v28 = vld [vmem:[#allocation28_spill] sm:$0xff] }
 0x433   :  { %6997 = vrcp.f32 %v1629_v7 }
 0x43c   :  { %v6994_v17 = vpop.eup %6993 }
 0x43d   :  { %v1634_v56 = vmul.f32 %v6994_v17, %v6990_v3  ;;  %v8632_v3 = vld [vmem:[#allocation27_spill] sm:$0xff] }
 0x43e   :  { %v6996_v58 = vpop.eup %6995 }
 0x43f   :  { %v1633_v6 = vmul.f32 %v6996_v58, %v7731_v10 }
 0x440   :  { %v6998_v4 = vpop.eup %6997 }
 0x441   :  { %v7814_v57 = vadd.f32 %v1634_v56, %v1633_v6 }
 0x443   :  { %6999 = vtanh.f32 %v7814_v57 }
 0x450   :  { %v7000_v8 = vpop.eup %6999 }
 0x451   :  { %v7817_v12 = vmul.f32 %v7000_v8, %v6998_v4 }
 0x453   :  { %v1650_v13 = vpack.c.bf16 %v7817_v12, %v7817_v12 }
 0x455   :  { %1876 = vmatmul.mubr.bf16.vlgmr.msra.gmra.mxu0 %v1650_v13  ;;  %1917 = vmatmul.mubr.bf16.vlgmr.msra.gmra.mxu1 %v1650_v13 }
 0x456   :  { %2160 = vmatpush1.bf16.msra.mxu0 %v7685_v32  ;;  %2201 = vmatpush1.bf16.msra.mxu1 %v7745_v21 }
 0x457   :  { %2161 = vmatprep.subr.bf16.mxu0 %v7689_v33  ;;  %2202 = vmatprep.subr.bf16.mxu1 %v7749_v49 }
 0x458   :  { %2191 = vmatprep.mubr.bf16.mxu0 %v8627_v47  ;;  %2232 = vmatprep.mubr.bf16.mxu1 %v8627_v47 }
 0x45a   :  { %2162 = vmatpush1.bf16.msra.mxu0 %v7691_v34  ;;  %2203 = vmatpush1.bf16.msra.mxu1 %v7751_v29 }
 0x45b   :  { %2163 = vmatprep.subr.bf16.mxu0 %v7755_v25  ;;  %2204 = vmatprep.subr.bf16.mxu1 %v7757_v5 }
 0x45e   :  { %2164 = vmatpush1.bf16.msra.mxu0 %v7759_v51  ;;  %2205 = vmatpush1.bf16.msra.mxu1 %v7761_v63 }
 0x45f   :  { %2165 = vmatprep.subr.bf16.mxu0 %v7695_v37  ;;  %2206 = vmatprep.subr.bf16.mxu1 %v7768_v55 }
 0x462   :  { %2166 = vmatpush1.bf16.msra.mxu0 %v7697_v38  ;;  %2207 = vmatpush1.bf16.msra.mxu1 %v7770_v50 }
 0x463   :  { %2167 = vmatprep.subr.bf16.mxu0 %v7699_v39  ;;  %2208 = vmatprep.subr.bf16.mxu1 %v7772_v35 }
 0x466   :  { %2168 = vmatpush1.bf16.msra.mxu0 %v7703_v40  ;;  %2209 = vmatpush1.bf16.msra.mxu1 %v7777_v36 }
 0x467   :  { %2169 = vmatprep.subr.bf16.mxu0 %v7706_v41  ;;  %2210 = vmatprep.subr.bf16.mxu1 %v7781_v11 }
 0x46a   :  { %2170 = vmatpush1.bf16.msra.mxu0 %v7709_v42  ;;  %2211 = vmatpush1.bf16.msra.mxu1 %v7785_v0 }
 0x46b   :  { %2171 = vmatprep.subr.bf16.mxu0 %v7712_v43  ;;  %2212 = vmatprep.subr.bf16.mxu1 %v7789_v19 }
 0x46e   :  { %2172 = vmatpush1.bf16.msra.mxu0 %v7715_v44  ;;  %2213 = vmatpush1.bf16.msra.mxu1 %v7793_v59 }
 0x46f   :  { %2173 = vmatprep.subr.bf16.mxu0 %v7718_v45  ;;  %2214 = vmatprep.subr.bf16.mxu1 %v7797_v30 }
 0x472   :  { %2174 = vmatpush1.bf16.msra.mxu0 %v7721_v48  ;;  %2215 = vmatpush1.bf16.msra.mxu1 %v7801_v61 }
 0x473   :  { %2475 = vmatprep.subr.bf16.mxu0 %v7683_v31  ;;  %2516 = vmatprep.subr.bf16.mxu1 %v7743_v9 }
 0x515   :  { %v1877_v10 = vpop.f32.mrf.mxu0  ;;  %v1918_v14 = vpop.f32.mrf.mxu1 }
 0x516   :  { %v1925_v16 = vadd.f32 %v1877_v10, %v8629_v15  ;;  %v1927_v53 = vadd.f32 %v1918_v14, %v8632_v3 }
 0x517   :  { %v1879_v18 = vpop.f32.mrf.mxu0  ;;  %v1920_v20 = vpop.f32.mrf.mxu1 }
 0x518   :  { %v6177_v60 = vmul.f32 -1.442695, %v1925_v16  ;;  %v1926_v62 = vadd.f32 %v1879_v18, %v8630_v22  ;;  %v1928_v31 = vadd.f32 %v1920_v20, %v8631_v28 }
 0x519   :  { %v1881_v23 = vpop.f32.mrf.mxu0  ;;  %v1922_v26 = vpop.f32.mrf.mxu1 }
 0x51a   :  { %7001 = vpow2.f32 %v6177_v60  ;;  %v6178_v24 = vmul.f32 -1.442695, %v1926_v62  ;;  %v6179_v17 = vmul.f32 -1.442695, %v1928_v31 }
 0x51b   :  { %v1882_v27 = vpop.f32.mrf.mxu0  ;;  %v1923_v1 = vpop.f32.mrf.mxu1 }
 0x51c   :  { %7003 = vpow2.f32 %v6178_v24  ;;  %v8636_v24 = vld [vmem:[#allocation29_spill] sm:$0xff] }
 0x51d   :  { %7005 = vtanh.f32 %v1927_v53 }
 0x51e   :  { %7007 = vpow2.f32 %v6179_v17 }
 0x527   :  { %v7002_v56 = vpop.eup %7001 }
 0x528   :  { %v1932_v58 = vadd.f32 1.0, %v7002_v56 }
 0x529   :  { %v7004_v7 = vpop.eup %7003 }
 0x52a   :  { %7009 = vrcp.f32 %v1932_v58  ;;  %v1938_v6 = vadd.f32 1.0, %v7004_v7  ;;  %v7006_v4 = vpop.eup %7005 }
 0x52b   :  { %v7008_v8 = vpop.eup %7007 }
 0x52c   :  { %7011 = vrcp.f32 %v1938_v6  ;;  %v1945_v16 = vadd.f32 1.0, %v7008_v8 }
 0x52e   :  { %7013 = vrcp.f32 %v1945_v16 }
 0x537   :  { %v7010_v13 = vpop.eup %7009 }
 0x538   :  { %v1950_v10 = vmul.f32 %v7010_v13, %v7006_v4 }
 0x539   :  { %v7012_v15 = vpop.eup %7011 }
 0x53a   :  { %v1949_v18 = vmul.f32 %v7012_v15, %v7814_v57 }
 0x53b   :  { %v7014_v14 = vpop.eup %7013 }
 0x53c   :  { %v7860_v20 = vadd.f32 %v1950_v10, %v1949_v18 }
 0x53e   :  { %7015 = vtanh.f32 %v7860_v20 }
 0x54b   :  { %v7016_v60 = vpop.eup %7015 }
 0x54c   :  { %v7863_v22 = vmul.f32 %v7016_v60, %v7014_v14 }
 0x54e   :  { %v1966_v62 = vpack.c.bf16 %v7863_v22, %v7863_v22 }
 0x550   :  { %2192 = vmatmul.mubr.bf16.vlgmr.msra.gmra.mxu0 %v1966_v62  ;;  %2233 = vmatmul.mubr.bf16.vlgmr.msra.gmra.mxu1 %v1966_v62 }
 0x551   :  { %2476 = vmatpush1.bf16.msra.mxu0 %v7685_v32  ;;  %2517 = vmatpush1.bf16.msra.mxu1 %v7745_v21 }
 0x552   :  { %2477 = vmatprep.subr.bf16.mxu0 %v7689_v33  ;;  %2518 = vmatprep.subr.bf16.mxu1 %v7749_v49 }
 0x553   :  { %2507 = vmatprep.mubr.bf16.mxu0 %v8627_v47  ;;  %2548 = vmatprep.mubr.bf16.mxu1 %v8627_v47 }
 0x555   :  { %2478 = vmatpush1.bf16.msra.mxu0 %v7691_v34  ;;  %2519 = vmatpush1.bf16.msra.mxu1 %v7751_v29  ;;  %v8633_v34 = vld [vmem:[#allocation20_spill] sm:$0xff] }
 0x556   :  { %2479 = vmatprep.subr.bf16.mxu0 %v7755_v25  ;;  %2520 = vmatprep.subr.bf16.mxu1 %v7757_v5 }
 0x559   :  { %2480 = vmatpush1.bf16.msra.mxu0 %v7759_v51  ;;  %2521 = vmatpush1.bf16.msra.mxu1 %v7761_v63 }
 0x55a   :  { %2481 = vmatprep.subr.bf16.mxu0 %v7695_v37  ;;  %2522 = vmatprep.subr.bf16.mxu1 %v7768_v55 }
 0x55d   :  { %2482 = vmatpush1.bf16.msra.mxu0 %v7697_v38  ;;  %2523 = vmatpush1.bf16.msra.mxu1 %v7770_v50 }
 0x55e   :  { %2483 = vmatprep.subr.bf16.mxu0 %v7699_v39  ;;  %2524 = vmatprep.subr.bf16.mxu1 %v7772_v35 }
 0x561   :  { %2484 = vmatpush1.bf16.msra.mxu0 %v7703_v40  ;;  %2525 = vmatpush1.bf16.msra.mxu1 %v7777_v36 }
 0x562   :  { %2485 = vmatprep.subr.bf16.mxu0 %v7706_v41  ;;  %2526 = vmatprep.subr.bf16.mxu1 %v7781_v11  ;;  %v8634_v41 = vld [vmem:[#allocation21_spill] sm:$0xff] }
 0x565   :  { %2486 = vmatpush1.bf16.msra.mxu0 %v7709_v42  ;;  %2527 = vmatpush1.bf16.msra.mxu1 %v7785_v0 }
 0x566   :  { %2487 = vmatprep.subr.bf16.mxu0 %v7712_v43  ;;  %2528 = vmatprep.subr.bf16.mxu1 %v7789_v19 }
 0x569   :  { %2488 = vmatpush1.bf16.msra.mxu0 %v7715_v44  ;;  %2529 = vmatpush1.bf16.msra.mxu1 %v7793_v59 }
 0x56a   :  { %2489 = vmatprep.subr.bf16.mxu0 %v7718_v45  ;;  %2530 = vmatprep.subr.bf16.mxu1 %v7797_v30 }
 0x56d   :  { %2490 = vmatpush1.bf16.msra.mxu0 %v7721_v48  ;;  %2531 = vmatpush1.bf16.msra.mxu1 %v7801_v61  ;;  %v8635_v48 = vld [vmem:[#allocation30_spill] sm:$0xff] }
 0x56e   :  { %2832 = vmatprep.subr.bf16.mxu1 %v7743_v9 }
 0x610   :  { %v2193_v32 = vpop.f32.mrf.mxu0  ;;  %v2234_v33 = vpop.f32.mrf.mxu1 }
 0x611   :  { %v2241_v37 = vadd.f32 %v2193_v32, %v8633_v34  ;;  %v2243_v9 = vadd.f32 %v2234_v33, %v8636_v24  ;;  %v8638_v33 = vld [vmem:[#allocation23_spill] sm:$0xff] }
 0x612   :  { %v2195_v38 = vpop.f32.mrf.mxu0  ;;  %v2236_v39 = vpop.f32.mrf.mxu1 }
 0x613   :  { %v6212_v40 = vmul.f32 -1.442695, %v2241_v37  ;;  %v2242_v42 = vadd.f32 %v2195_v38, %v8634_v41  ;;  %v2244_v26 = vadd.f32 %v2236_v39, %v8635_v48 }
 0x614   :  { %v2197_v43 = vpop.f32.mrf.mxu0  ;;  %v2238_v44 = vpop.f32.mrf.mxu1 }
 0x615   :  { %7017 = vpow2.f32 %v6212_v40  ;;  %v6213_v45 = vmul.f32 -1.442695, %v2242_v42  ;;  %v6214_v27 = vmul.f32 -1.442695, %v2244_v26  ;;  %v8639_v42 = vld [vmem:[#allocation32_spill] sm:$0xff]  ;;  %v8640_v44 = vld [vmem:[#allocation31_spill] sm:$0xff] }
 0x616   :  { %v2198_v57 = vpop.f32.mrf.mxu0  ;;  %v2239_v23 = vpop.f32.mrf.mxu1 }
 0x617   :  { %7019 = vpow2.f32 %v6213_v45 }
 0x618   :  { %7021 = vtanh.f32 %v2243_v9 }
 0x619   :  { %7023 = vpow2.f32 %v6214_v27 }
 0x622   :  { %v7018_v1 = vpop.eup %7017 }
 0x623   :  { %v2248_v28 = vadd.f32 1.0, %v7018_v1 }
 0x624   :  { %v7020_v31 = vpop.eup %7019 }
 0x625   :  { %7025 = vrcp.f32 %v2248_v28  ;;  %v2254_v3 = vadd.f32 1.0, %v7020_v31  ;;  %v7022_v53 = vpop.eup %7021 }
 0x626   :  { %v7024_v17 = vpop.eup %7023 }
 0x627   :  { %7027 = vrcp.f32 %v2254_v3  ;;  %v2261_v6 = vadd.f32 1.0, %v7024_v17 }
 0x629   :  { %7029 = vrcp.f32 %v2261_v6  ;;  %v6785_v6 = vld [vmem:[#allocation9 + $0xe0] ss:$16 sps:$4 sm:$0xff]  }
 0x632   :  { %v7026_v56 = vpop.eup %7025 }
 0x633   :  { %v2266_v58 = vmul.f32 %v7026_v56, %v7022_v53 }
 0x634   :  { %v7028_v7 = vpop.eup %7027 }
 0x635   :  { %v2265_v4 = vmul.f32 %v7028_v7, %v7860_v20  ;;  %v8637_v20 = vld [vmem:[#allocation22_spill] sm:$0xff] }
 0x636   :  { %v7030_v13 = vpop.eup %7029 }
 0x637   :  { %v7905_v8 = vadd.f32 %v2266_v58, %v2265_v4  ;;  %v6788_v4 = vld [vmem:[#allocation9 + $0xe8] ss:$16 sps:$4 sm:$0xff]  }
 0x639   :  { %7031 = vtanh.f32 %v7905_v8 }
 0x646   :  { %v7032_v10 = vpop.eup %7031 }
 0x647   :  { %v7908_v15 = vmul.f32 %v7032_v10, %v7030_v13  ;;  %v6793_v10 = vld [vmem:[#allocation9 + $0xc4] ss:$16 sps:$4 sm:$0xff]  }
 0x649   :  { %v2282_v16 = vpack.c.bf16 %v7908_v15, %v7908_v15 }
 0x64b   :  { %2508 = vmatmul.mubr.bf16.vlgmr.msra.gmra.mxu0 %v2282_v16  ;;  %2549 = vmatmul.mubr.bf16.vlgmr.msra.gmra.mxu1 %v2282_v16  ;;  %v6796_v16 = vld [vmem:[#allocation9 + $0xcc] ss:$16 sps:$4 sm:$0xff]  }
 0x64c   :  { %2833 = vmatpush1.bf16.msra.mxu1 %v7745_v21  ;;  %2823 = vmatprep.mubr.bf16.mxu0 %v8627_v47  ;;  %v6766_v21 = vld [vmem:[#allocation7 + $0xe4] ss:$16 sps:$4 sm:$0xff]  }
 0x64d   :  { %2834 = vmatprep.subr.bf16.mxu1 %v7749_v49  ;;  %2864 = vmatprep.mubr.bf16.mxu1 %v8627_v47  ;;  %v6764_v49 = vld [vmem:[#allocation7 + $0xe0] ss:$16 sps:$4 sm:$0xff]  }
 0x64e   :  { %2791 = vmatprep.subr.bf16.mxu0 %v6766_v21  ;;  %v6794_v21 = vld [vmem:[#allocation9 + $0xc8] ss:$16 sps:$4 sm:$0xff]  }
 0x64f   :  { %2792 = vmatpush1.bf16.msra.mxu0 %v6764_v49  ;;  %v6799_v49 = vld [vmem:[#allocation9 + $0xa4] ss:$16 sps:$4 sm:$0xff]  }
 0x650   :  { %2835 = vmatpush1.bf16.msra.mxu1 %v7751_v29  ;;  %v6769_v29 = vld [vmem:[#allocation7 + $0xc4] ss:$16 sps:$4 sm:$0xff]  }
 0x651   :  { %2836 = vmatprep.subr.bf16.mxu1 %v7757_v5  ;;  %v6767_v5 = vld [vmem:[#allocation7 + $0xc0] ss:$16 sps:$4 sm:$0xff]   ;;  %2793 = vmatprep.subr.bf16.mxu0 %v6769_v29  ;;  %v6802_v29 = vld [vmem:[#allocation9 + $0xac] ss:$16 sps:$4 sm:$0xff]  }
 0x653   :  { %2794 = vmatpush1.bf16.msra.mxu0 %v6767_v5  ;;  %v6797_v5 = vld [vmem:[#allocation9 + $0xa0] ss:$16 sps:$4 sm:$0xff]  }
 0x654   :  { %2837 = vmatpush1.bf16.msra.mxu1 %v7761_v63  ;;  %2795 = vmatprep.subr.bf16.mxu0 %v7755_v25  ;;  %v6772_v63 = vld [vmem:[#allocation7 + $0x84] ss:$16 sps:$4 sm:$0xff]  }
 0x655   :  { %2838 = vmatprep.subr.bf16.mxu1 %v7768_v55  ;;  %v6770_v55 = vld [vmem:[#allocation7 + $0x80] ss:$16 sps:$4 sm:$0xff]   ;;  %v6784_v25 = vld [vmem:[#allocation7 + $0x4] ss:$16 sps:$4 sm:$0xff]  }
 0x657   :  { %2796 = vmatpush1.bf16.msra.mxu0 %v7759_v51  ;;  %v6782_v51 = vld [vmem:[#allocation7] ss:$16 sps:$4 sm:$0xff]  }
 0x658   :  { %2839 = vmatpush1.bf16.msra.mxu1 %v7770_v50  ;;  %2797 = vmatprep.subr.bf16.mxu0 %v6772_v63  ;;  %v6775_v50 = vld [vmem:[#allocation7 + $0x64] ss:$16 sps:$4 sm:$0xff]   ;;  %v6800_v63 = vld [vmem:[#allocation9 + $0xa8] ss:$16 sps:$4 sm:$0xff]  }
 0x659   :  { %2840 = vmatprep.subr.bf16.mxu1 %v7772_v35  ;;  %v6773_v35 = vld [vmem:[#allocation7 + $0x60] ss:$16 sps:$4 sm:$0xff]  }
 0x65b   :  { %2798 = vmatpush1.bf16.msra.mxu0 %v6770_v55  ;;  %v6805_v55 = vld [vmem:[#allocation9 + $0x84] ss:$16 sps:$4 sm:$0xff]  }
 0x65c   :  { %2841 = vmatpush1.bf16.msra.mxu1 %v7777_v36  ;;  %2799 = vmatprep.subr.bf16.mxu0 %v6775_v50  ;;  %v6778_v36 = vld [vmem:[#allocation7 + $0x44] ss:$16 sps:$4 sm:$0xff]   ;;  %v6808_v50 = vld [vmem:[#allocation9 + $0x8c] ss:$16 sps:$4 sm:$0xff]  }
 0x65d   :  { %2842 = vmatprep.subr.bf16.mxu1 %v7781_v11  ;;  %v6790_v11 = vld [vmem:[#allocation9 + $0xec] ss:$16 sps:$4 sm:$0xff]  }
 0x65f   :  { %2800 = vmatpush1.bf16.msra.mxu0 %v6773_v35  ;;  %v6803_v35 = vld [vmem:[#allocation9 + $0x80] ss:$16 sps:$4 sm:$0xff]  }
 0x660   :  { %2843 = vmatpush1.bf16.msra.mxu1 %v7785_v0  ;;  %v6776_v0 = vld [vmem:[#allocation7 + $0x40] ss:$16 sps:$4 sm:$0xff]   ;;  %2801 = vmatprep.subr.bf16.mxu0 %v6778_v36  ;;  %v6806_v36 = vld [vmem:[#allocation9 + $0x88] ss:$16 sps:$4 sm:$0xff]  }
 0x661   :  { %2844 = vmatprep.subr.bf16.mxu1 %v7789_v19  ;;  %v6781_v19 = vld [vmem:[#allocation7 + $0x24] ss:$16 sps:$4 sm:$0xff]  }
 0x663   :  { %2802 = vmatpush1.bf16.msra.mxu0 %v6776_v0  ;;  %v6814_v0 = vld [vmem:[#allocation9 + $0x6c] ss:$16 sps:$4 sm:$0xff]  }
 0x664   :  { %2845 = vmatpush1.bf16.msra.mxu1 %v7793_v59  ;;  %v6779_v59 = vld [vmem:[#allocation7 + $0x20] ss:$16 sps:$4 sm:$0xff]   ;;  %2803 = vmatprep.subr.bf16.mxu0 %v6781_v19 }
 0x665   :  { %2846 = vmatprep.subr.bf16.mxu1 %v7797_v30  ;;  %v6787_v30 = vld [vmem:[#allocation9 + $0xe4] ss:$16 sps:$4 sm:$0xff]   ;;  %v6809_v19 = vld [vmem:[#allocation9 + $0x60] ss:$16 sps:$4 sm:$0xff]  }
 0x667   :  { %2804 = vmatpush1.bf16.msra.mxu0 %v6779_v59  ;;  %v6812_v59 = vld [vmem:[#allocation9 + $0x68] ss:$16 sps:$4 sm:$0xff]  }
 0x668   :  { %2847 = vmatpush1.bf16.msra.mxu1 %v7801_v61  ;;  %2805 = vmatprep.subr.bf16.mxu0 %v6784_v25  ;;  %v6817_v25 = vld [vmem:[#allocation9 + $0x44] ss:$16 sps:$4 sm:$0xff]  }
 0x669   :  { %3205 = vmatprep.subr.bf16.mxu1 %v6790_v11  ;;  %v6811_v11 = vld [vmem:[#allocation9 + $0x64] ss:$16 sps:$4 sm:$0xff]  }
 0x66b   :  { %2806 = vmatpush1.bf16.msra.mxu0 %v6782_v51  ;;  %v6820_v51 = vld [vmem:[#allocation9 + $0x4c] ss:$16 sps:$4 sm:$0xff]  }
 0x66c   :  { %3132 = vmatprep.subr.bf16.mxu0 %v6787_v30  ;;  %v6815_v30 = vld [vmem:[#allocation9 + $0x40] ss:$16 sps:$4 sm:$0xff]  }
 0x70b   :  { %v2509_v61 = vpop.f32.mrf.mxu0  ;;  %v2550_v18 = vpop.f32.mrf.mxu1 }
 0x70c   :  { %v2557_v14 = vadd.f32 %v2509_v61, %v8637_v20  ;;  %v2559_v45 = vadd.f32 %v2550_v18, %v8640_v44  ;;  %v6818_v61 = vld [vmem:[#allocation9 + $0x48] ss:$16 sps:$4 sm:$0xff]   ;;  %v6823_v18 = vld [vmem:[#allocation9 + $0x24] ss:$16 sps:$4 sm:$0xff]   ;;  %v6826_v20 = vld [vmem:[#allocation9 + $0x2c] ss:$16 sps:$4 sm:$0xff]  }
 0x70d   :  { %v2511_v60 = vpop.f32.mrf.mxu0  ;;  %v2552_v62 = vpop.f32.mrf.mxu1  ;;  %v7985_v44 = vld [vmem:[#allocation11 + $0xa0] ss:$16 sps:$4 sm:$0xff]  }
 0x70e   :  { %v6247_v32 = vmul.f32 -1.442695, %v2557_v14  ;;  %v2558_v34 = vadd.f32 %v2511_v60, %v8638_v33  ;;  %v2560_v43 = vadd.f32 %v2552_v62, %v8639_v42  ;;  %v6821_v14 = vld [vmem:[#allocation9 + $0x20] ss:$16 sps:$4 sm:$0xff]   ;;  %v6824_v60 = vld [vmem:[#allocation9 + $0x28] ss:$16 sps:$4 sm:$0xff]  }
 0x70f   :  { %v2513_v37 = vpop.f32.mrf.mxu0  ;;  %v2554_v38 = vpop.f32.mrf.mxu1  ;;  %v6829_v62 = vld [vmem:[#allocation9 + $0x4] ss:$16 sps:$4 sm:$0xff]   ;;  %v6827_v33 = vld [vmem:[#allocation9] ss:$16 sps:$4 sm:$0xff]  }
 0x710   :  { %7033 = vpow2.f32 %v6247_v32  ;;  %v6248_v39 = vmul.f32 -1.442695, %v2558_v34  ;;  %v6249_v57 = vmul.f32 -1.442695, %v2560_v43  ;;  %v6832_v32 = vld [vmem:[#allocation9 + $0xc] ss:$16 sps:$4 sm:$0xff]   ;;  %v2914_v37 = vpack.c.bf16 %v7662_v52, %v7617_v54 }
 0x711   :  { %v2514_v40 = vpop.f32.mrf.mxu0  ;;  %v2555_v41 = vpop.f32.mrf.mxu1  ;;  %v6830_v34 = vld [vmem:[#allocation9 + $0x8] ss:$16 sps:$4 sm:$0xff]   ;;  %v2915_v38 = vpack.c.bf16 %v7817_v12, %v7734_v2  ;;  %v7957_v54 = vld [vmem:[#allocation11 + $0xe4] ss:$16 sps:$4 sm:$0xff]   ;;  %v7959_v52 = vld [vmem:[#allocation11 + $0xec] ss:$16 sps:$4 sm:$0xff]  }
 0x712   :  { %7035 = vpow2.f32 %v6248_v39  ;;  %v2916_v39 = vpack.c.bf16 %v7908_v15, %v7863_v22  ;;  %v7961_v2 = vld [vmem:[#allocation11 + $0xe0] ss:$16 sps:$4 sm:$0xff]   ;;  %v7963_v12 = vld [vmem:[#allocation11 + $0xe8] ss:$16 sps:$4 sm:$0xff]   ;;  %v7969_v22 = vld [vmem:[#allocation11 + $0xc4] ss:$16 sps:$4 sm:$0xff]  }
 0x713   :  { %7037 = vtanh.f32 %v2559_v45  ;;  %v7971_v15 = vld [vmem:[#allocation11 + $0xcc] ss:$16 sps:$4 sm:$0xff]   ;;  %v7973_v40 = vld [vmem:[#allocation11 + $0xc0] ss:$16 sps:$4 sm:$0xff]   ;;  %v7975_v41 = vld [vmem:[#allocation11 + $0xc8] ss:$16 sps:$4 sm:$0xff]  }
 0x714   :  { %7039 = vpow2.f32 %v6249_v57  ;;  %v7981_v42 = vld [vmem:[#allocation11 + $0xa4] ss:$16 sps:$4 sm:$0xff]   ;;  %v7983_v43 = vld [vmem:[#allocation11 + $0xac] ss:$16 sps:$4 sm:$0xff]   ;;  %v7987_v45 = vld [vmem:[#allocation11 + $0xa8] ss:$16 sps:$4 sm:$0xff]  }
 0x715   :  { %v7993_v57 = vld [vmem:[#allocation11 + $0x84] ss:$16 sps:$4 sm:$0xff]  }
 0x71d   :  { %v7034_v23 = vpop.eup %7033 }
 0x71e   :  { %v2564_v48 = vadd.f32 1.0, %v7034_v23  ;;  %v7995_v23 = vld [vmem:[#allocation11 + $0x8c] ss:$16 sps:$4 sm:$0xff]  }
 0x71f   :  { %v7036_v26 = vpop.eup %7035 }
 0x720   :  { %7041 = vrcp.f32 %v2564_v48  ;;  %v2570_v24 = vadd.f32 1.0, %v7036_v26  ;;  %v7038_v9 = vpop.eup %7037  ;;  %v7997_v48 = vld [vmem:[#allocation11 + $0x80] ss:$16 sps:$4 sm:$0xff]   ;;  %v7999_v26 = vld [vmem:[#allocation11 + $0x88] ss:$16 sps:$4 sm:$0xff]  }
 0x721   :  { %v7040_v27 = vpop.eup %7039 }
 0x722   :  { %7043 = vrcp.f32 %v2570_v24  ;;  %v2577_v3 = vadd.f32 1.0, %v7040_v27  ;;  %v8005_v24 = vld [vmem:[#allocation11 + $0x64] ss:$16 sps:$4 sm:$0xff]   ;;  %v8009_v27 = vld [vmem:[#allocation11 + $0x60] ss:$16 sps:$4 sm:$0xff]  }
 0x724   :  { %7045 = vrcp.f32 %v2577_v3  ;;  %v8021_v3 = vld [vmem:[#allocation11 + $0x40] ss:$16 sps:$4 sm:$0xff]  }
 0x72d   :  { %v7042_v1 = vpop.eup %7041 }
 0x72e   :  { %v2582_v28 = vmul.f32 %v7042_v1, %v7038_v9  ;;  %v8007_v9 = vld [vmem:[#allocation11 + $0x6c] ss:$16 sps:$4 sm:$0xff]   ;;  %v8011_v1 = vld [vmem:[#allocation11 + $0x68] ss:$16 sps:$4 sm:$0xff]  }
 0x72f   :  { %v7044_v31 = vpop.eup %7043 }
 0x730   :  { %v2581_v53 = vmul.f32 %v7044_v31, %v7905_v8  ;;  %v6791_v8 = vld [vmem:[#allocation9 + $0xc0] ss:$16 sps:$4 sm:$0xff]   ;;  %v8019_v31 = vld [vmem:[#allocation11 + $0x4c] ss:$16 sps:$4 sm:$0xff]  }
 0x731   :  { %v7046_v56 = vpop.eup %7045 }
 0x732   :  { %v7936_v17 = vadd.f32 %v2582_v28, %v2581_v53  ;;  %v8017_v28 = vld [vmem:[#allocation11 + $0x44] ss:$16 sps:$4 sm:$0xff]   ;;  %v8023_v53 = vld [vmem:[#allocation11 + $0x48] ss:$16 sps:$4 sm:$0xff]  }
 0x734   :  { %7047 = vtanh.f32 %v7936_v17 }
 0x741   :  { %v7048_v58 = vpop.eup %7047 }
 0x742   :  { %v7939_v7 = vmul.f32 %v7048_v58, %v7046_v56  ;;  %v8029_v56 = vld [vmem:[#allocation11 + $0x24] ss:$16 sps:$4 sm:$0xff]   ;;  %v8031_v58 = vld [vmem:[#allocation11 + $0x2c] ss:$16 sps:$4 sm:$0xff]  }
 0x744   :  { %v2598_v13 = vpack.c.bf16 %v7939_v7, %v7939_v7 }
 0x746   :  { %2824 = vmatmul.mubr.bf16.vlgmr.msra.gmra.mxu0 %v2598_v13  ;;  %2865 = vmatmul.mubr.bf16.vlgmr.msra.gmra.mxu1 %v2598_v13  ;;  %v8039_v13 = vld [vmem:[#allocation11 + $0x4] ss:$16 sps:$4 sm:$0xff]  }
 0x747   :  { %3133 = vmatpush1.bf16.msra.mxu0 %v6785_v6  ;;  %3206 = vmatpush1.bf16.msra.mxu1 %v6788_v4  ;;  %v8033_v6 = vld [vmem:[#allocation11 + $0x20] ss:$16 sps:$4 sm:$0xff]   ;;  %v8035_v4 = vld [vmem:[#allocation11 + $0x28] ss:$16 sps:$4 sm:$0xff]  }
 0x748   :  { %3134 = vmatprep.subr.bf16.mxu0 %v6793_v10  ;;  %3207 = vmatprep.subr.bf16.mxu1 %v6796_v16  ;;  %v8041_v10 = vld [vmem:[#allocation11 + $0xc] ss:$16 sps:$4 sm:$0xff]   ;;  %v8045_v16 = vld [vmem:[#allocation11] ss:$16 sps:$4 sm:$0xff]  }
 0x749   :  { %3164 = vmatprep.mubr.bf16.mxu0 %v8627_v47  ;;  %3237 = vmatprep.mubr.bf16.mxu1 %v8627_v47 }
 0x74b   :  { %3135 = vmatpush1.bf16.msra.mxu0 %v6791_v8  ;;  %3208 = vmatpush1.bf16.msra.mxu1 %v6794_v21  ;;  %v8047_v8 = vld [vmem:[#allocation11 + $0x8] ss:$16 sps:$4 sm:$0xff]  }
 0x74c   :  { %3136 = vmatprep.subr.bf16.mxu0 %v6799_v49  ;;  %3209 = vmatprep.subr.bf16.mxu1 %v6802_v29  ;;  %v8641_v29 = vld [vmem:[#allocation24_spill] sm:$0xff] }
 0x74f   :  { %3137 = vmatpush1.bf16.msra.mxu0 %v6797_v5  ;;  %3210 = vmatpush1.bf16.msra.mxu1 %v6800_v63 }
 0x750   :  { %3138 = vmatprep.subr.bf16.mxu0 %v6805_v55  ;;  %3211 = vmatprep.subr.bf16.mxu1 %v6808_v50 }
 0x753   :  { %3139 = vmatpush1.bf16.msra.mxu0 %v6803_v35  ;;  %3212 = vmatpush1.bf16.msra.mxu1 %v6806_v36  ;;  %v8642_v35 = vld [vmem:[#allocation25_spill] sm:$0xff] }
 0x754   :  { %3140 = vmatprep.subr.bf16.mxu0 %v6811_v11  ;;  %3213 = vmatprep.subr.bf16.mxu1 %v6814_v0 }
 0x757   :  { %3141 = vmatpush1.bf16.msra.mxu0 %v6809_v19  ;;  %3214 = vmatpush1.bf16.msra.mxu1 %v6812_v59 }
 0x758   :  { %3142 = vmatprep.subr.bf16.mxu0 %v6817_v25  ;;  %3215 = vmatprep.subr.bf16.mxu1 %v6820_v51 }
 0x75b   :  { %3143 = vmatpush1.bf16.msra.mxu0 %v6815_v30  ;;  %3216 = vmatpush1.bf16.msra.mxu1 %v6818_v61  ;;  %v8643_v30 = vld [vmem:[#allocation33_spill] sm:$0xff] }
 0x75c   :  { %3144 = vmatprep.subr.bf16.mxu0 %v6823_v18  ;;  %3217 = vmatprep.subr.bf16.mxu1 %v6826_v20 }
 0x75f   :  { %3145 = vmatpush1.bf16.msra.mxu0 %v6821_v14  ;;  %3218 = vmatpush1.bf16.msra.mxu1 %v6824_v60 }
 0x760   :  { %3146 = vmatprep.subr.bf16.mxu0 %v6829_v62  ;;  %3219 = vmatprep.subr.bf16.mxu1 %v6832_v32 }
 0x763   :  { %3147 = vmatpush1.bf16.msra.mxu0 %v6827_v33  ;;  %3220 = vmatpush1.bf16.msra.mxu1 %v6830_v34 }
 0x764   :  { %3510 = vmatprep.subr.bf16.mxu0 %v7957_v54  ;;  %3551 = vmatprep.subr.bf16.mxu1 %v7959_v52 }
 0x766   :  { %3165 = vmatmul.mubr.bf16.vlgmr.msra.gmra.mxu0 %v2914_v37  ;;  %3238 = vmatmul.mubr.bf16.vlgmr.msra.gmra.mxu1 %v2914_v37 }
 0x767   :  { %3174 = vmatprep.mubr.bf16.mxu0 %v8627_v47  ;;  %3247 = vmatprep.mubr.bf16.mxu1 %v8627_v47 }
 0x768   :  { %3511 = vmatpush1.bf16.msra.mxu0 %v7961_v2  ;;  %3552 = vmatpush1.bf16.msra.mxu1 %v7963_v12 }
 0x769   :  { %3512 = vmatprep.subr.bf16.mxu0 %v7969_v22  ;;  %3553 = vmatprep.subr.bf16.mxu1 %v7971_v15 }
 0x76c   :  { %3513 = vmatpush1.bf16.msra.mxu0 %v7973_v40  ;;  %3554 = vmatpush1.bf16.msra.mxu1 %v7975_v41 }
 0x76d   :  { %3514 = vmatprep.subr.bf16.mxu0 %v7981_v42  ;;  %3555 = vmatprep.subr.bf16.mxu1 %v7983_v43 }
 0x76e   :  { %3175 = vmatmul.mubr.bf16.gmra.mxu0 %v2915_v38  ;;  %3248 = vmatmul.mubr.bf16.gmra.mxu1 %v2915_v38 }
 0x76f   :  { %3184 = vmatprep.mubr.bf16.mxu0 %v8627_v47  ;;  %3257 = vmatprep.mubr.bf16.mxu1 %v8627_v47 }
 0x770   :  { %3515 = vmatpush1.bf16.msra.mxu0 %v7985_v44  ;;  %3556 = vmatpush1.bf16.msra.mxu1 %v7987_v45 }
 0x771   :  { %3516 = vmatprep.subr.bf16.mxu0 %v7993_v57  ;;  %3557 = vmatprep.subr.bf16.mxu1 %v7995_v23 }
 0x774   :  { %3517 = vmatpush1.bf16.msra.mxu0 %v7997_v48  ;;  %3558 = vmatpush1.bf16.msra.mxu1 %v7999_v26 }
 0x775   :  { %3518 = vmatprep.subr.bf16.mxu0 %v8005_v24  ;;  %3559 = vmatprep.subr.bf16.mxu1 %v8007_v9 }
 0x776   :  { %3185 = vmatmul.mubr.bf16.gmra.mxu0 %v2916_v39  ;;  %3258 = vmatmul.mubr.bf16.gmra.mxu1 %v2916_v39 }
 0x777   :  { %3194 = vmatprep.mubr.bf16.mxu0 %v8627_v47  ;;  %3267 = vmatprep.mubr.bf16.mxu1 %v8627_v47 }
 0x778   :  { %3519 = vmatpush1.bf16.msra.mxu0 %v8009_v27  ;;  %3560 = vmatpush1.bf16.msra.mxu1 %v8011_v1 }
 0x779   :  { %3520 = vmatprep.subr.bf16.mxu0 %v8017_v28  ;;  %3561 = vmatprep.subr.bf16.mxu1 %v8019_v31 }
 0x77c   :  { %3521 = vmatpush1.bf16.msra.mxu0 %v8021_v3  ;;  %3562 = vmatpush1.bf16.msra.mxu1 %v8023_v53 }
 0x77d   :  { %3522 = vmatprep.subr.bf16.mxu0 %v8029_v56  ;;  %3563 = vmatprep.subr.bf16.mxu1 %v8031_v58 }
 0x780   :  { %3523 = vmatpush1.bf16.msra.mxu0 %v8033_v6  ;;  %3564 = vmatpush1.bf16.msra.mxu1 %v8035_v4 }
 0x781   :  { %3524 = vmatprep.subr.bf16.mxu0 %v8039_v13  ;;  %3565 = vmatprep.subr.bf16.mxu1 %v8041_v10 }
 0x784   :  { %3525 = vmatpush1.bf16.msra.mxu0 %v8045_v16  ;;  %3566 = vmatpush1.bf16.msra.mxu1 %v8047_v8 }
 0x785   :  { %3822 = vmatprep.subr.bf16.mxu0 %v7957_v54  ;;  %3863 = vmatprep.subr.bf16.mxu1 %v7959_v52 }
 0x806   :  { %v2825_v21 = vpop.f32.mrf.mxu0  ;;  %v2866_v49 = vpop.f32.mrf.mxu1 }
 0x807   :  { %v2873_v5 = vadd.f32 %v2825_v21, %v8641_v29  ;;  %v2875_v61 = vadd.f32 %v2866_v49, %v8643_v30 }
 0x808   :  { %v2827_v63 = vpop.f32.mrf.mxu0  ;;  %v2868_v55 = vpop.f32.mrf.mxu1 }
 0x809   :  { %v6282_v50 = vmul.f32 -1.442695, %v2873_v5  ;;  %v2874_v36 = vadd.f32 %v2827_v63, %v8642_v35  ;;  %v2876_v51 = vadd.f32 %v2868_v55, %v7612_v46  ;;  %v8644_v55 = vmov 0.0|0.0  }
 0x80a   :  { %v2829_v11 = vpop.f32.mrf.mxu0  ;;  %v2870_v0 = vpop.f32.mrf.mxu1 }
 0x80b   :  { %7049 = vpow2.f32 %v6282_v50  ;;  %v6283_v19 = vmul.f32 -1.442695, %v2874_v36  ;;  %v6284_v18 = vmul.f32 -1.442695, %v2876_v51 }
 0x80c   :  { %v2830_v59 = vpop.f32.mrf.mxu0  ;;  %v2871_v25 = vpop.f32.mrf.mxu1 }
 0x80d   :  { %7051 = vpow2.f32 %v6283_v19 }
 0x80e   :  { %7053 = vtanh.f32 %v2875_v61 }
 0x80f   :  { %7055 = vpow2.f32 %v6284_v18 }
 0x818   :  { %v7050_v20 = vpop.eup %7049 }
 0x819   :  { %v2880_v14 = vadd.f32 1.0, %v7050_v20 }
 0x81a   :  { %v7052_v60 = vpop.eup %7051 }
 0x81b   :  { %7057 = vrcp.f32 %v2880_v14  ;;  %v2886_v62 = vadd.f32 1.0, %v7052_v60  ;;  %v7054_v32 = vpop.eup %7053 }
 0x81c   :  { %v7056_v33 = vpop.eup %7055 }
 0x81d   :  { %7059 = vrcp.f32 %v2886_v62  ;;  %v2893_v39 = vadd.f32 1.0, %v7056_v33 }
 0x81f   :  { %7061 = vrcp.f32 %v2893_v39 }
 0x828   :  { %v7058_v34 = vpop.eup %7057 }
 0x829   :  { %v2898_v37 = vmul.f32 %v7058_v34, %v7054_v32 }
 0x82a   :  { %v7060_v38 = vpop.eup %7059 }
 0x82b   :  { %v2897_v21 = vmul.f32 %v7060_v38, %v7936_v17  ;;  %v3166_v17 = vpop.f32.mrf.mxu0 }
 0x82c   :  { %v7062_v49 = vpop.eup %7061 }
 0x82d   :  { %v2899_v46 = vadd.f32 %v2898_v37, %v2897_v21  ;;  %v3168_v50 = vpop.f32.mrf.mxu0  ;;  %v2950_v21 = vld [vmem:[%s8596_s6] sm:$0xf] }
 0x82f   :  { %7063 = vtanh.f32 %v2899_v46  ;;  %v8099_v36 = vpop.f32.mrf.mxu0 }
 0x831   :  { %v8103_v0 = vpop.f32.mrf.mxu0 }
 0x833   :  { %v8107_v59 = vpop.f32.mrf.mxu0 }
 0x835   :  { %v8111_v51 = vpop.f32.mrf.mxu0 }
 0x837   :  { %v8115_v61 = vpop.f32.mrf.mxu0 }
 0x838   :  { %8646 = vst [vmem:[#allocation18_spill] sm:$0xff] %v8115_v61 }
 0x839   :  { %v8119_v20 = vpop.f32.mrf.mxu0 }
 0x83a   :  { %8648 = vst [vmem:[#allocation28_spill] sm:$0xff] %v8119_v20 }
 0x83b   :  { %v8123_v60 = vpop.f32.mrf.mxu0 }
 0x83c   :  { %v7064_v29 = vpop.eup %7063  ;;  %8650 = vst [vmem:[#allocation20_spill] sm:$0xff] %v8123_v60 }
 0x83d   :  { %v2901_v5 = vmul.f32 %v7064_v29, %v7062_v49  ;;  %v8127_v32 = vpop.f32.mrf.mxu0 }
 0x83e   :  { %8652 = vst [vmem:[#allocation30_spill] sm:$0xff] %v8127_v32 }
 0x83f   :  { %v2917_v63 = vpack.c.bf16 %v2901_v5, %v7939_v7  ;;  %v3239_v7 = vpop.f32.mrf.mxu1  ;;  %v8131_v34 = vpop.f32.mrf.mxu0 }
 0x840   :  { %8654 = vst [vmem:[#allocation22_spill] sm:$0xff] %v8131_v34 }
 0x841   :  { %3195 = vmatmul.mubr.bf16.gmra.mxu0 %v2917_v63  ;;  %3268 = vmatmul.mubr.bf16.gmra.mxu1 %v2917_v63  ;;  %v3241_v35 = vpop.f32.mrf.mxu1  ;;  %v8135_v38 = vpop.f32.mrf.mxu0  ;;  %v8662_v63 = vld [vmem:[#allocation17_spill] sm:$0xff] }
 0x842   :  { %3542 = vmatprep.mubr.bf16.mxu0 %v8627_v47  ;;  %3583 = vmatprep.mubr.bf16.mxu1 %v8627_v47  ;;  %8656 = vst [vmem:[#allocation32_spill] sm:$0xff] %v8135_v38  ;;  %v8669_v61 = vsub.s32 3, %v8662_v63 }
 0x843   :  { %v8101_v11 = vpop.f32.mrf.mxu1 }
 0x845   :  { %v8105_v19 = vpop.f32.mrf.mxu1 }
 0x847   :  { %v8109_v25 = vpop.f32.mrf.mxu1 }
 0x848   :  { %8645 = vst [vmem:[#allocation26_spill] sm:$0xff] %v8109_v25 }
 0x849   :  { %3543 = vmatmul.mubr.bf16.vlgmr.msra.gmra.mxu0 %v8644_v55  ;;  %3584 = vmatmul.mubr.bf16.vlgmr.msra.gmra.mxu1 %v8644_v55  ;;  %v8113_v30 = vpop.f32.mrf.mxu1  ;;  %v8663_v55 = vsub.s32 0, %v8662_v63 }
 0x84a   :  { %3823 = vmatpush1.bf16.msra.mxu0 %v7961_v2  ;;  %3864 = vmatpush1.bf16.msra.mxu1 %v7963_v12 }
 0x84b   :  { %3824 = vmatprep.subr.bf16.mxu0 %v7969_v22  ;;  %3865 = vmatprep.subr.bf16.mxu1 %v7971_v15  ;;  %v8117_v18 = vpop.f32.mrf.mxu1  ;;  %v8152_v34 = vrot.slane %v2950_v21, %v8663_v55 }
 0x84c   :  { %3854 = vmatprep.mubr.bf16.mxu0 %v8627_v47  ;;  %3895 = vmatprep.mubr.bf16.mxu1 %v8627_v47  ;;  %8647 = vst [vmem:[#allocation19_spill] sm:$0xff] %v8117_v18 }
 0x84d   :  { %v8121_v14 = vpop.f32.mrf.mxu1 }
 0x84e   :  { %3825 = vmatpush1.bf16.msra.mxu0 %v7973_v40  ;;  %3866 = vmatpush1.bf16.msra.mxu1 %v7975_v41  ;;  %8649 = vst [vmem:[#allocation27_spill] sm:$0xff] %v8121_v14 }
 0x84f   :  { %3826 = vmatprep.subr.bf16.mxu0 %v7981_v42  ;;  %3867 = vmatprep.subr.bf16.mxu1 %v7983_v43  ;;  %v8125_v62 = vpop.f32.mrf.mxu1 }
 0x850   :  { %8651 = vst [vmem:[#allocation21_spill] sm:$0xff] %v8125_v62 }
 0x851   :  { %v8129_v33 = vpop.f32.mrf.mxu1 }
 0x852   :  { %3827 = vmatpush1.bf16.msra.mxu0 %v7985_v44  ;;  %3868 = vmatpush1.bf16.msra.mxu1 %v7987_v45  ;;  %8653 = vst [vmem:[#allocation29_spill] sm:$0xff] %v8129_v33 }
 0x853   :  { %3828 = vmatprep.subr.bf16.mxu0 %v7993_v57  ;;  %3869 = vmatprep.subr.bf16.mxu1 %v7995_v23  ;;  %v8133_v37 = vpop.f32.mrf.mxu1 }
 0x854   :  { %8655 = vst [vmem:[#allocation23_spill] sm:$0xff] %v8133_v37 }
 0x855   :  { %v8137_v39 = vpop.f32.mrf.mxu1 }
 0x856   :  { %3829 = vmatpush1.bf16.msra.mxu0 %v7997_v48  ;;  %3870 = vmatpush1.bf16.msra.mxu1 %v7999_v26  ;;  %8657 = vst [vmem:[#allocation31_spill] sm:$0xff] %v8137_v39  ;;  %v8666_v39 = vsub.s32 1, %v8662_v63 }
 0x857   :  { %3830 = vmatprep.subr.bf16.mxu0 %v8005_v24  ;;  %3871 = vmatprep.subr.bf16.mxu1 %v8007_v9 }
 0x858   :  { %v8160_v62 = vrot.slane %v2950_v21, %v8666_v39 }
 0x85a   :  { %3831 = vmatpush1.bf16.msra.mxu0 %v8009_v27  ;;  %3872 = vmatpush1.bf16.msra.mxu1 %v8011_v1  ;;  %v3169_v32 = vadd.f32 %v3168_v50, %v8160_v62  ;;  %v8670_v50 = vsub.s32 2, %v8662_v63 }
 0x85b   :  { %3832 = vmatprep.subr.bf16.mxu0 %v8017_v28  ;;  %3873 = vmatprep.subr.bf16.mxu1 %v8019_v31 }
 0x85e   :  { %3833 = vmatpush1.bf16.msra.mxu0 %v8021_v3  ;;  %3874 = vmatpush1.bf16.msra.mxu1 %v8023_v53 }
 0x85f   :  { %3834 = vmatprep.subr.bf16.mxu0 %v8029_v56  ;;  %3875 = vmatprep.subr.bf16.mxu1 %v8031_v58 }
 0x862   :  { %3835 = vmatpush1.bf16.msra.mxu0 %v8033_v6  ;;  %3876 = vmatpush1.bf16.msra.mxu1 %v8035_v4 }
 0x863   :  { %3836 = vmatprep.subr.bf16.mxu0 %v8039_v13  ;;  %3877 = vmatprep.subr.bf16.mxu1 %v8041_v10 }
 0x866   :  { %3837 = vmatpush1.bf16.msra.mxu0 %v8045_v16  ;;  %3878 = vmatpush1.bf16.msra.mxu1 %v8047_v8 }
 0x867   :  { %4135 = vmatprep.subr.bf16.mxu0 %v7957_v54  ;;  %4176 = vmatprep.subr.bf16.mxu1 %v7959_v52 }
 0x901   :  { %v8142_v46 = vpop.f32.mrf.mxu0  ;;  %v8144_v49 = vpop.f32.mrf.mxu1 }
 0x902   :  { %8658 = vst [vmem:[#allocation24_spill] sm:$0xff] %v8142_v46  ;;  %8659 = vst [vmem:[#allocation25_spill] sm:$0xff] %v8144_v49  ;;  %v3167_v49 = vadd.f32 %v3166_v17, %v8152_v34 }
 0x903   :  { %v8146_v29 = vpop.f32.mrf.mxu0  ;;  %v8148_v5 = vpop.f32.mrf.mxu1 }
 0x904   :  { %8660 = vst [vmem:[#allocation33_spill] sm:$0xff] %v8146_v29  ;;  %8661 = vst [vmem:[#allocation34_spill] sm:$0xff] %v8148_v5 }
 0x905   :  { %v8154_v37 = vpop.f32.mrf.mxu0  ;;  %v8156_v38 = vpop.f32.mrf.mxu1 }
 0x906   :  { %8664 = vst [vmem:[#allocation17_spill] sm:$0xff] %v8154_v37  ;;  %8665 = vst [vmem:[#allocation35_spill] sm:$0xff] %v8156_v38 }
 0x907   :  { %v8162_v33 = vpop.f32.mrf.mxu0  ;;  %v8164_v46 = vpop.f32.mrf.mxu1 }
 0x908   :  { %8667 = vst [vmem:[#allocation36_spill] sm:$0xff] %v8162_v33  ;;  %8668 = vst [vmem:[#allocation37_spill] sm:$0xff] %v8164_v46  ;;  %v8170_v33 = vrot.slane %v2950_v21, %v8669_v61 }
 0x909   :  { %v3544_v29 = vpop.f32.mrf.mxu0  ;;  %v3585_v5 = vpop.f32.mrf.mxu1 }
 0x90a   :  { %v3592_v55 = vadd.f32 %v3544_v29, %v3167_v49  ;;  %v3242_v17 = vadd.f32 %v3241_v35, %v8170_v33  ;;  %v8175_v49 = vrot.slane %v2950_v21, %v8670_v50 }
 0x90b   :  { %v3546_v60 = vpop.f32.mrf.mxu0  ;;  %v3587_v18 = vpop.f32.mrf.mxu1 }
 0x90c   :  { %v6349_v37 = vmul.f32 -1.442695, %v3592_v55  ;;  %v3593_v14 = vadd.f32 %v3546_v60, %v3169_v32  ;;  %v3595_v29 = vadd.f32 %v3587_v18, %v3242_v17  ;;  %v3240_v60 = vadd.f32 %v3239_v7, %v8175_v49 }
 0x90d   :  { %v3548_v38 = vpop.f32.mrf.mxu0  ;;  %v3589_v20 = vpop.f32.mrf.mxu1 }
 0x90e   :  { %7065 = vpow2.f32 %v6349_v37  ;;  %v6350_v39 = vmul.f32 -1.442695, %v3593_v14  ;;  %v6351_v32 = vmul.f32 -1.442695, %v3595_v29  ;;  %v3594_v37 = vadd.f32 %v3585_v5, %v3240_v60 }
 0x90f   :  { %v3549_v46 = vpop.f32.mrf.mxu0  ;;  %v3590_v25 = vpop.f32.mrf.mxu1  ;;  %v3171_v29 = vadd.f32 %v8099_v36, %v8152_v34 }
 0x910   :  { %7067 = vpow2.f32 %v6350_v39 }
 0x911   :  { %7069 = vpow2.f32 %v6351_v32 }
 0x91b   :  { %v7066_v20 = vpop.eup %7065 }
 0x91c   :  { %v3599_v14 = vadd.f32 1.0, %v7066_v20  ;;  %v3173_v20 = vadd.f32 %v8103_v0, %v8160_v62 }
 0x91d   :  { %v7068_v38 = vpop.eup %7067 }
 0x91e   :  { %7071 = vrcp.f32 %v3599_v14  ;;  %v3605_v61 = vadd.f32 1.0, %v7068_v38  ;;  %v7070_v25 = vpop.eup %7069 }
 0x91f   :  { %7073 = vtanh.f32 %v3594_v37  ;;  %v3612_v63 = vadd.f32 1.0, %v7070_v25 }
 0x920   :  { %7075 = vrcp.f32 %v3605_v61 }
 0x921   :  { %7077 = vrcp.f32 %v3612_v63 }
 0x92b   :  { %v7072_v46 = vpop.eup %7071 }
 0x92c   :  { %v7074_v35 = vpop.eup %7073 }
 0x92d   :  { %v7076_v55 = vpop.eup %7075  ;;  %v3617_v39 = vmul.f32 %v7074_v35, %v7072_v46 }
 0x92e   :  { %v3616_v21 = vmul.f32 0.0, %v7076_v55  ;;  %v7078_v7 = vpop.eup %7077 }
 0x930   :  { %v8178_v18 = vadd.f32 %v3617_v39, %v3616_v21  ;;  %v3244_v21 = vadd.f32 %v8101_v11, %v8175_v49 }
 0x932   :  { %7079 = vtanh.f32 %v8178_v18 }
 0x93f   :  { %v7080_v5 = vpop.eup %7079 }
 0x940   :  { %v8181_v17 = vmul.f32 %v7080_v5, %v7078_v7 }
 0x942   :  { %v3629_v50 = vpack.c.bf16 %v8181_v17, %v8181_v17 }
 0x944   :  { %3855 = vmatmul.mubr.bf16.vlgmr.msra.gmra.mxu0 %v3629_v50  ;;  %3896 = vmatmul.mubr.bf16.vlgmr.msra.gmra.mxu1 %v3629_v50 }
 0x945   :  { %4136 = vmatpush1.bf16.msra.mxu0 %v7961_v2  ;;  %4177 = vmatpush1.bf16.msra.mxu1 %v7963_v12 }
 0x946   :  { %4137 = vmatprep.subr.bf16.mxu0 %v7969_v22  ;;  %4178 = vmatprep.subr.bf16.mxu1 %v7971_v15 }
 0x947   :  { %4167 = vmatprep.mubr.bf16.mxu0 %v8627_v47  ;;  %4208 = vmatprep.mubr.bf16.mxu1 %v8627_v47 }
 0x949   :  { %4138 = vmatpush1.bf16.msra.mxu0 %v7973_v40  ;;  %4179 = vmatpush1.bf16.msra.mxu1 %v7975_v41 }
 0x94a   :  { %4139 = vmatprep.subr.bf16.mxu0 %v7981_v42  ;;  %4180 = vmatprep.subr.bf16.mxu1 %v7983_v43 }
 0x94d   :  { %4140 = vmatpush1.bf16.msra.mxu0 %v7985_v44  ;;  %4181 = vmatpush1.bf16.msra.mxu1 %v7987_v45 }
 0x94e   :  { %4141 = vmatprep.subr.bf16.mxu0 %v7993_v57  ;;  %4182 = vmatprep.subr.bf16.mxu1 %v7995_v23 }
 0x951   :  { %4142 = vmatpush1.bf16.msra.mxu0 %v7997_v48  ;;  %4183 = vmatpush1.bf16.msra.mxu1 %v7999_v26 }
 0x952   :  { %4143 = vmatprep.subr.bf16.mxu0 %v8005_v24  ;;  %4184 = vmatprep.subr.bf16.mxu1 %v8007_v9 }
 0x955   :  { %4144 = vmatpush1.bf16.msra.mxu0 %v8009_v27  ;;  %4185 = vmatpush1.bf16.msra.mxu1 %v8011_v1 }
 0x956   :  { %4145 = vmatprep.subr.bf16.mxu0 %v8017_v28  ;;  %4186 = vmatprep.subr.bf16.mxu1 %v8019_v31 }
 0x959   :  { %4146 = vmatpush1.bf16.msra.mxu0 %v8021_v3  ;;  %4187 = vmatpush1.bf16.msra.mxu1 %v8023_v53 }
 0x95a   :  { %4147 = vmatprep.subr.bf16.mxu0 %v8029_v56  ;;  %4188 = vmatprep.subr.bf16.mxu1 %v8031_v58 }
 0x95d   :  { %4148 = vmatpush1.bf16.msra.mxu0 %v8033_v6  ;;  %4189 = vmatpush1.bf16.msra.mxu1 %v8035_v4 }
 0x95e   :  { %4149 = vmatprep.subr.bf16.mxu0 %v8039_v13  ;;  %4190 = vmatprep.subr.bf16.mxu1 %v8041_v10 }
 0x961   :  { %4150 = vmatpush1.bf16.msra.mxu0 %v8045_v16  ;;  %4191 = vmatpush1.bf16.msra.mxu1 %v8047_v8 }
 0x962   :  { %4448 = vmatprep.subr.bf16.mxu0 %v7957_v54  ;;  %4489 = vmatprep.subr.bf16.mxu1 %v7959_v52  ;;  %v3246_v52 = vadd.f32 %v8105_v19, %v8170_v33 }
 0xa04   :  { %v3856_v60 = vpop.f32.mrf.mxu0  ;;  %v3897_v32 = vpop.f32.mrf.mxu1 }
 0xa05   :  { %v3904_v37 = vadd.f32 %v3856_v60, %v3171_v29  ;;  %v3906_v0 = vadd.f32 %v3897_v32, %v3244_v21  ;;  %v8291_v21 = vld [vmem:[#allocation11 + $0xe8] ss:$16 sps:$4 sm:$0xff]  }
 0xa06   :  { %v3858_v14 = vpop.f32.mrf.mxu0  ;;  %v3899_v38 = vpop.f32.mrf.mxu1 }
 0xa07   :  { %v6384_v61 = vmul.f32 -1.442695, %v3904_v37  ;;  %v3905_v25 = vadd.f32 %v3858_v14, %v3173_v20  ;;  %v3907_v36 = vadd.f32 %v3899_v38, %v3246_v52  ;;  %v8287_v52 = vld [vmem:[#allocation11 + $0xec] ss:$16 sps:$4 sm:$0xff]  }
 0xa08   :  { %v3860_v46 = vpop.f32.mrf.mxu0  ;;  %v3901_v35 = vpop.f32.mrf.mxu1 }
 0xa09   :  { %7081 = vpow2.f32 %v6384_v61  ;;  %v6385_v55 = vmul.f32 -1.442695, %v3905_v25  ;;  %v6386_v39 = vmul.f32 -1.442695, %v3907_v36  ;;  %v8289_v36 = vld [vmem:[#allocation11 + $0xe0] ss:$16 sps:$4 sm:$0xff]  }
 0xa0a   :  { %v3861_v54 = vpop.f32.mrf.mxu0  ;;  %v3902_v63 = vpop.f32.mrf.mxu1 }
 0xa0b   :  { %7083 = vpow2.f32 %v6385_v55  ;;  %v8285_v63 = vld [vmem:[#allocation11 + $0xe4] ss:$16 sps:$4 sm:$0xff]  }
 0xa0c   :  { %7085 = vtanh.f32 %v3906_v0  ;;  %v8297_v0 = vld [vmem:[#allocation11 + $0xc4] ss:$16 sps:$4 sm:$0xff]  }
 0xa0d   :  { %7087 = vpow2.f32 %v6386_v39  ;;  %v8299_v39 = vld [vmem:[#allocation11 + $0xcc] ss:$16 sps:$4 sm:$0xff]  }
 0xa16   :  { %v7082_v7 = vpop.eup %7081 }
 0xa17   :  { %v3911_v5 = vadd.f32 1.0, %v7082_v7  ;;  %v8301_v7 = vld [vmem:[#allocation11 + $0xc0] ss:$16 sps:$4 sm:$0xff]  }
 0xa18   :  { %v7084_v50 = vpop.eup %7083 }
 0xa19   :  { %7089 = vrcp.f32 %v3911_v5  ;;  %v3917_v29 = vadd.f32 1.0, %v7084_v50  ;;  %v7086_v60 = vpop.eup %7085  ;;  %v8303_v5 = vld [vmem:[#allocation11 + $0xc8] ss:$16 sps:$4 sm:$0xff]   ;;  %v8309_v50 = vld [vmem:[#allocation11 + $0xa4] ss:$16 sps:$4 sm:$0xff]  }
 0xa1a   :  { %v7088_v20 = vpop.eup %7087 }
 0xa1b   :  { %7091 = vrcp.f32 %v3917_v29  ;;  %v3924_v19 = vadd.f32 1.0, %v7088_v20  ;;  %v8311_v29 = vld [vmem:[#allocation11 + $0xac] ss:$16 sps:$4 sm:$0xff]   ;;  %v8315_v20 = vld [vmem:[#allocation11 + $0xa8] ss:$16 sps:$4 sm:$0xff]  }
 0xa1d   :  { %7093 = vrcp.f32 %v3924_v19  ;;  %v8327_v19 = vld [vmem:[#allocation11 + $0x88] ss:$16 sps:$4 sm:$0xff]  }
 0xa26   :  { %v7090_v37 = vpop.eup %7089 }
 0xa27   :  { %v3929_v14 = vmul.f32 %v7090_v37, %v7086_v60  ;;  %v8313_v60 = vld [vmem:[#allocation11 + $0xa0] ss:$16 sps:$4 sm:$0xff]   ;;  %v8321_v37 = vld [vmem:[#allocation11 + $0x84] ss:$16 sps:$4 sm:$0xff]  }
 0xa28   :  { %v7092_v61 = vpop.eup %7091 }
 0xa29   :  { %v3928_v38 = vmul.f32 %v7092_v61, %v8178_v18  ;;  %v8325_v61 = vld [vmem:[#allocation11 + $0x80] ss:$16 sps:$4 sm:$0xff]  }
 0xa2a   :  { %v7094_v11 = vpop.eup %7093 }
 0xa2b   :  { %v8228_v25 = vadd.f32 %v3929_v14, %v3928_v38  ;;  %v8323_v14 = vld [vmem:[#allocation11 + $0x8c] ss:$16 sps:$4 sm:$0xff]   ;;  %v8331_v38 = vld [vmem:[#allocation11 + $0x64] ss:$16 sps:$4 sm:$0xff]  }
 0xa2d   :  { %7095 = vtanh.f32 %v8228_v25 }
 0xa3a   :  { %v7096_v32 = vpop.eup %7095 }
 0xa3b   :  { %v8231_v46 = vmul.f32 %v7096_v32, %v7094_v11  ;;  %v8337_v11 = vld [vmem:[#allocation11 + $0x60] ss:$16 sps:$4 sm:$0xff]   ;;  %v8339_v32 = vld [vmem:[#allocation11 + $0x68] ss:$16 sps:$4 sm:$0xff]  }
 0xa3d   :  { %v3942_v35 = vpack.c.bf16 %v8231_v46, %v8231_v46 }
 0xa3f   :  { %4168 = vmatmul.mubr.bf16.vlgmr.msra.gmra.mxu0 %v3942_v35  ;;  %4209 = vmatmul.mubr.bf16.vlgmr.msra.gmra.mxu1 %v3942_v35  ;;  %v8343_v35 = vld [vmem:[#allocation11 + $0x44] ss:$16 sps:$4 sm:$0xff]  }
 0xa40   :  { %4449 = vmatpush1.bf16.msra.mxu0 %v7961_v2  ;;  %4490 = vmatpush1.bf16.msra.mxu1 %v7963_v12  ;;  %v3177_v2 = vadd.f32 %v8107_v59, %v8152_v34 }
 0xa41   :  { %4450 = vmatprep.subr.bf16.mxu0 %v7969_v22  ;;  %4491 = vmatprep.subr.bf16.mxu1 %v7971_v15  ;;  %v3179_v15 = vadd.f32 %v8111_v51, %v8160_v62 }
 0xa42   :  { %4480 = vmatprep.mubr.bf16.mxu0 %v8627_v47  ;;  %4521 = vmatprep.mubr.bf16.mxu1 %v8627_v47 }
 0xa44   :  { %4451 = vmatpush1.bf16.msra.mxu0 %v7973_v40  ;;  %4492 = vmatpush1.bf16.msra.mxu1 %v7975_v41 }
 0xa45   :  { %4452 = vmatprep.subr.bf16.mxu0 %v7981_v42  ;;  %4493 = vmatprep.subr.bf16.mxu1 %v7983_v43 }
 0xa48   :  { %4453 = vmatpush1.bf16.msra.mxu0 %v7985_v44  ;;  %4494 = vmatpush1.bf16.msra.mxu1 %v7987_v45 }
 0xa49   :  { %4454 = vmatprep.subr.bf16.mxu0 %v7993_v57  ;;  %4495 = vmatprep.subr.bf16.mxu1 %v7995_v23 }
 0xa4c   :  { %4455 = vmatpush1.bf16.msra.mxu0 %v7997_v48  ;;  %4496 = vmatpush1.bf16.msra.mxu1 %v7999_v26 }
 0xa4d   :  { %4456 = vmatprep.subr.bf16.mxu0 %v8005_v24  ;;  %4497 = vmatprep.subr.bf16.mxu1 %v8007_v9  ;;  %v3252_v24 = vadd.f32 %v8113_v30, %v8170_v33 }
 0xa50   :  { %4457 = vmatpush1.bf16.msra.mxu0 %v8009_v27  ;;  %4498 = vmatpush1.bf16.msra.mxu1 %v8011_v1  ;;  %v8671_v27 = vld [vmem:[#allocation26_spill] sm:$0xff] }
 0xa51   :  { %4458 = vmatprep.subr.bf16.mxu0 %v8017_v28  ;;  %4499 = vmatprep.subr.bf16.mxu1 %v8019_v31  ;;  %v3250_v1 = vadd.f32 %v8671_v27, %v8175_v49 }
 0xa54   :  { %4459 = vmatpush1.bf16.msra.mxu0 %v8021_v3  ;;  %4500 = vmatpush1.bf16.msra.mxu1 %v8023_v53 }
 0xa55   :  { %4460 = vmatprep.subr.bf16.mxu0 %v8029_v56  ;;  %4501 = vmatprep.subr.bf16.mxu1 %v8031_v58 }
 0xa58   :  { %4461 = vmatpush1.bf16.msra.mxu0 %v8033_v6  ;;  %4502 = vmatpush1.bf16.msra.mxu1 %v8035_v4 }
 0xa59   :  { %4462 = vmatprep.subr.bf16.mxu0 %v8039_v13  ;;  %4503 = vmatprep.subr.bf16.mxu1 %v8041_v10 }
 0xa5c   :  { %4463 = vmatpush1.bf16.msra.mxu0 %v8045_v16  ;;  %4504 = vmatpush1.bf16.msra.mxu1 %v8047_v8 }
 0xa5d   :  { %4761 = vmatprep.subr.bf16.mxu0 %v8285_v63  ;;  %4802 = vmatprep.subr.bf16.mxu1 %v8287_v52 }
 0xaff   :  { %v4169_v12 = vpop.f32.mrf.mxu0  ;;  %v4210_v22 = vpop.f32.mrf.mxu1 }
 0xb00   :  { %v4217_v40 = vadd.f32 %v4169_v12, %v3177_v2  ;;  %v4219_v28 = vadd.f32 %v4210_v22, %v3250_v1  ;;  %v8345_v2 = vld [vmem:[#allocation11 + $0x4c] ss:$16 sps:$4 sm:$0xff]   ;;  %v8349_v12 = vld [vmem:[#allocation11 + $0x40] ss:$16 sps:$4 sm:$0xff]   ;;  %v8351_v22 = vld [vmem:[#allocation11 + $0x48] ss:$16 sps:$4 sm:$0xff]  }
 0xb01   :  { %v4171_v41 = vpop.f32.mrf.mxu0  ;;  %v4212_v42 = vpop.f32.mrf.mxu1 }
 0xb02   :  { %v6419_v43 = vmul.f32 -1.442695, %v4217_v40  ;;  %v4218_v44 = vadd.f32 %v4171_v41, %v3179_v15  ;;  %v4220_v9 = vadd.f32 %v4212_v42, %v3252_v24  ;;  %v8355_v15 = vld [vmem:[#allocation11 + $0x24] ss:$16 sps:$4 sm:$0xff]   ;;  %v8357_v40 = vld [vmem:[#allocation11 + $0x2c] ss:$16 sps:$4 sm:$0xff]  }
 0xb03   :  { %v4173_v45 = vpop.f32.mrf.mxu0  ;;  %v4214_v57 = vpop.f32.mrf.mxu1  ;;  %v8361_v41 = vld [vmem:[#allocation11 + $0x20] ss:$16 sps:$4 sm:$0xff]   ;;  %v8363_v42 = vld [vmem:[#allocation11 + $0x28] ss:$16 sps:$4 sm:$0xff]  }
 0xb04   :  { %7097 = vpow2.f32 %v6419_v43  ;;  %v6420_v23 = vmul.f32 -1.442695, %v4218_v44  ;;  %v6421_v31 = vmul.f32 -1.442695, %v4220_v9  ;;  %v8367_v43 = vld [vmem:[#allocation11 + $0x4] ss:$16 sps:$4 sm:$0xff]  }
 0xb05   :  { %v4174_v48 = vpop.f32.mrf.mxu0  ;;  %v4215_v26 = vpop.f32.mrf.mxu1  ;;  %v8369_v44 = vld [vmem:[#allocation11 + $0xc] ss:$16 sps:$4 sm:$0xff]   ;;  %v8373_v45 = vld [vmem:[#allocation11] ss:$16 sps:$4 sm:$0xff]   ;;  %v8375_v57 = vld [vmem:[#allocation11 + $0x8] ss:$16 sps:$4 sm:$0xff]  }
 0xb06   :  { %7099 = vpow2.f32 %v6420_v23  ;;  %v8672_v23 = vld [vmem:[#allocation18_spill] sm:$0xff]  ;;  %v8673_v9 = vld [vmem:[#allocation28_spill] sm:$0xff] }
 0xb07   :  { %7101 = vtanh.f32 %v4219_v28  ;;  %v3181_v48 = vadd.f32 %v8672_v23, %v8152_v34  ;;  %v3183_v27 = vadd.f32 %v8673_v9, %v8160_v62 }
 0xb08   :  { %7103 = vpow2.f32 %v6421_v31 }
 0xb11   :  { %v7098_v3 = vpop.eup %7097 }
 0xb12   :  { %v4224_v53 = vadd.f32 1.0, %v7098_v3 }
 0xb13   :  { %v7100_v56 = vpop.eup %7099 }
 0xb14   :  { %7105 = vrcp.f32 %v4224_v53  ;;  %v4230_v58 = vadd.f32 1.0, %v7100_v56  ;;  %v7102_v6 = vpop.eup %7101 }
 0xb15   :  { %v7104_v4 = vpop.eup %7103 }
 0xb16   :  { %7107 = vrcp.f32 %v4230_v58  ;;  %v4237_v8 = vadd.f32 1.0, %v7104_v4 }
 0xb18   :  { %7109 = vrcp.f32 %v4237_v8 }
 0xb21   :  { %v7106_v13 = vpop.eup %7105 }
 0xb22   :  { %v4242_v10 = vmul.f32 %v7106_v13, %v7102_v6 }
 0xb23   :  { %v7108_v16 = vpop.eup %7107 }
 0xb24   :  { %v4241_v59 = vmul.f32 %v7108_v16, %v8228_v25  ;;  %v8333_v25 = vld [vmem:[#allocation11 + $0x6c] ss:$16 sps:$4 sm:$0xff]  }
 0xb25   :  { %v7110_v30 = vpop.eup %7109 }
 0xb26   :  { %v8276_v51 = vadd.f32 %v4242_v10, %v4241_v59  ;;  %v8674_v10 = vld [vmem:[#allocation27_spill] sm:$0xff] }
 0xb27   :  { %v3256_v16 = vadd.f32 %v8674_v10, %v8170_v33  ;;  %v8675_v59 = vld [vmem:[#allocation19_spill] sm:$0xff] }
 0xb28   :  { %7111 = vtanh.f32 %v8276_v51 }
 0xb35   :  { %v7112_v18 = vpop.eup %7111 }
 0xb36   :  { %v8279_v55 = vmul.f32 %v7112_v18, %v7110_v30  ;;  %v3254_v30 = vadd.f32 %v8675_v59, %v8175_v49  ;;  %v8677_v59 = vld [vmem:[#allocation30_spill] sm:$0xff] }
 0xb38   :  { %v4255_v54 = vpack.c.bf16 %v8279_v55, %v8279_v55 }
 0xb3a   :  { %4481 = vmatmul.mubr.bf16.vlgmr.msra.gmra.mxu0 %v4255_v54  ;;  %4522 = vmatmul.mubr.bf16.vlgmr.msra.gmra.mxu1 %v4255_v54 }
 0xb3b   :  { %4793 = vmatprep.mubr.bf16.mxu0 %v8627_v47  ;;  %4834 = vmatprep.mubr.bf16.mxu1 %v8627_v47 }
 0xb3c   :  { %4762 = vmatpush1.bf16.msra.mxu0 %v8289_v36  ;;  %4803 = vmatpush1.bf16.msra.mxu1 %v8291_v21 }
 0xb3d   :  { %4763 = vmatprep.subr.bf16.mxu0 %v8297_v0  ;;  %4804 = vmatprep.subr.bf16.mxu1 %v8299_v39 }
 0xb40   :  { %4764 = vmatpush1.bf16.msra.mxu0 %v8301_v7  ;;  %4805 = vmatpush1.bf16.msra.mxu1 %v8303_v5 }
 0xb41   :  { %4765 = vmatprep.subr.bf16.mxu0 %v8309_v50  ;;  %4806 = vmatprep.subr.bf16.mxu1 %v8311_v29 }
 0xb44   :  { %4766 = vmatpush1.bf16.msra.mxu0 %v8313_v60  ;;  %4807 = vmatpush1.bf16.msra.mxu1 %v8315_v20 }
 0xb45   :  { %4767 = vmatprep.subr.bf16.mxu0 %v8321_v37  ;;  %4808 = vmatprep.subr.bf16.mxu1 %v8323_v14 }
 0xb48   :  { %4768 = vmatpush1.bf16.msra.mxu0 %v8325_v61  ;;  %4809 = vmatpush1.bf16.msra.mxu1 %v8327_v19 }
 0xb49   :  { %4769 = vmatprep.subr.bf16.mxu0 %v8331_v38  ;;  %4810 = vmatprep.subr.bf16.mxu1 %v8333_v25 }
 0xb4c   :  { %4770 = vmatpush1.bf16.msra.mxu0 %v8337_v11  ;;  %4811 = vmatpush1.bf16.msra.mxu1 %v8339_v32 }
 0xb4d   :  { %4771 = vmatprep.subr.bf16.mxu0 %v8343_v35  ;;  %4812 = vmatprep.subr.bf16.mxu1 %v8345_v2 }
 0xb50   :  { %4772 = vmatpush1.bf16.msra.mxu0 %v8349_v12  ;;  %4813 = vmatpush1.bf16.msra.mxu1 %v8351_v22 }
 0xb51   :  { %4773 = vmatprep.subr.bf16.mxu0 %v8355_v15  ;;  %4814 = vmatprep.subr.bf16.mxu1 %v8357_v40 }
 0xb54   :  { %4774 = vmatpush1.bf16.msra.mxu0 %v8361_v41  ;;  %4815 = vmatpush1.bf16.msra.mxu1 %v8363_v42 }
 0xb55   :  { %4775 = vmatprep.subr.bf16.mxu0 %v8367_v43  ;;  %4816 = vmatprep.subr.bf16.mxu1 %v8369_v44 }
 0xb58   :  { %4776 = vmatpush1.bf16.msra.mxu0 %v8373_v45  ;;  %4817 = vmatpush1.bf16.msra.mxu1 %v8375_v57 }
 0xb59   :  { %5074 = vmatprep.subr.bf16.mxu0 %v8285_v63  ;;  %5115 = vmatprep.subr.bf16.mxu1 %v8287_v52 }
 0xbfa   :  { %v4482_v26 = vpop.f32.mrf.mxu0  ;;  %v4523_v24 = vpop.f32.mrf.mxu1 }
 0xbfb   :  { %v4530_v1 = vadd.f32 %v4482_v26, %v3181_v48  ;;  %v4532_v18 = vadd.f32 %v4523_v24, %v3254_v30  ;;  %v3189_v30 = vadd.f32 %v8677_v59, %v8160_v62 }
 0xbfc   :  { %v4484_v28 = vpop.f32.mrf.mxu0  ;;  %v4525_v31 = vpop.f32.mrf.mxu1 }
 0xbfd   :  { %v6454_v3 = vmul.f32 -1.442695, %v4530_v1  ;;  %v4531_v53 = vadd.f32 %v4484_v28, %v3183_v27  ;;  %v4533_v8 = vadd.f32 %v4525_v31, %v3256_v16 }
 0xbfe   :  { %v4486_v56 = vpop.f32.mrf.mxu0  ;;  %v4527_v58 = vpop.f32.mrf.mxu1 }
 0xbff   :  { %7113 = vpow2.f32 %v6454_v3  ;;  %v6455_v6 = vmul.f32 -1.442695, %v4531_v53  ;;  %v6456_v54 = vmul.f32 -1.442695, %v4533_v8 }
 0xc00   :  { %v4487_v4 = vpop.f32.mrf.mxu0  ;;  %v4528_v13 = vpop.f32.mrf.mxu1 }
 0xc01   :  { %7115 = vpow2.f32 %v6455_v6 }
 0xc02   :  { %7117 = vtanh.f32 %v4532_v18 }
 0xc03   :  { %7119 = vpow2.f32 %v6456_v54 }
 0xc0c   :  { %v7114_v23 = vpop.eup %7113 }
 0xc0d   :  { %v4537_v48 = vadd.f32 1.0, %v7114_v23 }
 0xc0e   :  { %v7116_v26 = vpop.eup %7115 }
 0xc0f   :  { %7121 = vrcp.f32 %v4537_v48  ;;  %v4543_v9 = vadd.f32 1.0, %v7116_v26  ;;  %v7118_v27 = vpop.eup %7117 }
 0xc10   :  { %v7120_v1 = vpop.eup %7119 }
 0xc11   :  { %7123 = vrcp.f32 %v4543_v9  ;;  %v4550_v56 = vadd.f32 1.0, %v7120_v1 }
 0xc13   :  { %7125 = vrcp.f32 %v4550_v56 }
 0xc1c   :  { %v7122_v28 = vpop.eup %7121 }
 0xc1d   :  { %v4555_v3 = vmul.f32 %v7122_v28, %v7118_v27 }
 0xc1e   :  { %v7124_v53 = vpop.eup %7123 }
 0xc1f   :  { %v4554_v31 = vmul.f32 %v7124_v53, %v8276_v51  ;;  %v8676_v51 = vld [vmem:[#allocation20_spill] sm:$0xff]  ;;  %v8678_v53 = vld [vmem:[#allocation29_spill] sm:$0xff] }
 0xc20   :  { %v7126_v24 = vpop.eup %7125  ;;  %v3187_v10 = vadd.f32 %v8676_v51, %v8152_v34  ;;  %v3262_v56 = vadd.f32 %v8678_v53, %v8170_v33 }
 0xc21   :  { %v8392_v58 = vadd.f32 %v4555_v3, %v4554_v31 }
 0xc23   :  { %7127 = vtanh.f32 %v8392_v58 }
 0xc30   :  { %v7128_v6 = vpop.eup %7127 }
 0xc31   :  { %v8395_v4 = vmul.f32 %v7128_v6, %v7126_v24  ;;  %v8679_v24 = vld [vmem:[#allocation21_spill] sm:$0xff] }
 0xc32   :  { %v3260_v6 = vadd.f32 %v8679_v24, %v8175_v49 }
 0xc33   :  { %v4568_v13 = vpack.c.bf16 %v8395_v4, %v8395_v4 }
 0xc35   :  { %4794 = vmatmul.mubr.bf16.vlgmr.msra.gmra.mxu0 %v4568_v13  ;;  %4835 = vmatmul.mubr.bf16.vlgmr.msra.gmra.mxu1 %v4568_v13 }
 0xc36   :  { %5075 = vmatpush1.bf16.msra.mxu0 %v8289_v36  ;;  %5116 = vmatpush1.bf16.msra.mxu1 %v8291_v21 }
 0xc37   :  { %5076 = vmatprep.subr.bf16.mxu0 %v8297_v0  ;;  %5117 = vmatprep.subr.bf16.mxu1 %v8299_v39 }
 0xc38   :  { %5106 = vmatprep.mubr.bf16.mxu0 %v8627_v47  ;;  %5147 = vmatprep.mubr.bf16.mxu1 %v8627_v47 }
 0xc3a   :  { %5077 = vmatpush1.bf16.msra.mxu0 %v8301_v7  ;;  %5118 = vmatpush1.bf16.msra.mxu1 %v8303_v5 }
 0xc3b   :  { %5078 = vmatprep.subr.bf16.mxu0 %v8309_v50  ;;  %5119 = vmatprep.subr.bf16.mxu1 %v8311_v29 }
 0xc3e   :  { %5079 = vmatpush1.bf16.msra.mxu0 %v8313_v60  ;;  %5120 = vmatpush1.bf16.msra.mxu1 %v8315_v20 }
 0xc3f   :  { %5080 = vmatprep.subr.bf16.mxu0 %v8321_v37  ;;  %5121 = vmatprep.subr.bf16.mxu1 %v8323_v14 }
 0xc42   :  { %5081 = vmatpush1.bf16.msra.mxu0 %v8325_v61  ;;  %5122 = vmatpush1.bf16.msra.mxu1 %v8327_v19 }
 0xc43   :  { %5082 = vmatprep.subr.bf16.mxu0 %v8331_v38  ;;  %5123 = vmatprep.subr.bf16.mxu1 %v8333_v25 }
 0xc46   :  { %5083 = vmatpush1.bf16.msra.mxu0 %v8337_v11  ;;  %5124 = vmatpush1.bf16.msra.mxu1 %v8339_v32 }
 0xc47   :  { %5084 = vmatprep.subr.bf16.mxu0 %v8343_v35  ;;  %5125 = vmatprep.subr.bf16.mxu1 %v8345_v2 }
 0xc4a   :  { %5085 = vmatpush1.bf16.msra.mxu0 %v8349_v12  ;;  %5126 = vmatpush1.bf16.msra.mxu1 %v8351_v22 }
 0xc4b   :  { %5086 = vmatprep.subr.bf16.mxu0 %v8355_v15  ;;  %5127 = vmatprep.subr.bf16.mxu1 %v8357_v40 }
 0xc4e   :  { %5087 = vmatpush1.bf16.msra.mxu0 %v8361_v41  ;;  %5128 = vmatpush1.bf16.msra.mxu1 %v8363_v42 }
 0xc4f   :  { %5088 = vmatprep.subr.bf16.mxu0 %v8367_v43  ;;  %5129 = vmatprep.subr.bf16.mxu1 %v8369_v44 }
 0xc52   :  { %5089 = vmatpush1.bf16.msra.mxu0 %v8373_v45  ;;  %5130 = vmatpush1.bf16.msra.mxu1 %v8375_v57 }
 0xc53   :  { %5387 = vmatprep.subr.bf16.mxu0 %v8285_v63  ;;  %5428 = vmatprep.subr.bf16.mxu1 %v8287_v52 }
 0xcf5   :  { %v4795_v16 = vpop.f32.mrf.mxu0  ;;  %v4836_v8 = vpop.f32.mrf.mxu1 }
 0xcf6   :  { %v4843_v18 = vadd.f32 %v4795_v16, %v3187_v10  ;;  %v4845_v13 = vadd.f32 %v4836_v8, %v3260_v6  ;;  %v8681_v6 = vld [vmem:[#allocation32_spill] sm:$0xff] }
 0xcf7   :  { %v4797_v54 = vpop.f32.mrf.mxu0  ;;  %v4838_v23 = vpop.f32.mrf.mxu1 }
 0xcf8   :  { %v6489_v48 = vmul.f32 -1.442695, %v4843_v18  ;;  %v4844_v26 = vadd.f32 %v4797_v54, %v3189_v30  ;;  %v4846_v31 = vadd.f32 %v4838_v23, %v3262_v56 }
 0xcf9   :  { %v4799_v9 = vpop.f32.mrf.mxu0  ;;  %v4840_v27 = vpop.f32.mrf.mxu1 }
 0xcfa   :  { %7129 = vpow2.f32 %v6489_v48  ;;  %v6490_v1 = vmul.f32 -1.442695, %v4844_v26  ;;  %v6491_v51 = vmul.f32 -1.442695, %v4846_v31 }
 0xcfb   :  { %v4800_v28 = vpop.f32.mrf.mxu0  ;;  %v4841_v3 = vpop.f32.mrf.mxu1 }
 0xcfc   :  { %7131 = vpow2.f32 %v6490_v1 }
 0xcfd   :  { %7133 = vtanh.f32 %v4845_v13  ;;  %v3193_v13 = vadd.f32 %v8681_v6, %v8160_v62 }
 0xcfe   :  { %7135 = vpow2.f32 %v6491_v51 }
 0xd07   :  { %v7130_v10 = vpop.eup %7129 }
 0xd08   :  { %v4850_v16 = vadd.f32 1.0, %v7130_v10 }
 0xd09   :  { %v7132_v59 = vpop.eup %7131 }
 0xd0a   :  { %7137 = vrcp.f32 %v4850_v16  ;;  %v4856_v30 = vadd.f32 1.0, %v7132_v59  ;;  %v7134_v18 = vpop.eup %7133 }
 0xd0b   :  { %v7136_v54 = vpop.eup %7135 }
 0xd0c   :  { %7139 = vrcp.f32 %v4856_v30  ;;  %v4863_v27 = vadd.f32 1.0, %v7136_v54 }
 0xd0e   :  { %7141 = vrcp.f32 %v4863_v27 }
 0xd17   :  { %v7138_v48 = vpop.eup %7137 }
 0xd18   :  { %v4868_v26 = vmul.f32 %v7138_v48, %v7134_v18 }
 0xd19   :  { %v7140_v9 = vpop.eup %7139 }
 0xd1a   :  { %v4867_v23 = vmul.f32 %v7140_v9, %v8392_v58  ;;  %v8680_v58 = vld [vmem:[#allocation22_spill] sm:$0xff] }
 0xd1b   :  { %v7142_v8 = vpop.eup %7141  ;;  %v3191_v56 = vadd.f32 %v8680_v58, %v8152_v34 }
 0xd1c   :  { %v8442_v1 = vadd.f32 %v4868_v26, %v4867_v23  ;;  %v8683_v23 = vld [vmem:[#allocation23_spill] sm:$0xff] }
 0xd1e   :  { %7143 = vtanh.f32 %v8442_v1 }
 0xd2b   :  { %v7144_v28 = vpop.eup %7143 }
 0xd2c   :  { %v8445_v3 = vmul.f32 %v7144_v28, %v7142_v8  ;;  %v3264_v8 = vadd.f32 %v8683_v23, %v8175_v49 }
 0xd2e   :  { %v4881_v53 = vpack.c.bf16 %v8445_v3, %v8445_v3 }
 0xd30   :  { %5107 = vmatmul.mubr.bf16.vlgmr.msra.gmra.mxu0 %v4881_v53  ;;  %5148 = vmatmul.mubr.bf16.vlgmr.msra.gmra.mxu1 %v4881_v53 }
 0xd31   :  { %5388 = vmatpush1.bf16.msra.mxu0 %v8289_v36  ;;  %5429 = vmatpush1.bf16.msra.mxu1 %v8291_v21 }
 0xd32   :  { %5389 = vmatprep.subr.bf16.mxu0 %v8297_v0  ;;  %5430 = vmatprep.subr.bf16.mxu1 %v8299_v39 }
 0xd33   :  { %5419 = vmatprep.mubr.bf16.mxu0 %v8627_v47  ;;  %5460 = vmatprep.mubr.bf16.mxu1 %v8627_v47 }
 0xd35   :  { %5390 = vmatpush1.bf16.msra.mxu0 %v8301_v7  ;;  %5431 = vmatpush1.bf16.msra.mxu1 %v8303_v5 }
 0xd36   :  { %5391 = vmatprep.subr.bf16.mxu0 %v8309_v50  ;;  %5432 = vmatprep.subr.bf16.mxu1 %v8311_v29 }
 0xd39   :  { %5392 = vmatpush1.bf16.msra.mxu0 %v8313_v60  ;;  %5433 = vmatpush1.bf16.msra.mxu1 %v8315_v20 }
 0xd3a   :  { %5393 = vmatprep.subr.bf16.mxu0 %v8321_v37  ;;  %5434 = vmatprep.subr.bf16.mxu1 %v8323_v14 }
 0xd3d   :  { %5394 = vmatpush1.bf16.msra.mxu0 %v8325_v61  ;;  %5435 = vmatpush1.bf16.msra.mxu1 %v8327_v19 }
 0xd3e   :  { %5395 = vmatprep.subr.bf16.mxu0 %v8331_v38  ;;  %5436 = vmatprep.subr.bf16.mxu1 %v8333_v25 }
 0xd41   :  { %5396 = vmatpush1.bf16.msra.mxu0 %v8337_v11  ;;  %5437 = vmatpush1.bf16.msra.mxu1 %v8339_v32 }
 0xd42   :  { %5397 = vmatprep.subr.bf16.mxu0 %v8343_v35  ;;  %5438 = vmatprep.subr.bf16.mxu1 %v8345_v2 }
 0xd45   :  { %5398 = vmatpush1.bf16.msra.mxu0 %v8349_v12  ;;  %5439 = vmatpush1.bf16.msra.mxu1 %v8351_v22 }
 0xd46   :  { %5399 = vmatprep.subr.bf16.mxu0 %v8355_v15  ;;  %5440 = vmatprep.subr.bf16.mxu1 %v8357_v40 }
 0xd49   :  { %5400 = vmatpush1.bf16.msra.mxu0 %v8361_v41  ;;  %5441 = vmatpush1.bf16.msra.mxu1 %v8363_v42 }
 0xd4a   :  { %5401 = vmatprep.subr.bf16.mxu0 %v8367_v43  ;;  %5442 = vmatprep.subr.bf16.mxu1 %v8369_v44 }
 0xd4d   :  { %5402 = vmatpush1.bf16.msra.mxu0 %v8373_v45  ;;  %5443 = vmatpush1.bf16.msra.mxu1 %v8375_v57 }
 0xd4e   :  { %5700 = vmatprep.subr.bf16.mxu0 %v8285_v63  ;;  %5741 = vmatprep.subr.bf16.mxu1 %v8287_v52  ;;  %v8682_v52 = vld [vmem:[#allocation31_spill] sm:$0xff] }
 0xd4f   :  { %v3266_v9 = vadd.f32 %v8682_v52, %v8170_v33 }
 0xdf0   :  { %v5108_v31 = vpop.f32.mrf.mxu0  ;;  %v5149_v24 = vpop.f32.mrf.mxu1 }
 0xdf1   :  { %v5156_v51 = vadd.f32 %v5108_v31, %v3191_v56  ;;  %v5158_v28 = vadd.f32 %v5149_v24, %v3264_v8 }
 0xdf2   :  { %v5110_v10 = vpop.f32.mrf.mxu0  ;;  %v5151_v16 = vpop.f32.mrf.mxu1 }
 0xdf3   :  { %v6524_v59 = vmul.f32 -1.442695, %v5156_v51  ;;  %v5157_v30 = vadd.f32 %v5110_v10, %v3193_v13  ;;  %v5159_v27 = vadd.f32 %v5151_v16, %v3266_v9 }
 0xdf4   :  { %v5112_v18 = vpop.f32.mrf.mxu0  ;;  %v5153_v54 = vpop.f32.mrf.mxu1 }
 0xdf5   :  { %7145 = vpow2.f32 %v6524_v59  ;;  %v6525_v48 = vmul.f32 -1.442695, %v5157_v30  ;;  %v6526_v53 = vmul.f32 -1.442695, %v5159_v27 }
 0xdf6   :  { %v5113_v63 = vpop.f32.mrf.mxu0  ;;  %v5154_v26 = vpop.f32.mrf.mxu1 }
 0xdf7   :  { %7147 = vpow2.f32 %v6525_v48 }
 0xdf8   :  { %7149 = vtanh.f32 %v5158_v28 }
 0xdf9   :  { %7151 = vpow2.f32 %v6526_v53 }
 0xe02   :  { %v7146_v58 = vpop.eup %7145 }
 0xe03   :  { %v5163_v56 = vadd.f32 1.0, %v7146_v58 }
 0xe04   :  { %v7148_v31 = vpop.eup %7147 }
 0xe05   :  { %7153 = vrcp.f32 %v5163_v56  ;;  %v5169_v6 = vadd.f32 1.0, %v7148_v31  ;;  %v7150_v13 = vpop.eup %7149  ;;  %v6930_v56 = vld [vmem:[#allocation12 + $0x30] sm:$0xff]   ;;  %v5823_v31 = vpack.c.bf16 %v8231_v46, %v8181_v17  ;;  %v6936_v17 = vld [vmem:[#allocation12] sm:$0xff]   ;;  %v5824_v46 = vpack.c.bf16 %v8395_v4, %v8279_v55 }
 0xe06   :  { %v7152_v51 = vpop.eup %7151 }
 0xe07   :  { %7155 = vrcp.f32 %v5169_v6  ;;  %v5176_v18 = vadd.f32 1.0, %v7152_v51  ;;  %v6931_v6 = vld [vmem:[#allocation12 + $0x28] sm:$0xff]   ;;  %v6933_v51 = vld [vmem:[#allocation12 + $0x18] sm:$0xff]  }
 0xe09   :  { %7157 = vrcp.f32 %v5176_v18  ;;  %v8688_v18 = vld [vmem:[#allocation17_spill] sm:$0xff] }
 0xe12   :  { %v7154_v10 = vpop.eup %7153 }
 0xe13   :  { %v5181_v59 = vmul.f32 %v7154_v10, %v7150_v13  ;;  %v6932_v13 = vld [vmem:[#allocation12 + $0x20] sm:$0xff]   ;;  %v6934_v10 = vld [vmem:[#allocation12 + $0x10] sm:$0xff]  }
 0xe14   :  { %v7156_v30 = vpop.eup %7155 }
 0xe15   :  { %v5180_v16 = vmul.f32 %v7156_v30, %v8442_v1 }
 0xe16   :  { %v7158_v24 = vpop.eup %7157 }
 0xe17   :  { %v8492_v54 = vadd.f32 %v5181_v59, %v5180_v16  ;;  %v6935_v59 = vld [vmem:[#allocation12 + $0x8] sm:$0xff]   ;;  %v3201_v16 = vadd.f32 %v8688_v18, %v8152_v34 }
 0xe19   :  { %7159 = vtanh.f32 %v8492_v54 }
 0xe26   :  { %v7160_v48 = vpop.eup %7159 }
 0xe27   :  { %v8495_v63 = vmul.f32 %v7160_v48, %v7158_v24  ;;  %v8689_v48 = vld [vmem:[#allocation36_spill] sm:$0xff] }
 0xe29   :  { %v5194_v26 = vpack.c.bf16 %v8495_v63, %v8495_v63  ;;  %v5825_v30 = vpack.c.bf16 %v8495_v63, %v8445_v3 }
 0xe2b   :  { %5420 = vmatmul.mubr.bf16.vlgmr.msra.gmra.mxu0 %v5194_v26  ;;  %5461 = vmatmul.mubr.bf16.vlgmr.msra.gmra.mxu1 %v5194_v26  ;;  %v3203_v26 = vadd.f32 %v8689_v48, %v8160_v62 }
 0xe2c   :  { %5701 = vmatpush1.bf16.msra.mxu0 %v8289_v36  ;;  %5742 = vmatpush1.bf16.msra.mxu1 %v8291_v21  ;;  %v8684_v36 = vld [vmem:[#allocation24_spill] sm:$0xff] }
 0xe2d   :  { %5702 = vmatprep.subr.bf16.mxu0 %v8297_v0  ;;  %5743 = vmatprep.subr.bf16.mxu1 %v8299_v39  ;;  %v3197_v21 = vadd.f32 %v8684_v36, %v8152_v34 }
 0xe2e   :  { %5732 = vmatprep.mubr.bf16.mxu0 %v8627_v47  ;;  %5773 = vmatprep.mubr.bf16.mxu1 %v8627_v47  ;;  %v6929_v47 = vld [vmem:[#allocation12 + $0x38] sm:$0xff]  }
 0xe30   :  { %5703 = vmatpush1.bf16.msra.mxu0 %v8301_v7  ;;  %5744 = vmatpush1.bf16.msra.mxu1 %v8303_v5  ;;  %v8685_v7 = vld [vmem:[#allocation33_spill] sm:$0xff] }
 0xe31   :  { %5704 = vmatprep.subr.bf16.mxu0 %v8309_v50  ;;  %5745 = vmatprep.subr.bf16.mxu1 %v8311_v29  ;;  %v3199_v5 = vadd.f32 %v8685_v7, %v8160_v62 }
 0xe34   :  { %5705 = vmatpush1.bf16.msra.mxu0 %v8313_v60  ;;  %5746 = vmatpush1.bf16.msra.mxu1 %v8315_v20 }
 0xe35   :  { %5706 = vmatprep.subr.bf16.mxu0 %v8321_v37  ;;  %5747 = vmatprep.subr.bf16.mxu1 %v8323_v14 }
 0xe38   :  { %5707 = vmatpush1.bf16.msra.mxu0 %v8325_v61  ;;  %5748 = vmatpush1.bf16.msra.mxu1 %v8327_v19 }
 0xe39   :  { %5708 = vmatprep.subr.bf16.mxu0 %v8331_v38  ;;  %5749 = vmatprep.subr.bf16.mxu1 %v8333_v25 }
 0xe3c   :  { %5709 = vmatpush1.bf16.msra.mxu0 %v8337_v11  ;;  %5750 = vmatpush1.bf16.msra.mxu1 %v8339_v32  ;;  %v8686_v11 = vld [vmem:[#allocation34_spill] sm:$0xff] }
 0xe3d   :  { %5710 = vmatprep.subr.bf16.mxu0 %v8343_v35  ;;  %5751 = vmatprep.subr.bf16.mxu1 %v8345_v2  ;;  %v3272_v32 = vadd.f32 %v8686_v11, %v8170_v33  ;;  %v8687_v2 = vld [vmem:[#allocation25_spill] sm:$0xff] }
 0xe40   :  { %5711 = vmatpush1.bf16.msra.mxu0 %v8349_v12  ;;  %5752 = vmatpush1.bf16.msra.mxu1 %v8351_v22  ;;  %v3270_v12 = vadd.f32 %v8687_v2, %v8175_v49 }
 0xe41   :  { %5712 = vmatprep.subr.bf16.mxu0 %v8355_v15  ;;  %5753 = vmatprep.subr.bf16.mxu1 %v8357_v40 }
 0xe44   :  { %5713 = vmatpush1.bf16.msra.mxu0 %v8361_v41  ;;  %5754 = vmatpush1.bf16.msra.mxu1 %v8363_v42 }
 0xe45   :  { %5714 = vmatprep.subr.bf16.mxu0 %v8367_v43  ;;  %5755 = vmatprep.subr.bf16.mxu1 %v8369_v44 }
 0xe48   :  { %5715 = vmatpush1.bf16.msra.mxu0 %v8373_v45  ;;  %5756 = vmatpush1.bf16.msra.mxu1 %v8375_v57 }
 0xe49   :  { %6618 = vmatprep.subr.bf16.mxu0 %v6929_v47 }
 0xeeb   :  { %v5421_v0 = vpop.f32.mrf.mxu0  ;;  %v5462_v39 = vpop.f32.mrf.mxu1 }
 0xeec   :  { %v5469_v50 = vadd.f32 %v5421_v0, %v3197_v21  ;;  %v5471_v22 = vadd.f32 %v5462_v39, %v3270_v12 }
 0xeed   :  { %v5423_v29 = vpop.f32.mrf.mxu0  ;;  %v5464_v60 = vpop.f32.mrf.mxu1 }
 0xeee   :  { %v6559_v20 = vmul.f32 -1.442695, %v5469_v50  ;;  %v5470_v37 = vadd.f32 %v5423_v29, %v3199_v5  ;;  %v5472_v35 = vadd.f32 %v5464_v60, %v3272_v32  ;;  %v8690_v5 = vld [vmem:[#allocation37_spill] sm:$0xff]  ;;  %v8691_v29 = vld [vmem:[#allocation35_spill] sm:$0xff] }
 0xeef   :  { %v5425_v14 = vpop.f32.mrf.mxu0  ;;  %v5466_v61 = vpop.f32.mrf.mxu1  ;;  %v3276_v34 = vadd.f32 %v8690_v5, %v8170_v33  ;;  %v3274_v60 = vadd.f32 %v8691_v29, %v8175_v49 }
 0xef0   :  { %7161 = vpow2.f32 %v6559_v20  ;;  %v6560_v19 = vmul.f32 -1.442695, %v5470_v37  ;;  %v6561_v15 = vmul.f32 -1.442695, %v5472_v35 }
 0xef1   :  { %v5426_v38 = vpop.f32.mrf.mxu0  ;;  %v5467_v25 = vpop.f32.mrf.mxu1 }
 0xef2   :  { %7163 = vpow2.f32 %v6560_v19  ;;  %v6597_v38 = vld [vmem:[%s8598_s8] ss:$0 sm:$0xff] }
 0xef3   :  { %7165 = vtanh.f32 %v5471_v22 }
 0xef4   :  { %7167 = vpow2.f32 %v6561_v15 }
 0xefd   :  { %v7162_v40 = vpop.eup %7161 }
 0xefe   :  { %v5476_v41 = vadd.f32 1.0, %v7162_v40 }
 0xeff   :  { %v7164_v42 = vpop.eup %7163 }
 0xf00   :  { %7169 = vrcp.f32 %v5476_v41  ;;  %v5482_v43 = vadd.f32 1.0, %v7164_v42  ;;  %v7166_v44 = vpop.eup %7165 }
 0xf01   :  { %v7168_v45 = vpop.eup %7167 }
 0xf02   :  { %7171 = vrcp.f32 %v5482_v43  ;;  %v5489_v9 = vadd.f32 1.0, %v7168_v45 }
 0xf04   :  { %7173 = vrcp.f32 %v5489_v9 }
 0xf0d   :  { %v7170_v57 = vpop.eup %7169 }
 0xf0e   :  { %v5494_v1 = vmul.f32 %v7170_v57, %v7166_v44 }
 0xf0f   :  { %v7172_v52 = vpop.eup %7171 }
 0xf10   :  { %v5493_v27 = vmul.f32 %v7172_v52, %v8492_v54 }
 0xf11   :  { %v7174_v8 = vpop.eup %7173 }
 0xf12   :  { %v8540_v23 = vadd.f32 %v5494_v1, %v5493_v27 }
 0xf14   :  { %7175 = vtanh.f32 %v8540_v23 }
 0xf21   :  { %v7176_v28 = vpop.eup %7175 }
 0xf22   :  { %v8543_v53 = vmul.f32 %v7176_v28, %v7174_v8 }
 0xf24   :  { %v5507_v58 = vpack.c.bf16 %v8543_v53, %v8543_v53 }
 0xf26   :  { %5733 = vmatmul.mubr.bf16.vlgmr.msra.gmra.mxu0 %v5507_v58  ;;  %5774 = vmatmul.mubr.bf16.vlgmr.msra.gmra.mxu1 %v5507_v58 }
 0xf27   :  { %6619 = vmatpush3.bf16.msra.mxu0 %v6929_v47  ;;  %6634 = vmatprep.mubr.bf16.mxu0 %v5823_v31 }
 0xf28   :  { %6620 = vmatprep.subr.bf16.mxu0 %v6930_v56 }
 0xf2b   :  { %6621 = vmatpush3.bf16.msra.mxu0 %v6930_v56 }
 0xf2c   :  { %6622 = vmatprep.subr.bf16.mxu0 %v6931_v6 }
 0xf2f   :  { %6623 = vmatpush3.bf16.msra.mxu0 %v6931_v6 }
 0xf30   :  { %6624 = vmatprep.subr.bf16.mxu0 %v6932_v13 }
 0xf33   :  { %6625 = vmatpush3.bf16.msra.mxu0 %v6932_v13 }
 0xf34   :  { %6626 = vmatprep.subr.bf16.mxu0 %v6933_v51 }
 0xf37   :  { %6627 = vmatpush3.bf16.msra.mxu0 %v6933_v51 }
 0xf38   :  { %6628 = vmatprep.subr.bf16.mxu0 %v6934_v10 }
 0xf3b   :  { %6629 = vmatpush3.bf16.msra.mxu0 %v6934_v10 }
 0xf3c   :  { %6630 = vmatprep.subr.bf16.mxu0 %v6935_v59 }
 0xf3f   :  { %6631 = vmatpush3.bf16.msra.mxu0 %v6935_v59 }
 0xf40   :  { %6632 = vmatprep.subr.bf16.mxu0 %v6936_v17 }
 0xf43   :  { %6633 = vmatpush3.bf16.msra.mxu0 %v6936_v17 }
 0xf46   :  { %6635 = vmatmul.mubr.bf16.vlgmr.msra.gmra.mxu0 %v5824_v46 }
 0xf47   :  { %6638 = vmatprep.mubr.bf16.mxu0 %v5825_v30 }
 0xfe6   :  { %v5734_v54 = vpop.f32.mrf.mxu0  ;;  %v5775_v24 = vpop.f32.mrf.mxu1 }
 0xfe7   :  { %v5782_v47 = vadd.f32 %v5734_v54, %v3201_v16  ;;  %v5784_v62 = vadd.f32 %v5775_v24, %v3274_v60 }
 0xfe8   :  { %v5736_v36 = vpop.f32.mrf.mxu0  ;;  %v5777_v21 = vpop.f32.mrf.mxu1 }
 0xfe9   :  { %v6594_v0 = vmul.f32 -1.442695, %v5782_v47  ;;  %v5783_v39 = vadd.f32 %v5736_v36, %v3203_v26  ;;  %v5785_v50 = vadd.f32 %v5777_v21, %v3276_v34 }
 0xfea   :  { %v5738_v7 = vpop.f32.mrf.mxu0  ;;  %v5779_v55 = vpop.f32.mrf.mxu1 }
 0xfeb   :  { %7177 = vpow2.f32 %v6594_v0  ;;  %v6595_v4 = vmul.f32 -1.442695, %v5783_v39  ;;  %v6596_v20 = vmul.f32 -1.442695, %v5785_v50 }
 0xfec   :  { %v5739_v3 = vpop.f32.mrf.mxu0  ;;  %v5780_v63 = vpop.f32.mrf.mxu1 }
 0xfed   :  { %7179 = vpow2.f32 %v6595_v4 }
 0xfee   :  { %7181 = vtanh.f32 %v5784_v62 }
 0xfef   :  { %7183 = vpow2.f32 %v6596_v20 }
 0xff8   :  { %v7178_v37 = vpop.eup %7177 }
 0xff9   :  { %v5789_v14 = vadd.f32 1.0, %v7178_v37 }
 0xffa   :  { %v7180_v61 = vpop.eup %7179 }
 0xffb   :  { %7185 = vrcp.f32 %v5789_v14  ;;  %v5795_v19 = vadd.f32 1.0, %v7180_v61  ;;  %v7182_v25 = vpop.eup %7181 }
 0xffc   :  { %v7184_v11 = vpop.eup %7183 }
 0xffd   :  { %7187 = vrcp.f32 %v5795_v19  ;;  %v5802_v15 = vadd.f32 1.0, %v7184_v11 }
 0xfff   :  { %7189 = vrcp.f32 %v5802_v15 }
0x1006   :  { %v6636_v33 = vpop.f32.mrf.mxu0 }
0x1007   :  { %v5941_v32 = vadd.f32 %v6636_v33, %v6597_v38 }
0x1008   :  { %v7186_v35 = vpop.eup %7185  ;;  %v5932_v49 = vpop.f32.mrf.mxu0 }
0x1009   :  { %v5807_v2 = vmul.f32 %v7186_v35, %v7182_v25  ;;  %5965 = vst [vmem:[%s8599_s9 + $0x10] sm:$0xff] %v5941_v32  ;;  %v5933_v12 = vadd.f32 %v6597_v38, %v5932_v49 }
0x100a   :  { %v7188_v22 = vpop.eup %7187  ;;  %v6637_v40 = vpop.f32.mrf.mxu0 }
0x100b   :  { %v5806_v41 = vmul.f32 %v7188_v22, %v8540_v23  ;;  %5963 = vst [vmem:[%s8599_s9] sm:$0xff] %v5933_v12  ;;  %v5944_v42 = vadd.f32 %v6637_v40, %v6597_v38 }
0x100c   :  { %v5935_v43 = vpop.f32.mrf.mxu0  ;;  %v7190_v57 = vpop.eup %7189 }
0x100d   :  { %5966 = vst [vmem:[%s8599_s9 + $0x18] sm:$0xff] %v5944_v42  ;;  %v5936_v44 = vadd.f32 %v6597_v38, %v5935_v43  ;;  %v5808_v45 = vadd.f32 %v5807_v2, %v5806_v41 }
0x100f   :  { %5964 = vst [vmem:[%s8599_s9 + $0x8] sm:$0xff] %v5936_v44  ;;  %7191 = vtanh.f32 %v5808_v45 }
0x101c   :  { %v7192_v1 = vpop.eup %7191 }
0x101d   :  { %v5810_v52 = vmul.f32 %v7192_v1, %v7190_v57 }
0x101f   :  { %v5826_v9 = vpack.c.bf16 %v5810_v52, %v8543_v53 }
0x1021   :  { %6639 = vmatmul.mubr.bf16.gmra.mxu0 %v5826_v9 }
0x10e1   :  { %v6640_v27 = vpop.f32.mrf.mxu0 }
0x10e2   :  { %v5957_v23 = vadd.f32 %v6640_v27, %v6597_v38 }
0x10e3   :  { %v5948_v8 = vpop.f32.mrf.mxu0 }
0x10e4   :  { %5969 = vst [vmem:[%s8599_s9 + $0x30] sm:$0xff] %v5957_v23  ;;  %v5949_v28 = vadd.f32 %v6597_v38, %v5948_v8 }
0x10e5   :  { %v6641_v58 = vpop.f32.mrf.mxu0 }
0x10e6   :  { %5967 = vst [vmem:[%s8599_s9 + $0x20] sm:$0xff] %v5949_v28  ;;  %v5960_v56 = vadd.f32 %v6641_v58, %v6597_v38 }
0x10e7   :  { %v5951_v31 = vpop.f32.mrf.mxu0 }
0x10e8   :  { %5970 = vst [vmem:[%s8599_s9 + $0x38] sm:$0xff] %v5960_v56  ;;  %v5952_v53 = vadd.f32 %v6597_v38, %v5951_v31 }
0x10ea   :  { %5968 = vst [vmem:[%s8599_s9 + $0x28] sm:$0xff] %v5952_v53 }
0x10eb   :  { %5975 = vsyncpa [#allocation8], 1 }
0x10ec   :  { %5976 = vsyncpa [#allocation10], 1 }
0x10ed   :  { %5977 = vsyncpa [#allocation13], 1 }

</bundles_post_ra>
